<compile_context>
chip_gen: v7x
topology: tpu7x:2x2x1
jax: 0.10.0
libtpu: 0.0.40
codegen_flags: <defaults>
</compile_context>

<pallas_src>
import jax
import jax.numpy as jnp
from jax import lax
from jax.experimental import pallas as pl
from jax.experimental.pallas import tpu as pltpu

LANE = 128


def _round_up(n, m):
    return (n + m - 1) // m * m


def _softplus_torch(x):
    # Matches torch.nn.functional.softplus (beta=1, threshold=20).
    return jnp.where(x > 20.0, x, jnp.log(1.0 + jnp.exp(jnp.minimum(x, 20.0))))


# ---------------------------------------------------------------------------
# Kernels
# ---------------------------------------------------------------------------

def _matmul_bias_relu_kernel(x_ref, w_ref, b_ref, o_ref):
    # x: (TM, K)  activations (im2col patches)
    # w: (K, Np)  pre-transposed weight, lane-padded to a multiple of 128
    # b: (1, Np)  lane-padded bias
    acc = jnp.dot(x_ref[...], w_ref[...], preferred_element_type=jnp.float32)
    o_ref[...] = jnp.maximum(acc + b_ref[...], 0.0).astype(o_ref.dtype)


def _head_kernel(xf_ref, w5_ref, b5_ref, wl_ref, bl_ref, ws_ref, bs_ref,
                 locs_ref, scales_ref):
    # Fused final stage: conv5-as-linear + ReLU + locs head + scales head.
    xf = xf_ref[...]                                               # (B, K5)
    h = jnp.dot(xf, w5_ref[...], preferred_element_type=jnp.float32) + b5_ref[...]
    h = jnp.maximum(h, 0.0)                                        # (B, hidden)

    locs = jnp.dot(h, wl_ref[...], preferred_element_type=jnp.float32) + bl_ref[...]
    locs_ref[...] = locs.astype(locs_ref.dtype)

    s = jnp.dot(h, ws_ref[...], preferred_element_type=jnp.float32) + bs_ref[...]
    scales_ref[...] = jnp.maximum(_softplus_torch(s), 0.001).astype(scales_ref.dtype)


# ---------------------------------------------------------------------------
# Wrappers
# ---------------------------------------------------------------------------

def _im2col(x, k, stride, pad):
    """(B, C, H, W) -> ((B*Hout*Wout, C*k*k), Hout, Wout).

    Patch-axis flattening order is (c, kh, kw) to match a flattened PyTorch
    Conv2d weight (Cout, Cin, kh, kw).
    """
    B, C, H, W = x.shape
    if pad > 0:
        x = jnp.pad(x, ((0, 0), (0, 0), (pad, pad), (pad, pad)))
    Hp, Wp = H + 2 * pad, W + 2 * pad
    Hout = (Hp - k) // stride + 1
    Wout = (Wp - k) // stride + 1
    slices = []
    for ki in range(k):
        for kj in range(k):
            slices.append(x[:, :,
                            ki:ki + stride * (Hout - 1) + 1:stride,
                            kj:kj + stride * (Wout - 1) + 1:stride])
    patches = jnp.stack(slices, axis=2)            # (B, C, k*k, Hout, Wout)
    patches = patches.transpose(0, 3, 4, 1, 2)     # (B, Hout, Wout, C, k*k)
    return patches.reshape(B * Hout * Wout, C * k * k), Hout, Wout


def conv2d_relu_pallas(x, w, b, *, stride, pad, tm_max=512):
    """Conv2d(k=4) + ReLU as im2col + Pallas matmul with fused bias+ReLU."""
    B, Cin, _, _ = x.shape
    Cout, Cin_w, kh, kw = w.shape
    assert Cin == Cin_w and kh == kw == 4

    patches, Hout, Wout = _im2col(x, kh, stride, pad)
    M, K = patches.shape

    # Pre-transposed, lane-padded weight/bias (lane-dense output stores).
    Np = _round_up(Cout, LANE)
    w_t = jnp.pad(w.reshape(Cout, K).T, ((0, 0), (0, Np - Cout)))   # (K, Np)
    b_p = jnp.pad(b.reshape(1, Cout), ((0, 0), (0, Np - Cout)))     # (1, Np)

    tm = min(M, tm_max)
    out = pl.pallas_call(
        _matmul_bias_relu_kernel,
        out_shape=jax.ShapeDtypeStruct((M, Np), jnp.float32),
        grid=(pl.cdiv(M, tm),),
        in_specs=[
            pl.BlockSpec((tm, K), lambda i: (i, 0)),    # activations: row-tiled
            pl.BlockSpec((K, Np), lambda i: (0, 0)),    # weight: VMEM-resident
            pl.BlockSpec((1, Np), lambda i: (0, 0)),    # bias: VMEM-resident
        ],
        out_specs=pl.BlockSpec((tm, Np), lambda i: (i, 0)),
        compiler_params=pltpu.CompilerParams(
            dimension_semantics=("parallel",),
        ),
    )(patches, w_t, b_p)

    out = out[:, :Cout]                                         # drop lane pad
    return out.reshape(B, Hout, Wout, Cout).transpose(0, 3, 1, 2)  # NCHW


def encoder_head_pallas(x4, w5, b5, wl, bl, ws, bs):
    """Fused conv5(128->hidden,4,1)+ReLU + locs Linear + scales Linear+softplus+clamp."""
    B = x4.shape[0]
    hidden_dim = w5.shape[0]
    z_dim = wl.shape[0]
    K5 = w5.shape[1] * w5.shape[2] * w5.shape[3]                 # Cin*4*4

    xf = x4.reshape(B, K5)                                       # (B, 2048)
    Zp = _round_up(z_dim, LANE)

    w5_t = w5.reshape(hidden_dim, K5).T                          # (K5, hidden)
    b5_r = b5.reshape(1, hidden_dim)
    wl_t = jnp.pad(wl.T, ((0, 0), (0, Zp - z_dim)))              # (hidden, Zp)
    bl_p = jnp.pad(bl.reshape(1, z_dim), ((0, 0), (0, Zp - z_dim)))
    ws_t = jnp.pad(ws.T, ((0, 0), (0, Zp - z_dim)))
    bs_p = jnp.pad(bs.reshape(1, z_dim), ((0, 0), (0, Zp - z_dim)))

    locs_p, scales_p = pl.pallas_call(
        _head_kernel,
        out_shape=(jax.ShapeDtypeStruct((B, Zp), jnp.float32),
                   jax.ShapeDtypeStruct((B, Zp), jnp.float32)),
        in_specs=[
            pl.BlockSpec((B, K5), lambda: (0, 0)),
            pl.BlockSpec((K5, hidden_dim), lambda: (0, 0)),
            pl.BlockSpec((1, hidden_dim), lambda: (0, 0)),
            pl.BlockSpec((hidden_dim, Zp), lambda: (0, 0)),
            pl.BlockSpec((1, Zp), lambda: (0, 0)),
            pl.BlockSpec((hidden_dim, Zp), lambda: (0, 0)),
            pl.BlockSpec((1, Zp), lambda: (0, 0)),
        ],
        out_specs=(pl.BlockSpec((B, Zp), lambda: (0, 0)),
                   pl.BlockSpec((B, Zp), lambda: (0, 0))),
    )(xf, w5_t, b5_r, wl_t, bl_p, ws_t, bs_p)

    return locs_p[:, :z_dim], scales_p[:, :z_dim]


def celeba_encoder_forward(x, params):
    (w1, b1), (w2, b2), (w3, b3), (w4, b4), (w5, b5) = params["convs"]
    h = conv2d_relu_pallas(x, w1, b1, stride=2, pad=1)
    h = conv2d_relu_pallas(h, w2, b2, stride=2, pad=1)
    h = conv2d_relu_pallas(h, w3, b3, stride=2, pad=1)
    h = conv2d_relu_pallas(h, w4, b4, stride=2, pad=1)
    return encoder_head_pallas(h, w5, b5,
                               params["locs_w"], params["locs_b"],
                               params["scales_w"], params["scales_b"])


# ---------------------------------------------------------------------------
# Pure-JAX reference
# ---------------------------------------------------------------------------

def celeba_encoder_reference(x, params):
    dn = ("NCHW", "OIHW", "NCHW")
    strides_pads = [(2, 1), (2, 1), (2, 1), (2, 1), (1, 0)]
    h = x
    for (w, b), (s, p) in zip(params["convs"], strides_pads):
        h = lax.conv_general_dilated(h, w, (s, s), [(p, p), (p, p)],
                                     dimension_numbers=dn)
        h = jnp.maximum(h + b.reshape(1, -1, 1, 1), 0.0)
    h = h.reshape(x.shape[0], -1)
    locs = h @ params["locs_w"].T + params["locs_b"]
    s = h @ params["scales_w"].T + params["scales_b"]
    scales = jnp.maximum(_softplus_torch(s), 0.001)
    return locs, scales


if __name__ == "__main__":
    batch = 2
    z_dim = 16
    hidden_dim = 64      # constructor arg (default 256); small for smoke test
    H = W = 64           # CELEBA: 4 stride-2 convs + final 4x4 conv -> 1x1

    key = jax.random.PRNGKey(0)
    keys = list(jax.random.split(key, 8))
    ki = iter(keys)

    def conv_init(k, cout, cin):
        fan_in = cin * 16
        bound = 1.0 / (fan_in ** 0.5)
        kw_, kb_ = jax.random.split(k)
        w = jax.random.uniform(kw_, (cout, cin, 4, 4), jnp.float32, -bound, bound)
        b = jax.random.uniform(kb_, (cout,), jnp.float32, -bound, bound)
        return w, b

    def linear_init(k, out_f, in_f):
        bound = 1.0 / (in_f ** 0.5)
        kw_, kb_ = jax.random.split(k)
        w = jax.random.uniform(kw_, (out_f, in_f), jnp.float32, -bound, bound)
        b = jax.random.uniform(kb_, (out_f,), jnp.float32, -bound, bound)
        return w, b

    convs = [
        conv_init(next(ki), 32, 3),
        conv_init(next(ki), 32, 32),
        conv_init(next(ki), 64, 32),
        conv_init(next(ki), 128, 64),
        conv_init(next(ki), hidden_dim, 128),
    ]
    locs_w, locs_b = linear_init(next(ki), z_dim, hidden_dim)
    scales_w, scales_b = linear_init(next(ki), z_dim, hidden_dim)
    params = dict(convs=convs, locs_w=locs_w, locs_b=locs_b,
                  scales_w=scales_w, scales_b=scales_b)

    x = jax.random.normal(next(ki), (batch, 3, H, W), dtype=jnp.float32)

    fwd = jax.jit(celeba_encoder_forward)
    locs, scales = jax.block_until_ready(fwd(x, params))

    locs_ref, scales_ref = celeba_encoder_reference(x, params)
    assert locs.shape == (batch, z_dim) and scales.shape == (batch, z_dim)
    assert bool(jnp.all(scales >= 0.001))
    assert jnp.allclose(locs, locs_ref, atol=2e-2, rtol=2e-2), \
        float(jnp.max(jnp.abs(locs - locs_ref)))
    assert jnp.allclose(scales, scales_ref, atol=2e-2, rtol=2e-2), \
        float(jnp.max(jnp.abs(scales - scales_ref)))

    print("KERNEL_OK")
</pallas_src>

<mosaic_0001>
module attributes {stable_mosaic.version = 11 : i64} {
  func.func @_matmul_bias_relu_kernel(%arg0: i32, %arg1: memref<512x48xf32, #tpu.memory_space<vmem>>, %arg2: memref<48x128xf32, #tpu.memory_space<vmem>>, %arg3: memref<1x128xf32, #tpu.memory_space<vmem>>, %arg4: memref<512x128xf32, #tpu.memory_space<vmem>>) attributes {dimension_semantics = [#tpu.dimension_semantics<parallel>], iteration_bounds = array<i64: 4>, scalar_prefetch = 0 : i64, scratch_operands = 0 : i64, tpu.core_type = #tpu.core_type<tc>, window_params = [{transform_indices = @transform_0, window_bounds = array<i64: 512, 48>}, {pipeline_mode = #tpu.pipeline_mode<synchronous>, transform_indices = @transform_1, window_bounds = array<i64: 48, 128>}, {pipeline_mode = #tpu.pipeline_mode<synchronous>, transform_indices = @transform_2, window_bounds = array<i64: 1, 128>}, {transform_indices = @transform_3, window_bounds = array<i64: 512, 128>}]} {
    %c0 = arith.constant 0 : index
    %c0_0 = arith.constant 0 : index
    %0 = vector.load %arg1[%c0, %c0_0] : memref<512x48xf32, #tpu.memory_space<vmem>>, vector<512x48xf32>
    %c0_1 = arith.constant 0 : index
    %c0_2 = arith.constant 0 : index
    %1 = vector.load %arg2[%c0_1, %c0_2] : memref<48x128xf32, #tpu.memory_space<vmem>>, vector<48x128xf32>
    %cst = arith.constant dense<0.000000e+00> : vector<512x128xf32>
    %2 = tpu.matmul %0, %1, %cst {dimension_numbers = #tpu.dot_dimension_numbers<[1], [0], [0], [1], [0, 0, 1, 1], [], []>} : vector<512x48xf32>, vector<48x128xf32>, vector<512x128xf32> -> vector<512x128xf32>
    %c0_3 = arith.constant 0 : index
    %c0_4 = arith.constant 0 : index
    %3 = vector.load %arg3[%c0_3, %c0_4] : memref<1x128xf32, #tpu.memory_space<vmem>>, vector<1x128xf32>
    %4 = vector.broadcast %3 : vector<1x128xf32> to vector<512x128xf32>
    %5 = arith.addf %2, %4 : vector<512x128xf32>
    %cst_5 = arith.constant 0.000000e+00 : f32
    %6 = vector.broadcast %cst_5 : f32 to vector<512x128xf32>
    %7 = arith.maximumf %5, %6 : vector<512x128xf32>
    %c0_6 = arith.constant 0 : index
    %c0_7 = arith.constant 0 : index
    %8 = vector.load %arg4[%c0_6, %c0_7] : memref<512x128xf32, #tpu.memory_space<vmem>>, vector<512x128xf32>
    tpu.vector_store %arg4[%c0_6, %c0_7], %7 {strides = array<i32>} : memref<512x128xf32, #tpu.memory_space<vmem>>, vector<512x128xf32>,
    return
  }
  func.func @transform_0(%arg0: i32) -> (i32, i32) {
    %c0_i32 = arith.constant 0 : i32
    %c0_i32_0 = arith.constant 0 : i32
    return %arg0, %c0_i32 : i32, i32
  }
  func.func @transform_1(%arg0: i32) -> (i32, i32) {
    %c0_i32 = arith.constant 0 : i32
    %c0_i32_0 = arith.constant 0 : i32
    %c0_i32_1 = arith.constant 0 : i32
    return %c0_i32, %c0_i32_0 : i32, i32
  }
  func.func @transform_2(%arg0: i32) -> (i32, i32) {
    %c0_i32 = arith.constant 0 : i32
    %c0_i32_0 = arith.constant 0 : i32
    %c0_i32_1 = arith.constant 0 : i32
    return %c0_i32, %c0_i32_0 : i32, i32
  }
  func.func @transform_3(%arg0: i32) -> (i32, i32) {
    %c0_i32 = arith.constant 0 : i32
    %c0_i32_0 = arith.constant 0 : i32
    return %arg0, %c0_i32 : i32, i32
  }
}

module attributes {stable_mosaic.version = 11 : i64} {
  func.func @_matmul_bias_relu_kernel(%arg0: i32, %arg1: memref<512x512xf32, #tpu.memory_space<vmem>>, %arg2: memref<512x128xf32, #tpu.memory_space<vmem>>, %arg3: memref<1x128xf32, #tpu.memory_space<vmem>>, %arg4: memref<512x128xf32, #tpu.memory_space<vmem>>) attributes {dimension_semantics = [#tpu.dimension_semantics<parallel>], iteration_bounds = array<i64: 1>, scalar_prefetch = 0 : i64, scratch_operands = 0 : i64, tpu.core_type = #tpu.core_type<tc>, window_params = [{transform_indices = @transform_0, window_bounds = array<i64: 512, 512>}, {pipeline_mode = #tpu.pipeline_mode<synchronous>, transform_indices = @transform_1, window_bounds = array<i64: 512, 128>}, {pipeline_mode = #tpu.pipeline_mode<synchronous>, transform_indices = @transform_2, window_bounds = array<i64: 1, 128>}, {transform_indices = @transform_3, window_bounds = array<i64: 512, 128>}]} {
    %c0 = arith.constant 0 : index
    %c0_0 = arith.constant 0 : index
    %0 = vector.load %arg1[%c0, %c0_0] : memref<512x512xf32, #tpu.memory_space<vmem>>, vector<512x512xf32>
    %c0_1 = arith.constant 0 : index
    %c0_2 = arith.constant 0 : index
    %1 = vector.load %arg2[%c0_1, %c0_2] : memref<512x128xf32, #tpu.memory_space<vmem>>, vector<512x128xf32>
    %cst = arith.constant dense<0.000000e+00> : vector<512x128xf32>
    %2 = tpu.matmul %0, %1, %cst {dimension_numbers = #tpu.dot_dimension_numbers<[1], [0], [0], [1], [0, 0, 1, 1], [], []>} : vector<512x512xf32>, vector<512x128xf32>, vector<512x128xf32> -> vector<512x128xf32>
    %c0_3 = arith.constant 0 : index
    %c0_4 = arith.constant 0 : index
    %3 = vector.load %arg3[%c0_3, %c0_4] : memref<1x128xf32, #tpu.memory_space<vmem>>, vector<1x128xf32>
    %4 = vector.broadcast %3 : vector<1x128xf32> to vector<512x128xf32>
    %5 = arith.addf %2, %4 : vector<512x128xf32>
    %cst_5 = arith.constant 0.000000e+00 : f32
    %6 = vector.broadcast %cst_5 : f32 to vector<512x128xf32>
    %7 = arith.maximumf %5, %6 : vector<512x128xf32>
    %c0_6 = arith.constant 0 : index
    %c0_7 = arith.constant 0 : index
    %8 = vector.load %arg4[%c0_6, %c0_7] : memref<512x128xf32, #tpu.memory_space<vmem>>, vector<512x128xf32>
    tpu.vector_store %arg4[%c0_6, %c0_7], %7 {strides = array<i32>} : memref<512x128xf32, #tpu.memory_space<vmem>>, vector<512x128xf32>,
    return
  }
  func.func @transform_0(%arg0: i32) -> (i32, i32) {
    %c0_i32 = arith.constant 0 : i32
    %c0_i32_0 = arith.constant 0 : i32
    return %arg0, %c0_i32 : i32, i32
  }
  func.func @transform_1(%arg0: i32) -> (i32, i32) {
    %c0_i32 = arith.constant 0 : i32
    %c0_i32_0 = arith.constant 0 : i32
    %c0_i32_1 = arith.constant 0 : i32
    return %c0_i32, %c0_i32_0 : i32, i32
  }
  func.func @transform_2(%arg0: i32) -> (i32, i32) {
    %c0_i32 = arith.constant 0 : i32
    %c0_i32_0 = arith.constant 0 : i32
    %c0_i32_1 = arith.constant 0 : i32
    return %c0_i32, %c0_i32_0 : i32, i32
  }
  func.func @transform_3(%arg0: i32) -> (i32, i32) {
    %c0_i32 = arith.constant 0 : i32
    %c0_i32_0 = arith.constant 0 : i32
    return %arg0, %c0_i32 : i32, i32
  }
}

module attributes {stable_mosaic.version = 11 : i64} {
  func.func @_matmul_bias_relu_kernel(%arg0: i32, %arg1: memref<128x512xf32, #tpu.memory_space<vmem>>, %arg2: memref<512x128xf32, #tpu.memory_space<vmem>>, %arg3: memref<1x128xf32, #tpu.memory_space<vmem>>, %arg4: memref<128x128xf32, #tpu.memory_space<vmem>>) attributes {dimension_semantics = [#tpu.dimension_semantics<parallel>], iteration_bounds = array<i64: 1>, scalar_prefetch = 0 : i64, scratch_operands = 0 : i64, tpu.core_type = #tpu.core_type<tc>, window_params = [{transform_indices = @transform_0, window_bounds = array<i64: 128, 512>}, {pipeline_mode = #tpu.pipeline_mode<synchronous>, transform_indices = @transform_1, window_bounds = array<i64: 512, 128>}, {pipeline_mode = #tpu.pipeline_mode<synchronous>, transform_indices = @transform_2, window_bounds = array<i64: 1, 128>}, {transform_indices = @transform_3, window_bounds = array<i64: 128, 128>}]} {
    %c0 = arith.constant 0 : index
    %c0_0 = arith.constant 0 : index
    %0 = vector.load %arg1[%c0, %c0_0] : memref<128x512xf32, #tpu.memory_space<vmem>>, vector<128x512xf32>
    %c0_1 = arith.constant 0 : index
    %c0_2 = arith.constant 0 : index
    %1 = vector.load %arg2[%c0_1, %c0_2] : memref<512x128xf32, #tpu.memory_space<vmem>>, vector<512x128xf32>
    %cst = arith.constant dense<0.000000e+00> : vector<128x128xf32>
    %2 = tpu.matmul %0, %1, %cst {dimension_numbers = #tpu.dot_dimension_numbers<[1], [0], [0], [1], [0, 0, 1, 1], [], []>} : vector<128x512xf32>, vector<512x128xf32>, vector<128x128xf32> -> vector<128x128xf32>
    %c0_3 = arith.constant 0 : index
    %c0_4 = arith.constant 0 : index
    %3 = vector.load %arg3[%c0_3, %c0_4] : memref<1x128xf32, #tpu.memory_space<vmem>>, vector<1x128xf32>
    %4 = vector.broadcast %3 : vector<1x128xf32> to vector<128x128xf32>
    %5 = arith.addf %2, %4 : vector<128x128xf32>
    %cst_5 = arith.constant 0.000000e+00 : f32
    %6 = vector.broadcast %cst_5 : f32 to vector<128x128xf32>
    %7 = arith.maximumf %5, %6 : vector<128x128xf32>
    %c0_6 = arith.constant 0 : index
    %c0_7 = arith.constant 0 : index
    %8 = vector.load %arg4[%c0_6, %c0_7] : memref<128x128xf32, #tpu.memory_space<vmem>>, vector<128x128xf32>
    tpu.vector_store %arg4[%c0_6, %c0_7], %7 {strides = array<i32>} : memref<128x128xf32, #tpu.memory_space<vmem>>, vector<128x128xf32>,
    return
  }
  func.func @transform_0(%arg0: i32) -> (i32, i32) {
    %c0_i32 = arith.constant 0 : i32
    %c0_i32_0 = arith.constant 0 : i32
    return %arg0, %c0_i32 : i32, i32
  }
  func.func @transform_1(%arg0: i32) -> (i32, i32) {
    %c0_i32 = arith.constant 0 : i32
    %c0_i32_0 = arith.constant 0 : i32
    %c0_i32_1 = arith.constant 0 : i32
    return %c0_i32, %c0_i32_0 : i32, i32
  }
  func.func @transform_2(%arg0: i32) -> (i32, i32) {
    %c0_i32 = arith.constant 0 : i32
    %c0_i32_0 = arith.constant 0 : i32
    %c0_i32_1 = arith.constant 0 : i32
    return %c0_i32, %c0_i32_0 : i32, i32
  }
  func.func @transform_3(%arg0: i32) -> (i32, i32) {
    %c0_i32 = arith.constant 0 : i32
    %c0_i32_0 = arith.constant 0 : i32
    return %arg0, %c0_i32 : i32, i32
  }
}

module attributes {stable_mosaic.version = 11 : i64} {
  func.func @_matmul_bias_relu_kernel(%arg0: i32, %arg1: memref<32x1024xf32, #tpu.memory_space<vmem>>, %arg2: memref<1024x128xf32, #tpu.memory_space<vmem>>, %arg3: memref<1x128xf32, #tpu.memory_space<vmem>>, %arg4: memref<32x128xf32, #tpu.memory_space<vmem>>) attributes {dimension_semantics = [#tpu.dimension_semantics<parallel>], iteration_bounds = array<i64: 1>, scalar_prefetch = 0 : i64, scratch_operands = 0 : i64, tpu.core_type = #tpu.core_type<tc>, window_params = [{transform_indices = @transform_0, window_bounds = array<i64: 32, 1024>}, {pipeline_mode = #tpu.pipeline_mode<synchronous>, transform_indices = @transform_1, window_bounds = array<i64: 1024, 128>}, {pipeline_mode = #tpu.pipeline_mode<synchronous>, transform_indices = @transform_2, window_bounds = array<i64: 1, 128>}, {transform_indices = @transform_3, window_bounds = array<i64: 32, 128>}]} {
    %c0 = arith.constant 0 : index
    %c0_0 = arith.constant 0 : index
    %0 = vector.load %arg1[%c0, %c0_0] : memref<32x1024xf32, #tpu.memory_space<vmem>>, vector<32x1024xf32>
    %c0_1 = arith.constant 0 : index
    %c0_2 = arith.constant 0 : index
    %1 = vector.load %arg2[%c0_1, %c0_2] : memref<1024x128xf32, #tpu.memory_space<vmem>>, vector<1024x128xf32>
    %cst = arith.constant dense<0.000000e+00> : vector<32x128xf32>
    %2 = tpu.matmul %0, %1, %cst {dimension_numbers = #tpu.dot_dimension_numbers<[1], [0], [0], [1], [0, 0, 1, 1], [], []>} : vector<32x1024xf32>, vector<1024x128xf32>, vector<32x128xf32> -> vector<32x128xf32>
    %c0_3 = arith.constant 0 : index
    %c0_4 = arith.constant 0 : index
    %3 = vector.load %arg3[%c0_3, %c0_4] : memref<1x128xf32, #tpu.memory_space<vmem>>, vector<1x128xf32>
    %4 = vector.broadcast %3 : vector<1x128xf32> to vector<32x128xf32>
    %5 = arith.addf %2, %4 : vector<32x128xf32>
    %cst_5 = arith.constant 0.000000e+00 : f32
    %6 = vector.broadcast %cst_5 : f32 to vector<32x128xf32>
    %7 = arith.maximumf %5, %6 : vector<32x128xf32>
    %c0_6 = arith.constant 0 : index
    %c0_7 = arith.constant 0 : index
    %8 = vector.load %arg4[%c0_6, %c0_7] : memref<32x128xf32, #tpu.memory_space<vmem>>, vector<32x128xf32>
    tpu.vector_store %arg4[%c0_6, %c0_7], %7 {strides = array<i32>} : memref<32x128xf32, #tpu.memory_space<vmem>>, vector<32x128xf32>,
    return
  }
  func.func @transform_0(%arg0: i32) -> (i32, i32) {
    %c0_i32 = arith.constant 0 : i32
    %c0_i32_0 = arith.constant 0 : i32
    return %arg0, %c0_i32 : i32, i32
  }
  func.func @transform_1(%arg0: i32) -> (i32, i32) {
    %c0_i32 = arith.constant 0 : i32
    %c0_i32_0 = arith.constant 0 : i32
    %c0_i32_1 = arith.constant 0 : i32
    return %c0_i32, %c0_i32_0 : i32, i32
  }
  func.func @transform_2(%arg0: i32) -> (i32, i32) {
    %c0_i32 = arith.constant 0 : i32
    %c0_i32_0 = arith.constant 0 : i32
    %c0_i32_1 = arith.constant 0 : i32
    return %c0_i32, %c0_i32_0 : i32, i32
  }
  func.func @transform_3(%arg0: i32) -> (i32, i32) {
    %c0_i32 = arith.constant 0 : i32
    %c0_i32_0 = arith.constant 0 : i32
    return %arg0, %c0_i32 : i32, i32
  }
}

module attributes {stable_mosaic.version = 11 : i64} {
  func.func @_head_kernel(%arg0: memref<2x2048xf32, #tpu.memory_space<vmem>>, %arg1: memref<2048x64xf32, #tpu.memory_space<vmem>>, %arg2: memref<1x64xf32, #tpu.memory_space<vmem>>, %arg3: memref<64x128xf32, #tpu.memory_space<vmem>>, %arg4: memref<1x128xf32, #tpu.memory_space<vmem>>, %arg5: memref<64x128xf32, #tpu.memory_space<vmem>>, %arg6: memref<1x128xf32, #tpu.memory_space<vmem>>, %arg7: memref<2x128xf32, #tpu.memory_space<vmem>>, %arg8: memref<2x128xf32, #tpu.memory_space<vmem>>) attributes {dimension_semantics = [], scalar_prefetch = 0 : i64, scratch_operands = 0 : i64, tpu.core_type = #tpu.core_type<tc>} {
    %c0 = arith.constant 0 : index
    %c0_0 = arith.constant 0 : index
    %0 = vector.load %arg0[%c0, %c0_0] : memref<2x2048xf32, #tpu.memory_space<vmem>>, vector<2x2048xf32>
    %c0_1 = arith.constant 0 : index
    %c0_2 = arith.constant 0 : index
    %1 = vector.load %arg1[%c0_1, %c0_2] : memref<2048x64xf32, #tpu.memory_space<vmem>>, vector<2048x64xf32>
    %cst = arith.constant dense<0.000000e+00> : vector<2x64xf32>
    %2 = tpu.matmul %0, %1, %cst {dimension_numbers = #tpu.dot_dimension_numbers<[1], [0], [0], [1], [0, 0, 1, 1], [], []>} : vector<2x2048xf32>, vector<2048x64xf32>, vector<2x64xf32> -> vector<2x64xf32>
    %c0_3 = arith.constant 0 : index
    %c0_4 = arith.constant 0 : index
    %3 = vector.load %arg2[%c0_3, %c0_4] : memref<1x64xf32, #tpu.memory_space<vmem>>, vector<1x64xf32>
    %4 = vector.broadcast %3 : vector<1x64xf32> to vector<2x64xf32>
    %5 = arith.addf %2, %4 : vector<2x64xf32>
    %cst_5 = arith.constant 0.000000e+00 : f32
    %6 = vector.broadcast %cst_5 : f32 to vector<2x64xf32>
    %7 = arith.maximumf %5, %6 : vector<2x64xf32>
    %c0_6 = arith.constant 0 : index
    %c0_7 = arith.constant 0 : index
    %8 = vector.load %arg3[%c0_6, %c0_7] : memref<64x128xf32, #tpu.memory_space<vmem>>, vector<64x128xf32>
    %cst_8 = arith.constant dense<0.000000e+00> : vector<2x128xf32>
    %9 = tpu.matmul %7, %8, %cst_8 {dimension_numbers = #tpu.dot_dimension_numbers<[1], [0], [0], [1], [0, 0, 1, 1], [], []>} : vector<2x64xf32>, vector<64x128xf32>, vector<2x128xf32> -> vector<2x128xf32>
    %c0_9 = arith.constant 0 : index
    %c0_10 = arith.constant 0 : index
    %10 = vector.load %arg4[%c0_9, %c0_10] : memref<1x128xf32, #tpu.memory_space<vmem>>, vector<1x128xf32>
    %11 = vector.broadcast %10 : vector<1x128xf32> to vector<2x128xf32>
    %12 = arith.addf %9, %11 : vector<2x128xf32>
    %c0_11 = arith.constant 0 : index
    %c0_12 = arith.constant 0 : index
    %13 = vector.load %arg7[%c0_11, %c0_12] : memref<2x128xf32, #tpu.memory_space<vmem>>, vector<2x128xf32>
    tpu.vector_store %arg7[%c0_11, %c0_12], %12 {strides = array<i32>} : memref<2x128xf32, #tpu.memory_space<vmem>>, vector<2x128xf32>,
    %c0_13 = arith.constant 0 : index
    %c0_14 = arith.constant 0 : index
    %14 = vector.load %arg5[%c0_13, %c0_14] : memref<64x128xf32, #tpu.memory_space<vmem>>, vector<64x128xf32>
    %cst_15 = arith.constant dense<0.000000e+00> : vector<2x128xf32>
    %15 = tpu.matmul %7, %14, %cst_15 {dimension_numbers = #tpu.dot_dimension_numbers<[1], [0], [0], [1], [0, 0, 1, 1], [], []>} : vector<2x64xf32>, vector<64x128xf32>, vector<2x128xf32> -> vector<2x128xf32>
    %c0_16 = arith.constant 0 : index
    %c0_17 = arith.constant 0 : index
    %16 = vector.load %arg6[%c0_16, %c0_17] : memref<1x128xf32, #tpu.memory_space<vmem>>, vector<1x128xf32>
    %17 = vector.broadcast %16 : vector<1x128xf32> to vector<2x128xf32>
    %18 = arith.addf %15, %17 : vector<2x128xf32>
    %cst_18 = arith.constant 2.000000e+01 : f32
    %19 = vector.broadcast %cst_18 : f32 to vector<2x128xf32>
    %20 = arith.cmpf ogt, %18, %19 : vector<2x128xf32>
    %cst_19 = arith.constant 2.000000e+01 : f32
    %21 = vector.broadcast %cst_19 : f32 to vector<2x128xf32>
    %22 = arith.minimumf %18, %21 : vector<2x128xf32>
    %23 = math.exp %22 : vector<2x128xf32>
    %cst_20 = arith.constant 1.000000e+00 : f32
    %24 = vector.broadcast %cst_20 : f32 to vector<2x128xf32>
    %25 = arith.addf %24, %23 : vector<2x128xf32>
    %26 = math.log %25 : vector<2x128xf32>
    %27 = arith.select %20, %18, %26 : vector<2x128xi1>, vector<2x128xf32>
    %cst_21 = arith.constant 1.000000e-03 : f32
    %28 = vector.broadcast %cst_21 : f32 to vector<2x128xf32>
    %29 = arith.maximumf %27, %28 : vector<2x128xf32>
    %c0_22 = arith.constant 0 : index
    %c0_23 = arith.constant 0 : index
    %30 = vector.load %arg8[%c0_22, %c0_23] : memref<2x128xf32, #tpu.memory_space<vmem>>, vector<2x128xf32>
    tpu.vector_store %arg8[%c0_22, %c0_23], %29 {strides = array<i32>} : memref<2x128xf32, #tpu.memory_space<vmem>>, vector<2x128xf32>,
    return
  }
}

</mosaic_0001>

<bundles_post_ra>
// kernel: celeba_encoder_forward.5
= control target key start
LH: loop header
LB: loop body
LE: loop exit
PB: predicated region body
PF: predicated region fallthrough
CT: control target
= control target key end

     0   :  { %s1321_s12 = smov 0   ;;  %s1628_s0 = inlined_call_operand.vmem [shape: f32[2048,48], index: 0, kind: input, shape index: {}]   ;;  %s1629_s1 = inlined_call_operand.vmem [shape: f32[48,128], index: 1, kind: input, shape index: {}]   ;;  %s1630_s2 = inlined_call_operand.vmem [shape: f32[1,128], index: 2, kind: input, shape index: {}]   ;;  %s1631_s3 = inlined_call_operand.vmem [shape: f32[2048,128], index: 3, kind: output, shape index: {}]  }
   0x1 LB: > { %s1013_s13 = sadd.s32 4294967295, %s1299_s12   ;;  %p1017_p0 = scmp.ge.s32.totalorder %s1299_s12, 1  ;;  %s1299_s12 = sphi %s1321_s12, %s13_s12  }
   0x2   : > { %p138_p1 = scmp.lt.s32.totalorder %s1299_s12, 5 }
   0x4   : > { %p139_p2 = pnand %p1017_p0, %p138_p1 }
   0x5   : > { %v238_v0 = vld [vmem:[%s1629_s1] sm:$0xff] (!%p139_p2)  ;;  %v239_v1 = vld [vmem:[%s1629_s1 + $0x8] sm:$0xff] (!%p139_p2)  ;;  %v240_v2 = vld [vmem:[%s1629_s1 + $0x10] sm:$0xff] (!%p139_p2)  ;;  %s1018_s20 = sshll.u32 (!%p139_p2), %s1013_s13, 6  ;;  %vm251_vm0 = vcmask (!%p139_p2), 392192  }
   0x6   : > { %142 = sbr.rel (%p139_p2) target bundleno = 299 (0x12b), region = 32  ;;  %v1267_v3 = vpack.c.bf16 (!%p139_p2), %v239_v1, %v238_v0  ;;  %v241_v4 = vld [vmem:[%s1629_s1 + $0x18] sm:$0xff] (!%p139_p2)  ;;  %p163_p3 = scmp.lt.s32.totalorder (!%p139_p2), %s1018_s20, 255  ;;  %v242_v6 = vld [vmem:[%s1629_s1 + $0x20] sm:$0xff] (!%p139_p2)  ;;  %v243_v7 = vld [vmem:[%s1629_s1 + $0x28] sm:$0xff] (!%p139_p2) }
   0x7   : > { %v1271_v5 = vpack.c.bf16 (!%p139_p2), %v241_v4, %v240_v2  ;;  %v1275_v8 = vpack.c.bf16 (!%p139_p2), %v243_v7, %v242_v6 }
   0x8   : > { %1268 = vmatprep.subr.bf16.mxu0 (!%p139_p2), %v1267_v3  ;;  %1279 = vmatprep.subr.bf16.mxu1 (!%p139_p2), %v1267_v3 }
   0x9   : > { %1270 = vmatpush3.bf16.msra.mxu0 (!%p139_p2), %v1267_v3  ;;  %1282 = vmatpush3.bf16.msra.mxu1 (!%p139_p2), %v1267_v3 }
   0xa   : > { %1272 = vmatprep.subr.bf16.mxu0 (!%p139_p2), %v1271_v5  ;;  %1280 = vmatprep.subr.bf16.mxu1 (!%p139_p2), %v1271_v5 }
   0xd   : > { %s1633_s20 = smov (!%p163_p3, %s1018_s20), 255  ;;  %1274 = vmatpush3.bf16.msra.mxu0 %v1271_v5  ;;  %1283 = vmatpush3.bf16.msra.mxu1 %v1271_v5 }
   0xe   : > { %s1019_s27 = sshll.u32 %s1633_s20, 3  ;;  %1276 = vmatprep.subr.bf16.mxu0 %v1275_v8  ;;  %1281 = vmatprep.subr.bf16.mxu1 %v1275_v8 }
   0xf   : > { %s1355_s30 = scalar_lea.vmem %s1628_s0, %s1019_s27  ;;  %s1497_s8 = scalar_lea.vmem %s1631_s3, %s1019_s27 }
  0x10   : > { %v174_v9 = vld [vmem:[%s1355_s30] sm:$0xff]  ;;  %v175_v11 = vld [vmem:[%s1355_s30 + $0x8] sm:$0xff]  ;;  %v176_v13 = vld [vmem:[%s1355_s30 + $0x10] sm:$0xff] }
  0x11   : > { %v206_v10 = vld [vmem:[%s1355_s30 + $0x100] sm:$0xff]  ;;  %1171 = vmatprep.mubr.msk.f32.mxu0 %vm251_vm0, %v174_v9  ;;  %1278 = vmatpush3.bf16.msra.mxu0 %v1275_v8  ;;  %v207_v12 = vld [vmem:[%s1355_s30 + $0x108] sm:$0xff]  ;;  %v208_v14 = vld [vmem:[%s1355_s30 + $0x110] sm:$0xff] }
  0x12   : > { %1219 = vmatprep.mubr.msk.f32.mxu1 %vm251_vm0, %v206_v10  ;;  %1284 = vmatpush3.bf16.msra.mxu1 %v1275_v8  ;;  %v177_v15 = vld [vmem:[%s1355_s30 + $0x18] sm:$0xff]  ;;  %v178_v17 = vld [vmem:[%s1355_s30 + $0x20] sm:$0xff]  ;;  %v179_v19 = vld [vmem:[%s1355_s30 + $0x28] sm:$0xff] }
  0x13   : > { %v209_v16 = vld [vmem:[%s1355_s30 + $0x118] sm:$0xff]  ;;  %v210_v18 = vld [vmem:[%s1355_s30 + $0x120] sm:$0xff]  ;;  %v211_v20 = vld [vmem:[%s1355_s30 + $0x128] sm:$0xff] }
  0x14   : > { %1172 = vmatmul.mubr.msk.f32.vlgmr.msra.gmra.mrb[0].mxu0 %vm251_vm0, %v175_v11  ;;  %v180_v21 = vld [vmem:[%s1355_s30 + $0x30] sm:$0xff]  ;;  %v181_v23 = vld [vmem:[%s1355_s30 + $0x38] sm:$0xff]  ;;  %v182_v25 = vld [vmem:[%s1355_s30 + $0x40] sm:$0xff] }
  0x15   : > { %1220 = vmatmul.mubr.msk.f32.vlgmr.msra.gmra.mrb[0].mxu1 %vm251_vm0, %v207_v12  ;;  %1174 = vmatprep.mubr.msk.f32.mxu0 %vm251_vm0, %v176_v13  ;;  %v212_v22 = vld [vmem:[%s1355_s30 + $0x130] sm:$0xff]  ;;  %v213_v24 = vld [vmem:[%s1355_s30 + $0x138] sm:$0xff]  ;;  %v214_v26 = vld [vmem:[%s1355_s30 + $0x140] sm:$0xff] }
  0x16   : > { %1222 = vmatprep.mubr.msk.f32.mxu1 %vm251_vm0, %v208_v14  ;;  %v183_v27 = vld [vmem:[%s1355_s30 + $0x48] sm:$0xff]  ;;  %v184_v29 = vld [vmem:[%s1355_s30 + $0x50] sm:$0xff]  ;;  %v185_v31 = vld [vmem:[%s1355_s30 + $0x58] sm:$0xff] }
  0x17   : > { %v215_v28 = vld [vmem:[%s1355_s30 + $0x148] sm:$0xff]  ;;  %v216_v30 = vld [vmem:[%s1355_s30 + $0x150] sm:$0xff]  ;;  %v217_v32 = vld [vmem:[%s1355_s30 + $0x158] sm:$0xff] }
  0x18   : > { %1175 = vmatmul.mubr.msk.f32.gmra.mrb[2].mxu0 %vm251_vm0, %v177_v15  ;;  %v186_v33 = vld [vmem:[%s1355_s30 + $0x60] sm:$0xff]  ;;  %v187_v35 = vld [vmem:[%s1355_s30 + $0x68] sm:$0xff]  ;;  %v188_v37 = vld [vmem:[%s1355_s30 + $0x70] sm:$0xff] }
  0x19   : > { %1223 = vmatmul.mubr.msk.f32.gmra.mrb[2].mxu1 %vm251_vm0, %v209_v16  ;;  %1177 = vmatprep.mubr.msk.f32.mxu0 %vm251_vm0, %v178_v17  ;;  %v218_v34 = vld [vmem:[%s1355_s30 + $0x160] sm:$0xff]  ;;  %v219_v36 = vld [vmem:[%s1355_s30 + $0x168] sm:$0xff]  ;;  %v220_v38 = vld [vmem:[%s1355_s30 + $0x170] sm:$0xff] }
  0x1a   : > { %1225 = vmatprep.mubr.msk.f32.mxu1 %vm251_vm0, %v210_v18  ;;  %v189_v39 = vld [vmem:[%s1355_s30 + $0x78] sm:$0xff]  ;;  %v190_v41 = vld [vmem:[%s1355_s30 + $0x80] sm:$0xff]  ;;  %v191_v43 = vld [vmem:[%s1355_s30 + $0x88] sm:$0xff] }
  0x1b   : > { %v221_v40 = vld [vmem:[%s1355_s30 + $0x178] sm:$0xff]  ;;  %v222_v42 = vld [vmem:[%s1355_s30 + $0x180] sm:$0xff]  ;;  %v223_v44 = vld [vmem:[%s1355_s30 + $0x188] sm:$0xff] }
  0x1c   : > { %1178 = vmatmul.mubr.msk.f32.gmra.mrb[4].mxu0 %vm251_vm0, %v179_v19  ;;  %v192_v45 = vld [vmem:[%s1355_s30 + $0x90] sm:$0xff]  ;;  %v193_v47 = vld [vmem:[%s1355_s30 + $0x98] sm:$0xff]  ;;  %v194_v49 = vld [vmem:[%s1355_s30 + $0xa0] sm:$0xff] }
  0x1d   : > { %1226 = vmatmul.mubr.msk.f32.gmra.mrb[4].mxu1 %vm251_vm0, %v211_v20  ;;  %1180 = vmatprep.mubr.msk.f32.mxu0 %vm251_vm0, %v180_v21  ;;  %v224_v46 = vld [vmem:[%s1355_s30 + $0x190] sm:$0xff]  ;;  %v225_v48 = vld [vmem:[%s1355_s30 + $0x198] sm:$0xff]  ;;  %v226_v50 = vld [vmem:[%s1355_s30 + $0x1a0] sm:$0xff] }
  0x1e   : > { %1228 = vmatprep.mubr.msk.f32.mxu1 %vm251_vm0, %v212_v22  ;;  %v195_v51 = vld [vmem:[%s1355_s30 + $0xa8] sm:$0xff]  ;;  %v196_v53 = vld [vmem:[%s1355_s30 + $0xb0] sm:$0xff]  ;;  %v197_v55 = vld [vmem:[%s1355_s30 + $0xb8] sm:$0xff] }
  0x1f   : > { %v227_v52 = vld [vmem:[%s1355_s30 + $0x1a8] sm:$0xff]  ;;  %v228_v54 = vld [vmem:[%s1355_s30 + $0x1b0] sm:$0xff]  ;;  %v229_v56 = vld [vmem:[%s1355_s30 + $0x1b8] sm:$0xff] }
  0x20   : > { %1181 = vmatmul.mubr.msk.f32.gmra.mrb[6].mxu0 %vm251_vm0, %v181_v23  ;;  %v198_v57 = vld [vmem:[%s1355_s30 + $0xc0] sm:$0xff]  ;;  %v199_v59 = vld [vmem:[%s1355_s30 + $0xc8] sm:$0xff]  ;;  %v200_v61 = vld [vmem:[%s1355_s30 + $0xd0] sm:$0xff] }
  0x21   : > { %1229 = vmatmul.mubr.msk.f32.gmra.mrb[6].mxu1 %vm251_vm0, %v213_v24  ;;  %1183 = vmatprep.mubr.msk.f32.mxu0 %vm251_vm0, %v182_v25  ;;  %v230_v58 = vld [vmem:[%s1355_s30 + $0x1c0] sm:$0xff]  ;;  %v231_v60 = vld [vmem:[%s1355_s30 + $0x1c8] sm:$0xff]  ;;  %v232_v62 = vld [vmem:[%s1355_s30 + $0x1d0] sm:$0xff] }
  0x22   : > { %1231 = vmatprep.mubr.msk.f32.mxu1 %vm251_vm0, %v214_v26  ;;  %v201_v63 = vld [vmem:[%s1355_s30 + $0xd8] sm:$0xff]  ;;  %v202_v1 = vld [vmem:[%s1355_s30 + $0xe0] sm:$0xff]  ;;  %v203_v3 = vld [vmem:[%s1355_s30 + $0xe8] sm:$0xff] }
  0x23   : > { %v233_v0 = vld [vmem:[%s1355_s30 + $0x1d8] sm:$0xff]  ;;  %v234_v2 = vld [vmem:[%s1355_s30 + $0x1e0] sm:$0xff]  ;;  %v235_v4 = vld [vmem:[%s1355_s30 + $0x1e8] sm:$0xff] }
  0x24   : > { %1184 = vmatmul.mubr.msk.f32.gmra.mrb[8].mxu0 %vm251_vm0, %v183_v27  ;;  %v204_v5 = vld [vmem:[%s1355_s30 + $0xf0] sm:$0xff]  ;;  %v205_v7 = vld [vmem:[%s1355_s30 + $0xf8] sm:$0xff]  ;;  %v1488_v9 = vld [vmem:[%s1630_s2] ss:$0 sm:$0xff] }
  0x25   : > { %1232 = vmatmul.mubr.msk.f32.gmra.mrb[8].mxu1 %vm251_vm0, %v215_v28  ;;  %1186 = vmatprep.mubr.msk.f32.mxu0 %vm251_vm0, %v184_v29  ;;  %v236_v6 = vld [vmem:[%s1355_s30 + $0x1f0] sm:$0xff]  ;;  %v237_v8 = vld [vmem:[%s1355_s30 + $0x1f8] sm:$0xff] }
  0x26   : > { %1234 = vmatprep.mubr.msk.f32.mxu1 %vm251_vm0, %v216_v30 }
  0x28   : > { %1187 = vmatmul.mubr.msk.f32.gmra.mrb[10].mxu0 %vm251_vm0, %v185_v31 }
  0x29   : > { %1235 = vmatmul.mubr.msk.f32.gmra.mrb[10].mxu1 %vm251_vm0, %v217_v32  ;;  %1189 = vmatprep.mubr.msk.f32.mxu0 %vm251_vm0, %v186_v33 }
  0x2a   : > { %1237 = vmatprep.mubr.msk.f32.mxu1 %vm251_vm0, %v218_v34 }
  0x2c   : > { %1190 = vmatmul.mubr.msk.f32.gmra.mrb[12].mxu0 %vm251_vm0, %v187_v35 }
  0x2d   : > { %1238 = vmatmul.mubr.msk.f32.gmra.mrb[12].mxu1 %vm251_vm0, %v219_v36  ;;  %1192 = vmatprep.mubr.msk.f32.mxu0 %vm251_vm0, %v188_v37 }
  0x2e   : > { %1240 = vmatprep.mubr.msk.f32.mxu1 %vm251_vm0, %v220_v38 }
  0x30   : > { %1193 = vmatmul.mubr.msk.f32.gmra.mrb[14].mxu0 %vm251_vm0, %v189_v39 }
  0x31   : > { %1241 = vmatmul.mubr.msk.f32.gmra.mrb[14].mxu1 %vm251_vm0, %v221_v40  ;;  %1195 = vmatprep.mubr.msk.f32.mxu0 %vm251_vm0, %v190_v41 }
  0x32   : > { %1243 = vmatprep.mubr.msk.f32.mxu1 %vm251_vm0, %v222_v42 }
  0x34   : > { %1196 = vmatmul.mubr.msk.f32.gmra.mrb[16].mxu0 %vm251_vm0, %v191_v43 }
  0x35   : > { %1244 = vmatmul.mubr.msk.f32.gmra.mrb[16].mxu1 %vm251_vm0, %v223_v44  ;;  %1198 = vmatprep.mubr.msk.f32.mxu0 %vm251_vm0, %v192_v45 }
  0x36   : > { %1246 = vmatprep.mubr.msk.f32.mxu1 %vm251_vm0, %v224_v46 }
  0x38   : > { %1199 = vmatmul.mubr.msk.f32.gmra.mrb[18].mxu0 %vm251_vm0, %v193_v47 }
  0x39   : > { %1247 = vmatmul.mubr.msk.f32.gmra.mrb[18].mxu1 %vm251_vm0, %v225_v48  ;;  %1201 = vmatprep.mubr.msk.f32.mxu0 %vm251_vm0, %v194_v49 }
  0x3a   : > { %1249 = vmatprep.mubr.msk.f32.mxu1 %vm251_vm0, %v226_v50 }
  0x3c   : > { %1202 = vmatmul.mubr.msk.f32.gmra.mrb[20].mxu0 %vm251_vm0, %v195_v51 }
  0x3d   : > { %1250 = vmatmul.mubr.msk.f32.gmra.mrb[20].mxu1 %vm251_vm0, %v227_v52  ;;  %1204 = vmatprep.mubr.msk.f32.mxu0 %vm251_vm0, %v196_v53 }
  0x3e   : > { %1252 = vmatprep.mubr.msk.f32.mxu1 %vm251_vm0, %v228_v54 }
  0x40   : > { %1205 = vmatmul.mubr.msk.f32.gmra.mrb[22].mxu0 %vm251_vm0, %v197_v55 }
  0x41   : > { %1253 = vmatmul.mubr.msk.f32.gmra.mrb[22].mxu1 %vm251_vm0, %v229_v56  ;;  %1207 = vmatprep.mubr.msk.f32.mxu0 %vm251_vm0, %v198_v57 }
  0x42   : > { %1255 = vmatprep.mubr.msk.f32.mxu1 %vm251_vm0, %v230_v58 }
  0x44   : > { %1208 = vmatmul.mubr.msk.f32.gmra.mrb[24].mxu0 %vm251_vm0, %v199_v59 }
  0x45   : > { %1256 = vmatmul.mubr.msk.f32.gmra.mrb[24].mxu1 %vm251_vm0, %v231_v60  ;;  %1210 = vmatprep.mubr.msk.f32.mxu0 %vm251_vm0, %v200_v61 }
  0x46   : > { %1258 = vmatprep.mubr.msk.f32.mxu1 %vm251_vm0, %v232_v62 }
  0x48   : > { %1211 = vmatmul.mubr.msk.f32.gmra.mrb[26].mxu0 %vm251_vm0, %v201_v63 }
  0x49   : > { %1259 = vmatmul.mubr.msk.f32.gmra.mrb[26].mxu1 %vm251_vm0, %v233_v0  ;;  %1213 = vmatprep.mubr.msk.f32.mxu0 %vm251_vm0, %v202_v1 }
  0x4a   : > { %1261 = vmatprep.mubr.msk.f32.mxu1 %vm251_vm0, %v234_v2 }
  0x4c   : > { %1214 = vmatmul.mubr.msk.f32.gmra.mrb[28].mxu0 %vm251_vm0, %v203_v3 }
  0x4d   : > { %1262 = vmatmul.mubr.msk.f32.gmra.mrb[28].mxu1 %vm251_vm0, %v235_v4  ;;  %1216 = vmatprep.mubr.msk.f32.mxu0 %vm251_vm0, %v204_v5 }
  0x4e   : > { %1264 = vmatprep.mubr.msk.f32.mxu1 %vm251_vm0, %v236_v6 }
  0x50   : > { %1217 = vmatmul.mubr.msk.f32.gmra.mrb[30].mxu0 %vm251_vm0, %v205_v7 }
  0x51   : > { %1265 = vmatmul.mubr.msk.f32.gmra.mrb[30].mxu1 %vm251_vm0, %v237_v8 }
  0xe7   : > { %v1173_v10 = vpop.f32.mrb[0].mxu0 }
  0xe8   : > { %v1221_v11 = vpop.f32.mrb[0].mxu1  ;;  %v516_v12 = vadd.f32 %v1173_v10, %v1488_v9  ;;  %v510_v14 = vpop.f32.mrb[1].mxu0 }
  0xe9   : > { %v676_v13 = vadd.f32 %v1221_v11, %v1488_v9  ;;  %v670_v15 = vpop.f32.mrb[1].mxu1  ;;  %v511_v16 = vadd.f32 %v1488_v9, %v510_v14 }
  0xea   : > { %v671_v17 = vadd.f32 %v1488_v9, %v670_v15  ;;  %v830_v18 = vmax.f32 %v516_v12, 0.0 }
  0xeb   : > { %v862_v19 = vmax.f32 %v676_v13, 0.0  ;;  %v829_v20 = vmax.f32 %v511_v16, 0.0  ;;  %v1176_v22 = vpop.f32.mrb[2].mxu0 }
  0xec   : > { %v861_v21 = vmax.f32 %v671_v17, 0.0  ;;  %v1224_v23 = vpop.f32.mrb[2].mxu1  ;;  %894 = vst [vmem:[%s1497_s8 + $0x8] sm:$0xff] %v830_v18  ;;  %v526_v24 = vadd.f32 %v1176_v22, %v1488_v9  ;;  %v520_v26 = vpop.f32.mrb[3].mxu0 }
  0xed   : > { %926 = vst [vmem:[%s1497_s8 + $0x108] sm:$0xff] %v862_v19  ;;  %v686_v25 = vadd.f32 %v1224_v23, %v1488_v9  ;;  %v680_v27 = vpop.f32.mrb[3].mxu1  ;;  %893 = vst [vmem:[%s1497_s8] sm:$0xff] %v829_v20  ;;  %v521_v28 = vadd.f32 %v1488_v9, %v520_v26 }
  0xee   : > { %925 = vst [vmem:[%s1497_s8 + $0x100] sm:$0xff] %v861_v21  ;;  %v681_v29 = vadd.f32 %v1488_v9, %v680_v27  ;;  %v832_v30 = vmax.f32 %v526_v24, 0.0 }
  0xef   : > { %v864_v31 = vmax.f32 %v686_v25, 0.0  ;;  %v831_v32 = vmax.f32 %v521_v28, 0.0  ;;  %v1179_v34 = vpop.f32.mrb[4].mxu0 }
  0xf0   : > { %v863_v33 = vmax.f32 %v681_v29, 0.0  ;;  %v1227_v35 = vpop.f32.mrb[4].mxu1  ;;  %896 = vst [vmem:[%s1497_s8 + $0x18] sm:$0xff] %v832_v30  ;;  %v536_v36 = vadd.f32 %v1179_v34, %v1488_v9  ;;  %v530_v38 = vpop.f32.mrb[5].mxu0 }
  0xf1   : > { %928 = vst [vmem:[%s1497_s8 + $0x118] sm:$0xff] %v864_v31  ;;  %v696_v37 = vadd.f32 %v1227_v35, %v1488_v9  ;;  %v690_v39 = vpop.f32.mrb[5].mxu1  ;;  %895 = vst [vmem:[%s1497_s8 + $0x10] sm:$0xff] %v831_v32  ;;  %v531_v40 = vadd.f32 %v1488_v9, %v530_v38 }
  0xf2   : > { %927 = vst [vmem:[%s1497_s8 + $0x110] sm:$0xff] %v863_v33  ;;  %v691_v41 = vadd.f32 %v1488_v9, %v690_v39  ;;  %v834_v42 = vmax.f32 %v536_v36, 0.0 }
  0xf3   : > { %v866_v43 = vmax.f32 %v696_v37, 0.0  ;;  %v833_v44 = vmax.f32 %v531_v40, 0.0  ;;  %v1182_v46 = vpop.f32.mrb[6].mxu0 }
  0xf4   : > { %v865_v45 = vmax.f32 %v691_v41, 0.0  ;;  %v1230_v47 = vpop.f32.mrb[6].mxu1  ;;  %898 = vst [vmem:[%s1497_s8 + $0x28] sm:$0xff] %v834_v42  ;;  %v546_v48 = vadd.f32 %v1182_v46, %v1488_v9  ;;  %v540_v50 = vpop.f32.mrb[7].mxu0 }
  0xf5   : > { %930 = vst [vmem:[%s1497_s8 + $0x128] sm:$0xff] %v866_v43  ;;  %v706_v49 = vadd.f32 %v1230_v47, %v1488_v9  ;;  %v700_v51 = vpop.f32.mrb[7].mxu1  ;;  %897 = vst [vmem:[%s1497_s8 + $0x20] sm:$0xff] %v833_v44  ;;  %v541_v52 = vadd.f32 %v1488_v9, %v540_v50 }
  0xf6   : > { %929 = vst [vmem:[%s1497_s8 + $0x120] sm:$0xff] %v865_v45  ;;  %v701_v53 = vadd.f32 %v1488_v9, %v700_v51  ;;  %v836_v54 = vmax.f32 %v546_v48, 0.0 }
  0xf7   : > { %v868_v55 = vmax.f32 %v706_v49, 0.0  ;;  %v835_v56 = vmax.f32 %v541_v52, 0.0  ;;  %v1185_v58 = vpop.f32.mrb[8].mxu0 }
  0xf8   : > { %v867_v57 = vmax.f32 %v701_v53, 0.0  ;;  %v1233_v59 = vpop.f32.mrb[8].mxu1  ;;  %900 = vst [vmem:[%s1497_s8 + $0x38] sm:$0xff] %v836_v54  ;;  %v556_v60 = vadd.f32 %v1185_v58, %v1488_v9  ;;  %v550_v62 = vpop.f32.mrb[9].mxu0 }
  0xf9   : > { %932 = vst [vmem:[%s1497_s8 + $0x138] sm:$0xff] %v868_v55  ;;  %v716_v61 = vadd.f32 %v1233_v59, %v1488_v9  ;;  %v710_v63 = vpop.f32.mrb[9].mxu1  ;;  %899 = vst [vmem:[%s1497_s8 + $0x30] sm:$0xff] %v835_v56  ;;  %v551_v0 = vadd.f32 %v1488_v9, %v550_v62 }
  0xfa   : > { %931 = vst [vmem:[%s1497_s8 + $0x130] sm:$0xff] %v867_v57  ;;  %v711_v1 = vadd.f32 %v1488_v9, %v710_v63  ;;  %v838_v2 = vmax.f32 %v556_v60, 0.0 }
  0xfb   : > { %v870_v3 = vmax.f32 %v716_v61, 0.0  ;;  %v837_v4 = vmax.f32 %v551_v0, 0.0  ;;  %v1188_v6 = vpop.f32.mrb[10].mxu0 }
  0xfc   : > { %v869_v5 = vmax.f32 %v711_v1, 0.0  ;;  %v1236_v7 = vpop.f32.mrb[10].mxu1  ;;  %902 = vst [vmem:[%s1497_s8 + $0x48] sm:$0xff] %v838_v2  ;;  %v566_v8 = vadd.f32 %v1188_v6, %v1488_v9  ;;  %v560_v11 = vpop.f32.mrb[11].mxu0 }
  0xfd   : > { %934 = vst [vmem:[%s1497_s8 + $0x148] sm:$0xff] %v870_v3  ;;  %v726_v10 = vadd.f32 %v1236_v7, %v1488_v9  ;;  %v720_v12 = vpop.f32.mrb[11].mxu1  ;;  %901 = vst [vmem:[%s1497_s8 + $0x40] sm:$0xff] %v837_v4  ;;  %v561_v13 = vadd.f32 %v1488_v9, %v560_v11 }
  0xfe   : > { %933 = vst [vmem:[%s1497_s8 + $0x140] sm:$0xff] %v869_v5  ;;  %v721_v14 = vadd.f32 %v1488_v9, %v720_v12  ;;  %v840_v15 = vmax.f32 %v566_v8, 0.0 }
  0xff   : > { %v872_v16 = vmax.f32 %v726_v10, 0.0  ;;  %v839_v17 = vmax.f32 %v561_v13, 0.0  ;;  %v1191_v19 = vpop.f32.mrb[12].mxu0 }
 0x100   : > { %v871_v18 = vmax.f32 %v721_v14, 0.0  ;;  %v1239_v20 = vpop.f32.mrb[12].mxu1  ;;  %904 = vst [vmem:[%s1497_s8 + $0x58] sm:$0xff] %v840_v15  ;;  %v576_v21 = vadd.f32 %v1191_v19, %v1488_v9  ;;  %v570_v23 = vpop.f32.mrb[13].mxu0 }
 0x101   : > { %936 = vst [vmem:[%s1497_s8 + $0x158] sm:$0xff] %v872_v16  ;;  %v736_v22 = vadd.f32 %v1239_v20, %v1488_v9  ;;  %v730_v24 = vpop.f32.mrb[13].mxu1  ;;  %903 = vst [vmem:[%s1497_s8 + $0x50] sm:$0xff] %v839_v17  ;;  %v571_v25 = vadd.f32 %v1488_v9, %v570_v23 }
 0x102   : > { %935 = vst [vmem:[%s1497_s8 + $0x150] sm:$0xff] %v871_v18  ;;  %v731_v26 = vadd.f32 %v1488_v9, %v730_v24  ;;  %v842_v27 = vmax.f32 %v576_v21, 0.0 }
 0x103   : > { %v874_v28 = vmax.f32 %v736_v22, 0.0  ;;  %v841_v29 = vmax.f32 %v571_v25, 0.0  ;;  %v1194_v31 = vpop.f32.mrb[14].mxu0 }
 0x104   : > { %v873_v30 = vmax.f32 %v731_v26, 0.0  ;;  %v1242_v32 = vpop.f32.mrb[14].mxu1  ;;  %906 = vst [vmem:[%s1497_s8 + $0x68] sm:$0xff] %v842_v27  ;;  %v586_v33 = vadd.f32 %v1194_v31, %v1488_v9  ;;  %v580_v35 = vpop.f32.mrb[15].mxu0 }
 0x105   : > { %938 = vst [vmem:[%s1497_s8 + $0x168] sm:$0xff] %v874_v28  ;;  %v746_v34 = vadd.f32 %v1242_v32, %v1488_v9  ;;  %v740_v36 = vpop.f32.mrb[15].mxu1  ;;  %905 = vst [vmem:[%s1497_s8 + $0x60] sm:$0xff] %v841_v29  ;;  %v581_v37 = vadd.f32 %v1488_v9, %v580_v35 }
 0x106   : > { %937 = vst [vmem:[%s1497_s8 + $0x160] sm:$0xff] %v873_v30  ;;  %v741_v38 = vadd.f32 %v1488_v9, %v740_v36  ;;  %v844_v39 = vmax.f32 %v586_v33, 0.0 }
 0x107   : > { %v876_v40 = vmax.f32 %v746_v34, 0.0  ;;  %v843_v41 = vmax.f32 %v581_v37, 0.0  ;;  %v1197_v43 = vpop.f32.mrb[16].mxu0 }
 0x108   : > { %v875_v42 = vmax.f32 %v741_v38, 0.0  ;;  %v1245_v44 = vpop.f32.mrb[16].mxu1  ;;  %908 = vst [vmem:[%s1497_s8 + $0x78] sm:$0xff] %v844_v39  ;;  %v596_v45 = vadd.f32 %v1197_v43, %v1488_v9  ;;  %v590_v47 = vpop.f32.mrb[17].mxu0 }
 0x109   : > { %940 = vst [vmem:[%s1497_s8 + $0x178] sm:$0xff] %v876_v40  ;;  %v756_v46 = vadd.f32 %v1245_v44, %v1488_v9  ;;  %v750_v48 = vpop.f32.mrb[17].mxu1  ;;  %907 = vst [vmem:[%s1497_s8 + $0x70] sm:$0xff] %v843_v41  ;;  %v591_v49 = vadd.f32 %v1488_v9, %v590_v47 }
 0x10a   : > { %939 = vst [vmem:[%s1497_s8 + $0x170] sm:$0xff] %v875_v42  ;;  %v751_v50 = vadd.f32 %v1488_v9, %v750_v48  ;;  %v846_v51 = vmax.f32 %v596_v45, 0.0 }
 0x10b   : > { %v878_v52 = vmax.f32 %v756_v46, 0.0  ;;  %v845_v53 = vmax.f32 %v591_v49, 0.0  ;;  %v1200_v55 = vpop.f32.mrb[18].mxu0 }
 0x10c   : > { %v877_v54 = vmax.f32 %v751_v50, 0.0  ;;  %v1248_v56 = vpop.f32.mrb[18].mxu1  ;;  %910 = vst [vmem:[%s1497_s8 + $0x88] sm:$0xff] %v846_v51  ;;  %v606_v57 = vadd.f32 %v1200_v55, %v1488_v9  ;;  %v600_v59 = vpop.f32.mrb[19].mxu0 }
 0x10d   : > { %942 = vst [vmem:[%s1497_s8 + $0x188] sm:$0xff] %v878_v52  ;;  %v766_v58 = vadd.f32 %v1248_v56, %v1488_v9  ;;  %v760_v60 = vpop.f32.mrb[19].mxu1  ;;  %909 = vst [vmem:[%s1497_s8 + $0x80] sm:$0xff] %v845_v53  ;;  %v601_v61 = vadd.f32 %v1488_v9, %v600_v59 }
 0x10e   : > { %941 = vst [vmem:[%s1497_s8 + $0x180] sm:$0xff] %v877_v54  ;;  %v761_v62 = vadd.f32 %v1488_v9, %v760_v60  ;;  %v848_v63 = vmax.f32 %v606_v57, 0.0 }
 0x10f   : > { %v880_v0 = vmax.f32 %v766_v58, 0.0  ;;  %v847_v1 = vmax.f32 %v601_v61, 0.0  ;;  %v1203_v3 = vpop.f32.mrb[20].mxu0 }
 0x110   : > { %v879_v2 = vmax.f32 %v761_v62, 0.0  ;;  %v1251_v4 = vpop.f32.mrb[20].mxu1  ;;  %912 = vst [vmem:[%s1497_s8 + $0x98] sm:$0xff] %v848_v63  ;;  %v616_v5 = vadd.f32 %v1203_v3, %v1488_v9  ;;  %v610_v7 = vpop.f32.mrb[21].mxu0 }
 0x111   : > { %944 = vst [vmem:[%s1497_s8 + $0x198] sm:$0xff] %v880_v0  ;;  %v776_v6 = vadd.f32 %v1251_v4, %v1488_v9  ;;  %v770_v8 = vpop.f32.mrb[21].mxu1  ;;  %911 = vst [vmem:[%s1497_s8 + $0x90] sm:$0xff] %v847_v1  ;;  %v611_v10 = vadd.f32 %v1488_v9, %v610_v7 }
 0x112   : > { %943 = vst [vmem:[%s1497_s8 + $0x190] sm:$0xff] %v879_v2  ;;  %v771_v11 = vadd.f32 %v1488_v9, %v770_v8  ;;  %v850_v12 = vmax.f32 %v616_v5, 0.0 }
 0x113   : > { %v882_v13 = vmax.f32 %v776_v6, 0.0  ;;  %v849_v14 = vmax.f32 %v611_v10, 0.0  ;;  %v1206_v16 = vpop.f32.mrb[22].mxu0 }
 0x114   : > { %v881_v15 = vmax.f32 %v771_v11, 0.0  ;;  %v1254_v17 = vpop.f32.mrb[22].mxu1  ;;  %914 = vst [vmem:[%s1497_s8 + $0xa8] sm:$0xff] %v850_v12  ;;  %v626_v18 = vadd.f32 %v1206_v16, %v1488_v9  ;;  %v620_v20 = vpop.f32.mrb[23].mxu0 }
 0x115   : > { %946 = vst [vmem:[%s1497_s8 + $0x1a8] sm:$0xff] %v882_v13  ;;  %v786_v19 = vadd.f32 %v1254_v17, %v1488_v9  ;;  %v780_v21 = vpop.f32.mrb[23].mxu1  ;;  %913 = vst [vmem:[%s1497_s8 + $0xa0] sm:$0xff] %v849_v14  ;;  %v621_v22 = vadd.f32 %v1488_v9, %v620_v20 }
 0x116   : > { %945 = vst [vmem:[%s1497_s8 + $0x1a0] sm:$0xff] %v881_v15  ;;  %v781_v23 = vadd.f32 %v1488_v9, %v780_v21  ;;  %v852_v24 = vmax.f32 %v626_v18, 0.0 }
 0x117   : > { %v884_v25 = vmax.f32 %v786_v19, 0.0  ;;  %v851_v26 = vmax.f32 %v621_v22, 0.0  ;;  %v1209_v28 = vpop.f32.mrb[24].mxu0 }
 0x118   : > { %v883_v27 = vmax.f32 %v781_v23, 0.0  ;;  %v1257_v29 = vpop.f32.mrb[24].mxu1  ;;  %916 = vst [vmem:[%s1497_s8 + $0xb8] sm:$0xff] %v852_v24  ;;  %v636_v30 = vadd.f32 %v1209_v28, %v1488_v9  ;;  %v630_v32 = vpop.f32.mrb[25].mxu0 }
 0x119   : > { %948 = vst [vmem:[%s1497_s8 + $0x1b8] sm:$0xff] %v884_v25  ;;  %v796_v31 = vadd.f32 %v1257_v29, %v1488_v9  ;;  %v790_v33 = vpop.f32.mrb[25].mxu1  ;;  %915 = vst [vmem:[%s1497_s8 + $0xb0] sm:$0xff] %v851_v26  ;;  %v631_v34 = vadd.f32 %v1488_v9, %v630_v32 }
 0x11a   : > { %947 = vst [vmem:[%s1497_s8 + $0x1b0] sm:$0xff] %v883_v27  ;;  %v791_v35 = vadd.f32 %v1488_v9, %v790_v33  ;;  %v854_v36 = vmax.f32 %v636_v30, 0.0 }
 0x11b   : > { %v886_v37 = vmax.f32 %v796_v31, 0.0  ;;  %v853_v38 = vmax.f32 %v631_v34, 0.0  ;;  %v1212_v40 = vpop.f32.mrb[26].mxu0 }
 0x11c   : > { %v885_v39 = vmax.f32 %v791_v35, 0.0  ;;  %v1260_v41 = vpop.f32.mrb[26].mxu1  ;;  %918 = vst [vmem:[%s1497_s8 + $0xc8] sm:$0xff] %v854_v36  ;;  %v646_v42 = vadd.f32 %v1212_v40, %v1488_v9  ;;  %v640_v44 = vpop.f32.mrb[27].mxu0 }
 0x11d   : > { %950 = vst [vmem:[%s1497_s8 + $0x1c8] sm:$0xff] %v886_v37  ;;  %v806_v43 = vadd.f32 %v1260_v41, %v1488_v9  ;;  %v800_v45 = vpop.f32.mrb[27].mxu1  ;;  %917 = vst [vmem:[%s1497_s8 + $0xc0] sm:$0xff] %v853_v38  ;;  %v641_v46 = vadd.f32 %v1488_v9, %v640_v44 }
 0x11e   : > { %949 = vst [vmem:[%s1497_s8 + $0x1c0] sm:$0xff] %v885_v39  ;;  %v801_v47 = vadd.f32 %v1488_v9, %v800_v45  ;;  %v856_v48 = vmax.f32 %v646_v42, 0.0 }
 0x11f   : > { %v888_v49 = vmax.f32 %v806_v43, 0.0  ;;  %v855_v50 = vmax.f32 %v641_v46, 0.0  ;;  %v1215_v52 = vpop.f32.mrb[28].mxu0 }
 0x120   : > { %v887_v51 = vmax.f32 %v801_v47, 0.0  ;;  %v1263_v53 = vpop.f32.mrb[28].mxu1  ;;  %920 = vst [vmem:[%s1497_s8 + $0xd8] sm:$0xff] %v856_v48  ;;  %v656_v54 = vadd.f32 %v1215_v52, %v1488_v9  ;;  %v650_v56 = vpop.f32.mrb[29].mxu0 }
 0x121   : > { %952 = vst [vmem:[%s1497_s8 + $0x1d8] sm:$0xff] %v888_v49  ;;  %v816_v55 = vadd.f32 %v1263_v53, %v1488_v9  ;;  %v810_v57 = vpop.f32.mrb[29].mxu1  ;;  %919 = vst [vmem:[%s1497_s8 + $0xd0] sm:$0xff] %v855_v50  ;;  %v651_v58 = vadd.f32 %v1488_v9, %v650_v56 }
 0x122   : > { %951 = vst [vmem:[%s1497_s8 + $0x1d0] sm:$0xff] %v887_v51  ;;  %v811_v59 = vadd.f32 %v1488_v9, %v810_v57  ;;  %v858_v60 = vmax.f32 %v656_v54, 0.0 }
 0x123   : > { %v890_v61 = vmax.f32 %v816_v55, 0.0  ;;  %v857_v62 = vmax.f32 %v651_v58, 0.0  ;;  %v1218_v0 = vpop.f32.mrb[30].mxu0 }
 0x124   : > { %v889_v63 = vmax.f32 %v811_v59, 0.0  ;;  %v1266_v1 = vpop.f32.mrb[30].mxu1  ;;  %922 = vst [vmem:[%s1497_s8 + $0xe8] sm:$0xff] %v858_v60  ;;  %v666_v2 = vadd.f32 %v1218_v0, %v1488_v9  ;;  %v660_v4 = vpop.f32.mrb[31].mxu0 }
 0x125   : > { %954 = vst [vmem:[%s1497_s8 + $0x1e8] sm:$0xff] %v890_v61  ;;  %v826_v3 = vadd.f32 %v1266_v1, %v1488_v9  ;;  %v820_v5 = vpop.f32.mrb[31].mxu1  ;;  %921 = vst [vmem:[%s1497_s8 + $0xe0] sm:$0xff] %v857_v62  ;;  %v661_v6 = vadd.f32 %v1488_v9, %v660_v4 }
 0x126   : > { %953 = vst [vmem:[%s1497_s8 + $0x1e0] sm:$0xff] %v889_v63  ;;  %v821_v7 = vadd.f32 %v1488_v9, %v820_v5  ;;  %v860_v8 = vmax.f32 %v666_v2, 0.0 }
 0x127   : > { %v892_v10 = vmax.f32 %v826_v3, 0.0  ;;  %v859_v11 = vmax.f32 %v661_v6, 0.0 }
 0x128   : > { %v891_v12 = vmax.f32 %v821_v7, 0.0  ;;  %924 = vst [vmem:[%s1497_s8 + $0xf8] sm:$0xff] %v860_v8 }
 0x129   : > { %956 = vst [vmem:[%s1497_s8 + $0x1f8] sm:$0xff] %v892_v10  ;;  %923 = vst [vmem:[%s1497_s8 + $0xf0] sm:$0xff] %v859_v11 }
 0x12a   : > { %955 = vst [vmem:[%s1497_s8 + $0x1f0] sm:$0xff] %v891_v12 }
 0x12b PF: > { %s13_s12 = sadd.s32 1, %s1299_s12  }
 0x12c   : > { %p10_p4 = scmp.ge.s32.totalorder %s13_s12, 6  }
 0x12e   :  { %12 = sbr.rel (!%p10_p4) target bundleno = 1 (0x1), region = 62 }

// kernel: celeba_encoder_forward.6
= control target key start
LH: loop header
LB: loop body
LE: loop exit
PB: predicated region body
PF: predicated region fallthrough
CT: control target
= control target key end

     0   :  { %v1470_v0 = vmov 0.0|0.0   ;;  %s2749_s1 = inlined_call_operand.vmem [shape: f32[512,128], index: 1, kind: input, shape index: {}]   ;;  %s2750_s0 = inlined_call_operand.vmem [shape: f32[512,512], index: 0, kind: input, shape index: {}]   ;;  %s2751_s2 = inlined_call_operand.vmem [shape: f32[1,128], index: 2, kind: input, shape index: {}]   ;;  %s2752_s3 = inlined_call_operand.vmem [shape: f32[512,128], index: 3, kind: output, shape index: {}]  }
   0x1   :  { %1244 = vmatprep.subr.bf16.mxu1 %v1470_v0  ;;  %v270_v1 = vld [vmem:[%s2749_s1] sm:$0xff]  ;;  %v271_v2 = vld [vmem:[%s2749_s1 + $0x8] sm:$0xff]  ;;  %1292 = vmatprep.subr.bf16.mxu0 %v1470_v0  ;;  %v272_v6 = vld [vmem:[%s2749_s1 + $0x10] sm:$0xff] }
   0x2   :  { %v302_v3 = vld [vmem:[%s2749_s1 + $0x100] sm:$0xff]  ;;  %v1245_v4 = vpack.c.bf16 %v271_v2, %v270_v1  ;;  %v303_v5 = vld [vmem:[%s2749_s1 + $0x108] sm:$0xff]  ;;  %v273_v7 = vld [vmem:[%s2749_s1 + $0x18] sm:$0xff] }
   0x3   :  { %v1293_v8 = vpack.c.bf16 %v303_v5, %v302_v3  ;;  %v304_v9 = vld [vmem:[%s2749_s1 + $0x110] sm:$0xff]  ;;  %v305_v10 = vld [vmem:[%s2749_s1 + $0x118] sm:$0xff]  ;;  %v1248_v11 = vpack.c.bf16 %v273_v7, %v272_v6  ;;  %v274_v13 = vld [vmem:[%s2749_s1 + $0x20] sm:$0xff] }
   0x4   :  { %1246 = vmatpush1.bf16.msra.mxu1 %v1245_v4  ;;  %v1296_v12 = vpack.c.bf16 %v305_v10, %v304_v9  ;;  %v275_v14 = vld [vmem:[%s2749_s1 + $0x28] sm:$0xff]  ;;  %v306_v15 = vld [vmem:[%s2749_s1 + $0x120] sm:$0xff]  ;;  %v276_v19 = vld [vmem:[%s2749_s1 + $0x30] sm:$0xff] }
   0x5   :  { %1294 = vmatpush1.bf16.msra.mxu0 %v1293_v8  ;;  %1247 = vmatprep.subr.bf16.mxu1 %v1470_v0  ;;  %v307_v16 = vld [vmem:[%s2749_s1 + $0x128] sm:$0xff]  ;;  %v1251_v17 = vpack.c.bf16 %v275_v14, %v274_v13  ;;  %v277_v20 = vld [vmem:[%s2749_s1 + $0x38] sm:$0xff]  ;;  %v308_v21 = vld [vmem:[%s2749_s1 + $0x130] sm:$0xff] }
   0x6   :  { %1295 = vmatprep.subr.bf16.mxu0 %v1470_v0  ;;  %v1299_v18 = vpack.c.bf16 %v307_v16, %v306_v15  ;;  %v309_v22 = vld [vmem:[%s2749_s1 + $0x138] sm:$0xff]  ;;  %v1254_v23 = vpack.c.bf16 %v277_v20, %v276_v19  ;;  %v278_v25 = vld [vmem:[%s2749_s1 + $0x40] sm:$0xff]  ;;  %v279_v26 = vld [vmem:[%s2749_s1 + $0x48] sm:$0xff] }
   0x7   :  { %v1302_v24 = vpack.c.bf16 %v309_v22, %v308_v21  ;;  %v310_v27 = vld [vmem:[%s2749_s1 + $0x140] sm:$0xff]  ;;  %v311_v28 = vld [vmem:[%s2749_s1 + $0x148] sm:$0xff]  ;;  %v1257_v29 = vpack.c.bf16 %v279_v26, %v278_v25  ;;  %v280_v31 = vld [vmem:[%s2749_s1 + $0x50] sm:$0xff] }
   0x8   :  { %1249 = vmatpush1.bf16.msra.mxu1 %v1248_v11  ;;  %v1305_v30 = vpack.c.bf16 %v311_v28, %v310_v27  ;;  %v281_v32 = vld [vmem:[%s2749_s1 + $0x58] sm:$0xff]  ;;  %v312_v33 = vld [vmem:[%s2749_s1 + $0x150] sm:$0xff]  ;;  %v282_v37 = vld [vmem:[%s2749_s1 + $0x60] sm:$0xff] }
   0x9   :  { %1297 = vmatpush1.bf16.msra.mxu0 %v1296_v12  ;;  %1250 = vmatprep.subr.bf16.mxu1 %v1470_v0  ;;  %v313_v34 = vld [vmem:[%s2749_s1 + $0x158] sm:$0xff]  ;;  %v1260_v35 = vpack.c.bf16 %v281_v32, %v280_v31  ;;  %v283_v38 = vld [vmem:[%s2749_s1 + $0x68] sm:$0xff]  ;;  %v314_v39 = vld [vmem:[%s2749_s1 + $0x160] sm:$0xff] }
   0xa   :  { %1298 = vmatprep.subr.bf16.mxu0 %v1470_v0  ;;  %v1308_v36 = vpack.c.bf16 %v313_v34, %v312_v33  ;;  %v315_v40 = vld [vmem:[%s2749_s1 + $0x168] sm:$0xff]  ;;  %v17_v42 = vld [vmem:[%s2750_s0 + $0x18] sm:$0xff]  ;;  %v1263_v43 = vpack.c.bf16 %v283_v38, %v282_v37  ;;  %v284_v45 = vld [vmem:[%s2749_s1 + $0x70] sm:$0xff] }
   0xb   :  { %v15_v41 = vld [vmem:[%s2750_s0 + $0x8] sm:$0xff]  ;;  %790 = vmatprep.mubr.f32.mxu0 %v17_v42  ;;  %v1311_v44 = vpack.c.bf16 %v315_v40, %v314_v39  ;;  %v285_v46 = vld [vmem:[%s2749_s1 + $0x78] sm:$0xff]  ;;  %v316_v47 = vld [vmem:[%s2749_s1 + $0x170] sm:$0xff] }
   0xc   :  { %1252 = vmatpush1.bf16.msra.mxu1 %v1251_v17  ;;  %405 = vmatprep.mubr.f32.mxu1 %v15_v41  ;;  %v317_v48 = vld [vmem:[%s2749_s1 + $0x178] sm:$0xff]  ;;  %v1266_v49 = vpack.c.bf16 %v285_v46, %v284_v45  ;;  %v286_v51 = vld [vmem:[%s2749_s1 + $0x80] sm:$0xff]  ;;  %v287_v52 = vld [vmem:[%s2749_s1 + $0x88] sm:$0xff] }
   0xd   :  { %1300 = vmatpush1.bf16.msra.mxu0 %v1299_v18  ;;  %1253 = vmatprep.subr.bf16.mxu1 %v1470_v0  ;;  %v1314_v50 = vpack.c.bf16 %v317_v48, %v316_v47  ;;  %v318_v53 = vld [vmem:[%s2749_s1 + $0x180] sm:$0xff]  ;;  %v319_v54 = vld [vmem:[%s2749_s1 + $0x188] sm:$0xff]  ;;  %v1269_v55 = vpack.c.bf16 %v287_v52, %v286_v51  ;;  %v288_v57 = vld [vmem:[%s2749_s1 + $0x90] sm:$0xff] }
   0xe   :  { %1301 = vmatprep.subr.bf16.mxu0 %v1470_v0  ;;  %v1317_v56 = vpack.c.bf16 %v319_v54, %v318_v53  ;;  %v289_v58 = vld [vmem:[%s2749_s1 + $0x98] sm:$0xff]  ;;  %v320_v59 = vld [vmem:[%s2749_s1 + $0x190] sm:$0xff]  ;;  %v290_v63 = vld [vmem:[%s2749_s1 + $0xa0] sm:$0xff] }
   0xf   :  { %v321_v60 = vld [vmem:[%s2749_s1 + $0x198] sm:$0xff]  ;;  %v1272_v61 = vpack.c.bf16 %v289_v58, %v288_v57  ;;  %v291_v1 = vld [vmem:[%s2749_s1 + $0xa8] sm:$0xff]  ;;  %v322_v2 = vld [vmem:[%s2749_s1 + $0x1a0] sm:$0xff] }
  0x10   :  { %1255 = vmatpush1.bf16.msra.mxu1 %v1254_v23  ;;  %v1320_v62 = vpack.c.bf16 %v321_v60, %v320_v59  ;;  %v323_v3 = vld [vmem:[%s2749_s1 + $0x1a8] sm:$0xff]  ;;  %v1275_v4 = vpack.c.bf16 %v291_v1, %v290_v63  ;;  %v292_v6 = vld [vmem:[%s2749_s1 + $0xb0] sm:$0xff]  ;;  %v293_v7 = vld [vmem:[%s2749_s1 + $0xb8] sm:$0xff] }
  0x11   :  { %1303 = vmatpush1.bf16.msra.mxu0 %v1302_v24  ;;  %1256 = vmatprep.subr.bf16.mxu1 %v1470_v0  ;;  %v1323_v5 = vpack.c.bf16 %v323_v3, %v322_v2  ;;  %v324_v8 = vld [vmem:[%s2749_s1 + $0x1b0] sm:$0xff]  ;;  %v325_v9 = vld [vmem:[%s2749_s1 + $0x1b8] sm:$0xff]  ;;  %v1278_v10 = vpack.c.bf16 %v293_v7, %v292_v6  ;;  %v294_v12 = vld [vmem:[%s2749_s1 + $0xc0] sm:$0xff] }
  0x12   :  { %1304 = vmatprep.subr.bf16.mxu0 %v1470_v0  ;;  %v1326_v11 = vpack.c.bf16 %v325_v9, %v324_v8  ;;  %v295_v13 = vld [vmem:[%s2749_s1 + $0xc8] sm:$0xff]  ;;  %v326_v14 = vld [vmem:[%s2749_s1 + $0x1c0] sm:$0xff]  ;;  %v296_v18 = vld [vmem:[%s2749_s1 + $0xd0] sm:$0xff] }
  0x13   :  { %v327_v15 = vld [vmem:[%s2749_s1 + $0x1c8] sm:$0xff]  ;;  %v1281_v16 = vpack.c.bf16 %v295_v13, %v294_v12  ;;  %v297_v19 = vld [vmem:[%s2749_s1 + $0xd8] sm:$0xff]  ;;  %v328_v20 = vld [vmem:[%s2749_s1 + $0x1d0] sm:$0xff] }
  0x14   :  { %1258 = vmatpush1.bf16.msra.mxu1 %v1257_v29  ;;  %v1329_v17 = vpack.c.bf16 %v327_v15, %v326_v14  ;;  %v329_v21 = vld [vmem:[%s2749_s1 + $0x1d8] sm:$0xff]  ;;  %v1284_v22 = vpack.c.bf16 %v297_v19, %v296_v18  ;;  %v298_v24 = vld [vmem:[%s2749_s1 + $0xe0] sm:$0xff]  ;;  %v299_v25 = vld [vmem:[%s2749_s1 + $0xe8] sm:$0xff] }
  0x15   :  { %1306 = vmatpush1.bf16.msra.mxu0 %v1305_v30  ;;  %1259 = vmatprep.subr.bf16.mxu1 %v1470_v0  ;;  %v1332_v23 = vpack.c.bf16 %v329_v21, %v328_v20  ;;  %v330_v26 = vld [vmem:[%s2749_s1 + $0x1e0] sm:$0xff]  ;;  %v331_v27 = vld [vmem:[%s2749_s1 + $0x1e8] sm:$0xff]  ;;  %v1287_v28 = vpack.c.bf16 %v299_v25, %v298_v24  ;;  %v300_v30 = vld [vmem:[%s2749_s1 + $0xf0] sm:$0xff] }
  0x16   :  { %1307 = vmatprep.subr.bf16.mxu0 %v1470_v0  ;;  %v1335_v29 = vpack.c.bf16 %v331_v27, %v330_v26  ;;  %v301_v31 = vld [vmem:[%s2749_s1 + $0xf8] sm:$0xff]  ;;  %v332_v32 = vld [vmem:[%s2749_s1 + $0x1f0] sm:$0xff]  ;;  %v19_v38 = vld [vmem:[%s2750_s0 + $0x28] sm:$0xff] }
  0x17   :  { %v333_v33 = vld [vmem:[%s2749_s1 + $0x1f8] sm:$0xff]  ;;  %v1290_v34 = vpack.c.bf16 %v301_v31, %v300_v30  ;;  %v16_v37 = vld [vmem:[%s2750_s0 + $0x10] sm:$0xff]  ;;  %v23_v41 = vld [vmem:[%s2750_s0 + $0x48] sm:$0xff] }
  0x18   :  { %1261 = vmatpush1.bf16.msra.mxu1 %v1260_v35  ;;  %v1338_v35 = vpack.c.bf16 %v333_v33, %v332_v32  ;;  %v21_v39 = vld [vmem:[%s2750_s0 + $0x38] sm:$0xff]  ;;  %v20_v40 = vld [vmem:[%s2750_s0 + $0x30] sm:$0xff]  ;;  %v27_v45 = vld [vmem:[%s2750_s0 + $0x68] sm:$0xff] }
  0x19   :  { %1309 = vmatpush1.bf16.msra.mxu0 %v1308_v36  ;;  %1262 = vmatprep.subr.bf16.mxu1 %v1470_v0  ;;  %v14_v36 = vld [vmem:[%s2750_s0] sm:$0xff]  ;;  %v25_v42 = vld [vmem:[%s2750_s0 + $0x58] sm:$0xff]  ;;  %v28_v48 = vld [vmem:[%s2750_s0 + $0x70] sm:$0xff] }
  0x1a   :  { %1310 = vmatprep.subr.bf16.mxu0 %v1470_v0  ;;  %v29_v46 = vld [vmem:[%s2750_s0 + $0x78] sm:$0xff]  ;;  %v26_v47 = vld [vmem:[%s2750_s0 + $0x60] sm:$0xff]  ;;  %v32_v52 = vld [vmem:[%s2750_s0 + $0x90] sm:$0xff] }
  0x1b   :  { %v30_v51 = vld [vmem:[%s2750_s0 + $0x80] sm:$0xff]  ;;  %v35_v53 = vld [vmem:[%s2750_s0 + $0xa8] sm:$0xff]  ;;  %v37_v54 = vld [vmem:[%s2750_s0 + $0xb8] sm:$0xff] }
  0x1c   :  { %1264 = vmatpush1.bf16.msra.mxu1 %v1263_v43  ;;  %v22_v43 = vld [vmem:[%s2750_s0 + $0x40] sm:$0xff]  ;;  %v39_v57 = vld [vmem:[%s2750_s0 + $0xc8] sm:$0xff]  ;;  %v41_v58 = vld [vmem:[%s2750_s0 + $0xd8] sm:$0xff] }
  0x1d   :  { %1312 = vmatpush1.bf16.msra.mxu0 %v1311_v44  ;;  %1265 = vmatprep.subr.bf16.mxu1 %v1470_v0  ;;  %v24_v44 = vld [vmem:[%s2750_s0 + $0x50] sm:$0xff]  ;;  %v38_v59 = vld [vmem:[%s2750_s0 + $0xc0] sm:$0xff]  ;;  %v47_v2 = vld [vmem:[%s2750_s0 + $0x108] sm:$0xff] }
  0x1e   :  { %1313 = vmatprep.subr.bf16.mxu0 %v1470_v0  ;;  %v40_v60 = vld [vmem:[%s2750_s0 + $0xd0] sm:$0xff]  ;;  %v42_v63 = vld [vmem:[%s2750_s0 + $0xe0] sm:$0xff]  ;;  %v49_v3 = vld [vmem:[%s2750_s0 + $0x118] sm:$0xff] }
  0x1f   :  { %v44_v1 = vld [vmem:[%s2750_s0 + $0xf0] sm:$0xff]  ;;  %v51_v6 = vld [vmem:[%s2750_s0 + $0x128] sm:$0xff]  ;;  %v53_v7 = vld [vmem:[%s2750_s0 + $0x138] sm:$0xff] }
  0x20   :  { %1267 = vmatpush1.bf16.msra.mxu1 %v1266_v49  ;;  %v31_v49 = vld [vmem:[%s2750_s0 + $0x88] sm:$0xff]  ;;  %v50_v8 = vld [vmem:[%s2750_s0 + $0x120] sm:$0xff]  ;;  %v52_v9 = vld [vmem:[%s2750_s0 + $0x130] sm:$0xff] }
  0x21   :  { %1315 = vmatpush1.bf16.msra.mxu0 %v1314_v50  ;;  %1268 = vmatprep.subr.bf16.mxu1 %v1470_v0  ;;  %v33_v50 = vld [vmem:[%s2750_s0 + $0x98] sm:$0xff]  ;;  %v54_v12 = vld [vmem:[%s2750_s0 + $0x140] sm:$0xff]  ;;  %v56_v13 = vld [vmem:[%s2750_s0 + $0x150] sm:$0xff] }
  0x22   :  { %1316 = vmatprep.subr.bf16.mxu0 %v1470_v0  ;;  %v59_v14 = vld [vmem:[%s2750_s0 + $0x168] sm:$0xff]  ;;  %v61_v15 = vld [vmem:[%s2750_s0 + $0x178] sm:$0xff]  ;;  %v62_v20 = vld [vmem:[%s2750_s0 + $0x180] sm:$0xff] }
  0x23   :  { %v63_v18 = vld [vmem:[%s2750_s0 + $0x188] sm:$0xff]  ;;  %v65_v19 = vld [vmem:[%s2750_s0 + $0x198] sm:$0xff]  ;;  %v64_v21 = vld [vmem:[%s2750_s0 + $0x190] sm:$0xff] }
  0x24   :  { %1270 = vmatpush1.bf16.msra.mxu1 %v1269_v55  ;;  %v34_v55 = vld [vmem:[%s2750_s0 + $0xa0] sm:$0xff]  ;;  %v68_v25 = vld [vmem:[%s2750_s0 + $0x1b0] sm:$0xff]  ;;  %v71_v26 = vld [vmem:[%s2750_s0 + $0x1c8] sm:$0xff] }
  0x25   :  { %1318 = vmatpush1.bf16.msra.mxu0 %v1317_v56  ;;  %1271 = vmatprep.subr.bf16.mxu1 %v1470_v0  ;;  %v36_v56 = vld [vmem:[%s2750_s0 + $0xb0] sm:$0xff]  ;;  %v66_v24 = vld [vmem:[%s2750_s0 + $0x1a0] sm:$0xff]  ;;  %v73_v27 = vld [vmem:[%s2750_s0 + $0x1d8] sm:$0xff] }
  0x26   :  { %1319 = vmatprep.subr.bf16.mxu0 %v1470_v0  ;;  %v75_v30 = vld [vmem:[%s2750_s0 + $0x1e8] sm:$0xff]  ;;  %v77_v31 = vld [vmem:[%s2750_s0 + $0x1f8] sm:$0xff]  ;;  %v74_v32 = vld [vmem:[%s2750_s0 + $0x1e0] sm:$0xff] }
  0x27   :  { %v76_v33 = vld [vmem:[%s2750_s0 + $0x1f0] sm:$0xff] }
  0x28   :  { %1273 = vmatpush1.bf16.msra.mxu1 %v1272_v61  ;;  %v43_v61 = vld [vmem:[%s2750_s0 + $0xe8] sm:$0xff] }
  0x29   :  { %1321 = vmatpush1.bf16.msra.mxu0 %v1320_v62  ;;  %1274 = vmatprep.subr.bf16.mxu1 %v1470_v0  ;;  %v45_v62 = vld [vmem:[%s2750_s0 + $0xf8] sm:$0xff] }
  0x2a   :  { %1322 = vmatprep.subr.bf16.mxu0 %v1470_v0 }
  0x2c   :  { %1276 = vmatpush1.bf16.msra.mxu1 %v1275_v4  ;;  %v46_v4 = vld [vmem:[%s2750_s0 + $0x100] sm:$0xff] }
  0x2d   :  { %1324 = vmatpush1.bf16.msra.mxu0 %v1323_v5  ;;  %1277 = vmatprep.subr.bf16.mxu1 %v1470_v0  ;;  %v48_v5 = vld [vmem:[%s2750_s0 + $0x110] sm:$0xff] }
  0x2e   :  { %1325 = vmatprep.subr.bf16.mxu0 %v1470_v0 }
  0x30   :  { %1279 = vmatpush1.bf16.msra.mxu1 %v1278_v10  ;;  %v55_v10 = vld [vmem:[%s2750_s0 + $0x148] sm:$0xff] }
  0x31   :  { %1327 = vmatpush1.bf16.msra.mxu0 %v1326_v11  ;;  %1280 = vmatprep.subr.bf16.mxu1 %v1470_v0  ;;  %v57_v11 = vld [vmem:[%s2750_s0 + $0x158] sm:$0xff] }
  0x32   :  { %1328 = vmatprep.subr.bf16.mxu0 %v1470_v0 }
  0x34   :  { %1282 = vmatpush1.bf16.msra.mxu1 %v1281_v16  ;;  %v58_v16 = vld [vmem:[%s2750_s0 + $0x160] sm:$0xff] }
  0x35   :  { %1330 = vmatpush1.bf16.msra.mxu0 %v1329_v17  ;;  %1283 = vmatprep.subr.bf16.mxu1 %v1470_v0  ;;  %v60_v17 = vld [vmem:[%s2750_s0 + $0x170] sm:$0xff] }
  0x36   :  { %1331 = vmatprep.subr.bf16.mxu0 %v1470_v0 }
  0x38   :  { %1285 = vmatpush1.bf16.msra.mxu1 %v1284_v22  ;;  %v67_v22 = vld [vmem:[%s2750_s0 + $0x1a8] sm:$0xff] }
  0x39   :  { %1333 = vmatpush1.bf16.msra.mxu0 %v1332_v23  ;;  %1286 = vmatprep.subr.bf16.mxu1 %v1470_v0  ;;  %v69_v23 = vld [vmem:[%s2750_s0 + $0x1b8] sm:$0xff] }
  0x3a   :  { %1334 = vmatprep.subr.bf16.mxu0 %v1470_v0 }
  0x3c   :  { %1288 = vmatpush1.bf16.msra.mxu1 %v1287_v28  ;;  %v70_v28 = vld [vmem:[%s2750_s0 + $0x1c0] sm:$0xff] }
  0x3d   :  { %1336 = vmatpush1.bf16.msra.mxu0 %v1335_v29  ;;  %1289 = vmatprep.subr.bf16.mxu1 %v1470_v0  ;;  %v72_v29 = vld [vmem:[%s2750_s0 + $0x1d0] sm:$0xff] }
  0x3e   :  { %1337 = vmatprep.subr.bf16.mxu0 %v1470_v0  ;;  %v18_v0 = vld [vmem:[%s2750_s0 + $0x20] sm:$0xff] }
  0x40   :  { %1291 = vmatpush1.bf16.msra.mxu1 %v1290_v34  ;;  %v79_v34 = vld [vmem:[%s2750_s0 + $0x208] sm:$0xff] }
  0x41   :  { %1339 = vmatpush1.bf16.msra.mxu0 %v1338_v35  ;;  %v81_v35 = vld [vmem:[%s2750_s0 + $0x218] sm:$0xff] }
  0x43   :  { %406 = vmatmul.mubr.f32.vlgmr.msra.gmra.mrb[0].mxu1 %v14_v36  ;;  %v78_v36 = vld [vmem:[%s2750_s0 + $0x200] sm:$0xff] }
  0x44   :  { %791 = vmatmul.mubr.f32.vlgmr.msra.gmra.mrb[0].mxu0 %v16_v37  ;;  %410 = vmatprep.mubr.f32.mxu1 %v19_v38  ;;  %v80_v37 = vld [vmem:[%s2750_s0 + $0x210] sm:$0xff]  ;;  %v83_v38 = vld [vmem:[%s2750_s0 + $0x228] sm:$0xff] }
  0x45   :  { %795 = vmatprep.mubr.f32.mxu0 %v21_v39  ;;  %v85_v39 = vld [vmem:[%s2750_s0 + $0x238] sm:$0xff] }
  0x47   :  { %411 = vmatmul.mubr.f32.gmra.mrb[2].mxu1 %v18_v0  ;;  %v82_v0 = vld [vmem:[%s2750_s0 + $0x220] sm:$0xff] }
  0x48   :  { %796 = vmatmul.mubr.f32.gmra.mrb[2].mxu0 %v20_v40  ;;  %415 = vmatprep.mubr.f32.mxu1 %v23_v41  ;;  %v84_v40 = vld [vmem:[%s2750_s0 + $0x230] sm:$0xff]  ;;  %v87_v41 = vld [vmem:[%s2750_s0 + $0x248] sm:$0xff] }
  0x49   :  { %800 = vmatprep.mubr.f32.mxu0 %v25_v42  ;;  %v89_v42 = vld [vmem:[%s2750_s0 + $0x258] sm:$0xff] }
  0x4b   :  { %416 = vmatmul.mubr.f32.gmra.mrb[4].mxu1 %v22_v43  ;;  %v86_v43 = vld [vmem:[%s2750_s0 + $0x240] sm:$0xff] }
  0x4c   :  { %801 = vmatmul.mubr.f32.gmra.mrb[4].mxu0 %v24_v44  ;;  %420 = vmatprep.mubr.f32.mxu1 %v27_v45  ;;  %v88_v44 = vld [vmem:[%s2750_s0 + $0x250] sm:$0xff]  ;;  %v91_v45 = vld [vmem:[%s2750_s0 + $0x268] sm:$0xff] }
  0x4d   :  { %805 = vmatprep.mubr.f32.mxu0 %v29_v46  ;;  %v93_v46 = vld [vmem:[%s2750_s0 + $0x278] sm:$0xff] }
  0x4f   :  { %421 = vmatmul.mubr.f32.gmra.mrb[6].mxu1 %v26_v47  ;;  %v90_v47 = vld [vmem:[%s2750_s0 + $0x260] sm:$0xff] }
  0x50   :  { %806 = vmatmul.mubr.f32.gmra.mrb[6].mxu0 %v28_v48  ;;  %425 = vmatprep.mubr.f32.mxu1 %v31_v49  ;;  %v92_v48 = vld [vmem:[%s2750_s0 + $0x270] sm:$0xff]  ;;  %v95_v49 = vld [vmem:[%s2750_s0 + $0x288] sm:$0xff] }
  0x51   :  { %810 = vmatprep.mubr.f32.mxu0 %v33_v50  ;;  %v97_v50 = vld [vmem:[%s2750_s0 + $0x298] sm:$0xff] }
  0x53   :  { %426 = vmatmul.mubr.f32.gmra.mrb[8].mxu1 %v30_v51  ;;  %v94_v51 = vld [vmem:[%s2750_s0 + $0x280] sm:$0xff] }
  0x54   :  { %811 = vmatmul.mubr.f32.gmra.mrb[8].mxu0 %v32_v52  ;;  %430 = vmatprep.mubr.f32.mxu1 %v35_v53  ;;  %v96_v52 = vld [vmem:[%s2750_s0 + $0x290] sm:$0xff]  ;;  %v99_v53 = vld [vmem:[%s2750_s0 + $0x2a8] sm:$0xff] }
  0x55   :  { %815 = vmatprep.mubr.f32.mxu0 %v37_v54  ;;  %v101_v54 = vld [vmem:[%s2750_s0 + $0x2b8] sm:$0xff] }
  0x57   :  { %431 = vmatmul.mubr.f32.gmra.mrb[10].mxu1 %v34_v55  ;;  %v98_v55 = vld [vmem:[%s2750_s0 + $0x2a0] sm:$0xff] }
  0x58   :  { %816 = vmatmul.mubr.f32.gmra.mrb[10].mxu0 %v36_v56  ;;  %435 = vmatprep.mubr.f32.mxu1 %v39_v57  ;;  %v100_v56 = vld [vmem:[%s2750_s0 + $0x2b0] sm:$0xff]  ;;  %v103_v57 = vld [vmem:[%s2750_s0 + $0x2c8] sm:$0xff] }
  0x59   :  { %820 = vmatprep.mubr.f32.mxu0 %v41_v58  ;;  %v105_v58 = vld [vmem:[%s2750_s0 + $0x2d8] sm:$0xff] }
  0x5b   :  { %436 = vmatmul.mubr.f32.gmra.mrb[12].mxu1 %v38_v59  ;;  %v102_v59 = vld [vmem:[%s2750_s0 + $0x2c0] sm:$0xff] }
  0x5c   :  { %821 = vmatmul.mubr.f32.gmra.mrb[12].mxu0 %v40_v60  ;;  %440 = vmatprep.mubr.f32.mxu1 %v43_v61  ;;  %v104_v60 = vld [vmem:[%s2750_s0 + $0x2d0] sm:$0xff]  ;;  %v107_v61 = vld [vmem:[%s2750_s0 + $0x2e8] sm:$0xff] }
  0x5d   :  { %825 = vmatprep.mubr.f32.mxu0 %v45_v62  ;;  %v109_v62 = vld [vmem:[%s2750_s0 + $0x2f8] sm:$0xff] }
  0x5f   :  { %441 = vmatmul.mubr.f32.gmra.mrb[14].mxu1 %v42_v63  ;;  %v106_v63 = vld [vmem:[%s2750_s0 + $0x2e0] sm:$0xff] }
  0x60   :  { %826 = vmatmul.mubr.f32.gmra.mrb[14].mxu0 %v44_v1  ;;  %445 = vmatprep.mubr.f32.mxu1 %v47_v2  ;;  %v108_v1 = vld [vmem:[%s2750_s0 + $0x2f0] sm:$0xff]  ;;  %v111_v2 = vld [vmem:[%s2750_s0 + $0x308] sm:$0xff] }
  0x61   :  { %830 = vmatprep.mubr.f32.mxu0 %v49_v3  ;;  %v113_v3 = vld [vmem:[%s2750_s0 + $0x318] sm:$0xff] }
  0x63   :  { %446 = vmatmul.mubr.f32.gmra.mrb[16].mxu1 %v46_v4  ;;  %v110_v4 = vld [vmem:[%s2750_s0 + $0x300] sm:$0xff] }
  0x64   :  { %831 = vmatmul.mubr.f32.gmra.mrb[16].mxu0 %v48_v5  ;;  %450 = vmatprep.mubr.f32.mxu1 %v51_v6  ;;  %v112_v5 = vld [vmem:[%s2750_s0 + $0x310] sm:$0xff]  ;;  %v115_v6 = vld [vmem:[%s2750_s0 + $0x328] sm:$0xff] }
  0x65   :  { %835 = vmatprep.mubr.f32.mxu0 %v53_v7  ;;  %v117_v7 = vld [vmem:[%s2750_s0 + $0x338] sm:$0xff] }
  0x67   :  { %451 = vmatmul.mubr.f32.gmra.mrb[18].mxu1 %v50_v8  ;;  %v114_v8 = vld [vmem:[%s2750_s0 + $0x320] sm:$0xff] }
  0x68   :  { %836 = vmatmul.mubr.f32.gmra.mrb[18].mxu0 %v52_v9  ;;  %455 = vmatprep.mubr.f32.mxu1 %v55_v10  ;;  %v116_v9 = vld [vmem:[%s2750_s0 + $0x330] sm:$0xff]  ;;  %v119_v10 = vld [vmem:[%s2750_s0 + $0x348] sm:$0xff] }
  0x69   :  { %840 = vmatprep.mubr.f32.mxu0 %v57_v11  ;;  %v121_v11 = vld [vmem:[%s2750_s0 + $0x358] sm:$0xff] }
  0x6b   :  { %456 = vmatmul.mubr.f32.gmra.mrb[20].mxu1 %v54_v12  ;;  %v118_v12 = vld [vmem:[%s2750_s0 + $0x340] sm:$0xff] }
  0x6c   :  { %841 = vmatmul.mubr.f32.gmra.mrb[20].mxu0 %v56_v13  ;;  %460 = vmatprep.mubr.f32.mxu1 %v59_v14  ;;  %v120_v13 = vld [vmem:[%s2750_s0 + $0x350] sm:$0xff]  ;;  %v123_v14 = vld [vmem:[%s2750_s0 + $0x368] sm:$0xff] }
  0x6d   :  { %845 = vmatprep.mubr.f32.mxu0 %v61_v15  ;;  %v125_v15 = vld [vmem:[%s2750_s0 + $0x378] sm:$0xff] }
  0x6f   :  { %461 = vmatmul.mubr.f32.gmra.mrb[22].mxu1 %v58_v16  ;;  %v122_v16 = vld [vmem:[%s2750_s0 + $0x360] sm:$0xff] }
  0x70   :  { %846 = vmatmul.mubr.f32.gmra.mrb[22].mxu0 %v60_v17  ;;  %465 = vmatprep.mubr.f32.mxu1 %v63_v18  ;;  %v124_v17 = vld [vmem:[%s2750_s0 + $0x370] sm:$0xff]  ;;  %v127_v18 = vld [vmem:[%s2750_s0 + $0x388] sm:$0xff] }
  0x71   :  { %850 = vmatprep.mubr.f32.mxu0 %v65_v19  ;;  %v129_v19 = vld [vmem:[%s2750_s0 + $0x398] sm:$0xff] }
  0x73   :  { %466 = vmatmul.mubr.f32.gmra.mrb[24].mxu1 %v62_v20  ;;  %v126_v20 = vld [vmem:[%s2750_s0 + $0x380] sm:$0xff] }
  0x74   :  { %851 = vmatmul.mubr.f32.gmra.mrb[24].mxu0 %v64_v21  ;;  %470 = vmatprep.mubr.f32.mxu1 %v67_v22  ;;  %v128_v21 = vld [vmem:[%s2750_s0 + $0x390] sm:$0xff]  ;;  %v131_v22 = vld [vmem:[%s2750_s0 + $0x3a8] sm:$0xff] }
  0x75   :  { %855 = vmatprep.mubr.f32.mxu0 %v69_v23  ;;  %v133_v23 = vld [vmem:[%s2750_s0 + $0x3b8] sm:$0xff] }
  0x77   :  { %471 = vmatmul.mubr.f32.gmra.mrb[26].mxu1 %v66_v24  ;;  %v130_v24 = vld [vmem:[%s2750_s0 + $0x3a0] sm:$0xff] }
  0x78   :  { %856 = vmatmul.mubr.f32.gmra.mrb[26].mxu0 %v68_v25  ;;  %475 = vmatprep.mubr.f32.mxu1 %v71_v26  ;;  %v132_v25 = vld [vmem:[%s2750_s0 + $0x3b0] sm:$0xff]  ;;  %v135_v26 = vld [vmem:[%s2750_s0 + $0x3c8] sm:$0xff] }
  0x79   :  { %860 = vmatprep.mubr.f32.mxu0 %v73_v27  ;;  %v137_v27 = vld [vmem:[%s2750_s0 + $0x3d8] sm:$0xff] }
  0x7b   :  { %476 = vmatmul.mubr.f32.gmra.mrb[28].mxu1 %v70_v28  ;;  %v134_v28 = vld [vmem:[%s2750_s0 + $0x3c0] sm:$0xff] }
  0x7c   :  { %861 = vmatmul.mubr.f32.gmra.mrb[28].mxu0 %v72_v29  ;;  %480 = vmatprep.mubr.f32.mxu1 %v75_v30  ;;  %v136_v29 = vld [vmem:[%s2750_s0 + $0x3d0] sm:$0xff]  ;;  %v139_v30 = vld [vmem:[%s2750_s0 + $0x3e8] sm:$0xff] }
  0x7d   :  { %865 = vmatprep.mubr.f32.mxu0 %v77_v31  ;;  %v141_v31 = vld [vmem:[%s2750_s0 + $0x3f8] sm:$0xff] }
  0x7f   :  { %481 = vmatmul.mubr.f32.gmra.mrb[30].mxu1 %v74_v32  ;;  %v138_v32 = vld [vmem:[%s2750_s0 + $0x3e0] sm:$0xff] }
  0x80   :  { %866 = vmatmul.mubr.f32.gmra.mrb[30].mxu0 %v76_v33  ;;  %485 = vmatprep.mubr.f32.mxu1 %v79_v34  ;;  %v140_v33 = vld [vmem:[%s2750_s0 + $0x3f0] sm:$0xff]  ;;  %v143_v34 = vld [vmem:[%s2750_s0 + $0x408] sm:$0xff] }
  0x81   :  { %870 = vmatprep.mubr.f32.mxu0 %v81_v35  ;;  %v145_v35 = vld [vmem:[%s2750_s0 + $0x418] sm:$0xff] }
  0x83   :  { %486 = vmatmul.mubr.f32.gmra.mrb[32].mxu1 %v78_v36  ;;  %v142_v36 = vld [vmem:[%s2750_s0 + $0x400] sm:$0xff] }
  0x84   :  { %871 = vmatmul.mubr.f32.gmra.mrb[32].mxu0 %v80_v37  ;;  %490 = vmatprep.mubr.f32.mxu1 %v83_v38  ;;  %v144_v37 = vld [vmem:[%s2750_s0 + $0x410] sm:$0xff]  ;;  %v147_v38 = vld [vmem:[%s2750_s0 + $0x428] sm:$0xff] }
  0x85   :  { %875 = vmatprep.mubr.f32.mxu0 %v85_v39  ;;  %v149_v39 = vld [vmem:[%s2750_s0 + $0x438] sm:$0xff] }
  0x87   :  { %491 = vmatmul.mubr.f32.gmra.mrb[34].mxu1 %v82_v0  ;;  %v146_v0 = vld [vmem:[%s2750_s0 + $0x420] sm:$0xff] }
  0x88   :  { %876 = vmatmul.mubr.f32.gmra.mrb[34].mxu0 %v84_v40  ;;  %495 = vmatprep.mubr.f32.mxu1 %v87_v41  ;;  %v148_v40 = vld [vmem:[%s2750_s0 + $0x430] sm:$0xff]  ;;  %v151_v41 = vld [vmem:[%s2750_s0 + $0x448] sm:$0xff] }
  0x89   :  { %880 = vmatprep.mubr.f32.mxu0 %v89_v42  ;;  %v153_v42 = vld [vmem:[%s2750_s0 + $0x458] sm:$0xff] }
  0x8b   :  { %496 = vmatmul.mubr.f32.gmra.mrb[36].mxu1 %v86_v43  ;;  %v150_v43 = vld [vmem:[%s2750_s0 + $0x440] sm:$0xff] }
  0x8c   :  { %881 = vmatmul.mubr.f32.gmra.mrb[36].mxu0 %v88_v44  ;;  %500 = vmatprep.mubr.f32.mxu1 %v91_v45  ;;  %v152_v44 = vld [vmem:[%s2750_s0 + $0x450] sm:$0xff]  ;;  %v155_v45 = vld [vmem:[%s2750_s0 + $0x468] sm:$0xff] }
  0x8d   :  { %885 = vmatprep.mubr.f32.mxu0 %v93_v46  ;;  %v157_v46 = vld [vmem:[%s2750_s0 + $0x478] sm:$0xff] }
  0x8f   :  { %501 = vmatmul.mubr.f32.gmra.mrb[38].mxu1 %v90_v47  ;;  %v154_v47 = vld [vmem:[%s2750_s0 + $0x460] sm:$0xff] }
  0x90   :  { %886 = vmatmul.mubr.f32.gmra.mrb[38].mxu0 %v92_v48  ;;  %505 = vmatprep.mubr.f32.mxu1 %v95_v49  ;;  %v156_v48 = vld [vmem:[%s2750_s0 + $0x470] sm:$0xff]  ;;  %v159_v49 = vld [vmem:[%s2750_s0 + $0x488] sm:$0xff] }
  0x91   :  { %890 = vmatprep.mubr.f32.mxu0 %v97_v50  ;;  %v161_v50 = vld [vmem:[%s2750_s0 + $0x498] sm:$0xff] }
  0x93   :  { %506 = vmatmul.mubr.f32.gmra.mrb[40].mxu1 %v94_v51  ;;  %v158_v51 = vld [vmem:[%s2750_s0 + $0x480] sm:$0xff] }
  0x94   :  { %891 = vmatmul.mubr.f32.gmra.mrb[40].mxu0 %v96_v52  ;;  %510 = vmatprep.mubr.f32.mxu1 %v99_v53  ;;  %v160_v52 = vld [vmem:[%s2750_s0 + $0x490] sm:$0xff]  ;;  %v163_v53 = vld [vmem:[%s2750_s0 + $0x4a8] sm:$0xff] }
  0x95   :  { %895 = vmatprep.mubr.f32.mxu0 %v101_v54  ;;  %v165_v54 = vld [vmem:[%s2750_s0 + $0x4b8] sm:$0xff] }
  0x97   :  { %511 = vmatmul.mubr.f32.gmra.mrb[42].mxu1 %v98_v55  ;;  %v162_v55 = vld [vmem:[%s2750_s0 + $0x4a0] sm:$0xff] }
  0x98   :  { %896 = vmatmul.mubr.f32.gmra.mrb[42].mxu0 %v100_v56  ;;  %515 = vmatprep.mubr.f32.mxu1 %v103_v57  ;;  %v164_v56 = vld [vmem:[%s2750_s0 + $0x4b0] sm:$0xff]  ;;  %v167_v57 = vld [vmem:[%s2750_s0 + $0x4c8] sm:$0xff] }
  0x99   :  { %900 = vmatprep.mubr.f32.mxu0 %v105_v58  ;;  %v169_v58 = vld [vmem:[%s2750_s0 + $0x4d8] sm:$0xff] }
  0x9b   :  { %516 = vmatmul.mubr.f32.gmra.mrb[44].mxu1 %v102_v59  ;;  %v166_v59 = vld [vmem:[%s2750_s0 + $0x4c0] sm:$0xff] }
  0x9c   :  { %901 = vmatmul.mubr.f32.gmra.mrb[44].mxu0 %v104_v60  ;;  %520 = vmatprep.mubr.f32.mxu1 %v107_v61  ;;  %v168_v60 = vld [vmem:[%s2750_s0 + $0x4d0] sm:$0xff]  ;;  %v171_v61 = vld [vmem:[%s2750_s0 + $0x4e8] sm:$0xff] }
  0x9d   :  { %905 = vmatprep.mubr.f32.mxu0 %v109_v62  ;;  %v173_v62 = vld [vmem:[%s2750_s0 + $0x4f8] sm:$0xff] }
  0x9f   :  { %521 = vmatmul.mubr.f32.gmra.mrb[46].mxu1 %v106_v63  ;;  %v170_v63 = vld [vmem:[%s2750_s0 + $0x4e0] sm:$0xff] }
  0xa0   :  { %906 = vmatmul.mubr.f32.gmra.mrb[46].mxu0 %v108_v1  ;;  %525 = vmatprep.mubr.f32.mxu1 %v111_v2  ;;  %v172_v1 = vld [vmem:[%s2750_s0 + $0x4f0] sm:$0xff]  ;;  %v175_v2 = vld [vmem:[%s2750_s0 + $0x508] sm:$0xff] }
  0xa1   :  { %910 = vmatprep.mubr.f32.mxu0 %v113_v3  ;;  %v177_v3 = vld [vmem:[%s2750_s0 + $0x518] sm:$0xff] }
  0xa3   :  { %526 = vmatmul.mubr.f32.gmra.mrb[48].mxu1 %v110_v4  ;;  %v174_v4 = vld [vmem:[%s2750_s0 + $0x500] sm:$0xff] }
  0xa4   :  { %911 = vmatmul.mubr.f32.gmra.mrb[48].mxu0 %v112_v5  ;;  %530 = vmatprep.mubr.f32.mxu1 %v115_v6  ;;  %v176_v5 = vld [vmem:[%s2750_s0 + $0x510] sm:$0xff]  ;;  %v179_v6 = vld [vmem:[%s2750_s0 + $0x528] sm:$0xff] }
  0xa5   :  { %915 = vmatprep.mubr.f32.mxu0 %v117_v7  ;;  %v181_v7 = vld [vmem:[%s2750_s0 + $0x538] sm:$0xff] }
  0xa7   :  { %531 = vmatmul.mubr.f32.gmra.mrb[50].mxu1 %v114_v8  ;;  %v178_v8 = vld [vmem:[%s2750_s0 + $0x520] sm:$0xff] }
  0xa8   :  { %916 = vmatmul.mubr.f32.gmra.mrb[50].mxu0 %v116_v9  ;;  %535 = vmatprep.mubr.f32.mxu1 %v119_v10  ;;  %v180_v9 = vld [vmem:[%s2750_s0 + $0x530] sm:$0xff]  ;;  %v183_v10 = vld [vmem:[%s2750_s0 + $0x548] sm:$0xff] }
  0xa9   :  { %920 = vmatprep.mubr.f32.mxu0 %v121_v11  ;;  %v185_v11 = vld [vmem:[%s2750_s0 + $0x558] sm:$0xff] }
  0xab   :  { %536 = vmatmul.mubr.f32.gmra.mrb[52].mxu1 %v118_v12  ;;  %v182_v12 = vld [vmem:[%s2750_s0 + $0x540] sm:$0xff] }
  0xac   :  { %921 = vmatmul.mubr.f32.gmra.mrb[52].mxu0 %v120_v13  ;;  %540 = vmatprep.mubr.f32.mxu1 %v123_v14  ;;  %v184_v13 = vld [vmem:[%s2750_s0 + $0x550] sm:$0xff]  ;;  %v187_v14 = vld [vmem:[%s2750_s0 + $0x568] sm:$0xff] }
  0xad   :  { %925 = vmatprep.mubr.f32.mxu0 %v125_v15  ;;  %v189_v15 = vld [vmem:[%s2750_s0 + $0x578] sm:$0xff] }
  0xaf   :  { %541 = vmatmul.mubr.f32.gmra.mrb[54].mxu1 %v122_v16  ;;  %v186_v16 = vld [vmem:[%s2750_s0 + $0x560] sm:$0xff] }
  0xb0   :  { %926 = vmatmul.mubr.f32.gmra.mrb[54].mxu0 %v124_v17  ;;  %545 = vmatprep.mubr.f32.mxu1 %v127_v18  ;;  %v188_v17 = vld [vmem:[%s2750_s0 + $0x570] sm:$0xff]  ;;  %v191_v18 = vld [vmem:[%s2750_s0 + $0x588] sm:$0xff] }
  0xb1   :  { %930 = vmatprep.mubr.f32.mxu0 %v129_v19  ;;  %v193_v19 = vld [vmem:[%s2750_s0 + $0x598] sm:$0xff] }
  0xb3   :  { %546 = vmatmul.mubr.f32.gmra.mrb[56].mxu1 %v126_v20  ;;  %v190_v20 = vld [vmem:[%s2750_s0 + $0x580] sm:$0xff] }
  0xb4   :  { %931 = vmatmul.mubr.f32.gmra.mrb[56].mxu0 %v128_v21  ;;  %550 = vmatprep.mubr.f32.mxu1 %v131_v22  ;;  %v192_v21 = vld [vmem:[%s2750_s0 + $0x590] sm:$0xff]  ;;  %v195_v22 = vld [vmem:[%s2750_s0 + $0x5a8] sm:$0xff] }
  0xb5   :  { %935 = vmatprep.mubr.f32.mxu0 %v133_v23  ;;  %v197_v23 = vld [vmem:[%s2750_s0 + $0x5b8] sm:$0xff] }
  0xb7   :  { %551 = vmatmul.mubr.f32.gmra.mrb[58].mxu1 %v130_v24  ;;  %v194_v24 = vld [vmem:[%s2750_s0 + $0x5a0] sm:$0xff] }
  0xb8   :  { %936 = vmatmul.mubr.f32.gmra.mrb[58].mxu0 %v132_v25  ;;  %555 = vmatprep.mubr.f32.mxu1 %v135_v26  ;;  %v196_v25 = vld [vmem:[%s2750_s0 + $0x5b0] sm:$0xff]  ;;  %v199_v26 = vld [vmem:[%s2750_s0 + $0x5c8] sm:$0xff] }
  0xb9   :  { %940 = vmatprep.mubr.f32.mxu0 %v137_v27  ;;  %v201_v27 = vld [vmem:[%s2750_s0 + $0x5d8] sm:$0xff] }
  0xbb   :  { %556 = vmatmul.mubr.f32.gmra.mrb[60].mxu1 %v134_v28  ;;  %v198_v28 = vld [vmem:[%s2750_s0 + $0x5c0] sm:$0xff] }
  0xbc   :  { %941 = vmatmul.mubr.f32.gmra.mrb[60].mxu0 %v136_v29  ;;  %560 = vmatprep.mubr.f32.mxu1 %v139_v30  ;;  %v200_v29 = vld [vmem:[%s2750_s0 + $0x5d0] sm:$0xff]  ;;  %v203_v30 = vld [vmem:[%s2750_s0 + $0x5e8] sm:$0xff] }
  0xbd   :  { %945 = vmatprep.mubr.f32.mxu0 %v141_v31  ;;  %v205_v31 = vld [vmem:[%s2750_s0 + $0x5f8] sm:$0xff] }
  0xbf   :  { %561 = vmatmul.mubr.f32.gmra.mrb[62].mxu1 %v138_v32  ;;  %v202_v32 = vld [vmem:[%s2750_s0 + $0x5e0] sm:$0xff] }
  0xc0   :  { %946 = vmatmul.mubr.f32.gmra.mrb[62].mxu0 %v140_v33  ;;  %565 = vmatprep.mubr.f32.mxu1 %v143_v34  ;;  %v204_v33 = vld [vmem:[%s2750_s0 + $0x5f0] sm:$0xff]  ;;  %v207_v34 = vld [vmem:[%s2750_s0 + $0x608] sm:$0xff] }
  0xc1   :  { %950 = vmatprep.mubr.f32.mxu0 %v145_v35  ;;  %v209_v35 = vld [vmem:[%s2750_s0 + $0x618] sm:$0xff] }
  0xc3   :  { %566 = vmatmul.mubr.f32.gmra.mrb[64].mxu1 %v142_v36  ;;  %v206_v36 = vld [vmem:[%s2750_s0 + $0x600] sm:$0xff] }
  0xc4   :  { %951 = vmatmul.mubr.f32.gmra.mrb[64].mxu0 %v144_v37  ;;  %570 = vmatprep.mubr.f32.mxu1 %v147_v38  ;;  %v208_v37 = vld [vmem:[%s2750_s0 + $0x610] sm:$0xff]  ;;  %v211_v38 = vld [vmem:[%s2750_s0 + $0x628] sm:$0xff] }
  0xc5   :  { %955 = vmatprep.mubr.f32.mxu0 %v149_v39  ;;  %v213_v39 = vld [vmem:[%s2750_s0 + $0x638] sm:$0xff] }
  0xc7   :  { %571 = vmatmul.mubr.f32.gmra.mrb[66].mxu1 %v146_v0  ;;  %v210_v0 = vld [vmem:[%s2750_s0 + $0x620] sm:$0xff] }
  0xc8   :  { %956 = vmatmul.mubr.f32.gmra.mrb[66].mxu0 %v148_v40  ;;  %575 = vmatprep.mubr.f32.mxu1 %v151_v41  ;;  %v212_v40 = vld [vmem:[%s2750_s0 + $0x630] sm:$0xff]  ;;  %v215_v41 = vld [vmem:[%s2750_s0 + $0x648] sm:$0xff] }
  0xc9   :  { %960 = vmatprep.mubr.f32.mxu0 %v153_v42  ;;  %v217_v42 = vld [vmem:[%s2750_s0 + $0x658] sm:$0xff] }
  0xcb   :  { %576 = vmatmul.mubr.f32.gmra.mrb[68].mxu1 %v150_v43  ;;  %v214_v43 = vld [vmem:[%s2750_s0 + $0x640] sm:$0xff] }
  0xcc   :  { %961 = vmatmul.mubr.f32.gmra.mrb[68].mxu0 %v152_v44  ;;  %580 = vmatprep.mubr.f32.mxu1 %v155_v45  ;;  %v216_v44 = vld [vmem:[%s2750_s0 + $0x650] sm:$0xff]  ;;  %v219_v45 = vld [vmem:[%s2750_s0 + $0x668] sm:$0xff] }
  0xcd   :  { %965 = vmatprep.mubr.f32.mxu0 %v157_v46  ;;  %v221_v46 = vld [vmem:[%s2750_s0 + $0x678] sm:$0xff] }
  0xcf   :  { %581 = vmatmul.mubr.f32.gmra.mrb[70].mxu1 %v154_v47  ;;  %v218_v47 = vld [vmem:[%s2750_s0 + $0x660] sm:$0xff] }
  0xd0   :  { %966 = vmatmul.mubr.f32.gmra.mrb[70].mxu0 %v156_v48  ;;  %585 = vmatprep.mubr.f32.mxu1 %v159_v49  ;;  %v220_v48 = vld [vmem:[%s2750_s0 + $0x670] sm:$0xff]  ;;  %v223_v49 = vld [vmem:[%s2750_s0 + $0x688] sm:$0xff] }
  0xd1   :  { %970 = vmatprep.mubr.f32.mxu0 %v161_v50  ;;  %v225_v50 = vld [vmem:[%s2750_s0 + $0x698] sm:$0xff] }
  0xd3   :  { %586 = vmatmul.mubr.f32.gmra.mrb[72].mxu1 %v158_v51  ;;  %v222_v51 = vld [vmem:[%s2750_s0 + $0x680] sm:$0xff] }
  0xd4   :  { %971 = vmatmul.mubr.f32.gmra.mrb[72].mxu0 %v160_v52  ;;  %590 = vmatprep.mubr.f32.mxu1 %v163_v53  ;;  %v224_v52 = vld [vmem:[%s2750_s0 + $0x690] sm:$0xff]  ;;  %v227_v53 = vld [vmem:[%s2750_s0 + $0x6a8] sm:$0xff] }
  0xd5   :  { %975 = vmatprep.mubr.f32.mxu0 %v165_v54  ;;  %v229_v54 = vld [vmem:[%s2750_s0 + $0x6b8] sm:$0xff] }
  0xd7   :  { %591 = vmatmul.mubr.f32.gmra.mrb[74].mxu1 %v162_v55  ;;  %v2360_v55 = vld [vmem:[%s2751_s2] ss:$0 sm:$0xff] }
  0xd8   :  { %976 = vmatmul.mubr.f32.gmra.mrb[74].mxu0 %v164_v56  ;;  %595 = vmatprep.mubr.f32.mxu1 %v167_v57  ;;  %v226_v56 = vld [vmem:[%s2750_s0 + $0x6a0] sm:$0xff]  ;;  %v228_v57 = vld [vmem:[%s2750_s0 + $0x6b0] sm:$0xff] }
  0xd9   :  { %980 = vmatprep.mubr.f32.mxu0 %v169_v58  ;;  %v231_v58 = vld [vmem:[%s2750_s0 + $0x6c8] sm:$0xff] }
  0xdb   :  { %596 = vmatmul.mubr.f32.gmra.mrb[76].mxu1 %v166_v59 }
  0xdc   :  { %981 = vmatmul.mubr.f32.gmra.mrb[76].mxu0 %v168_v60  ;;  %600 = vmatprep.mubr.f32.mxu1 %v171_v61  ;;  %v233_v60 = vld [vmem:[%s2750_s0 + $0x6d8] sm:$0xff] }
  0xdd   :  { %985 = vmatprep.mubr.f32.mxu0 %v173_v62 }
  0xdf   :  { %601 = vmatmul.mubr.f32.gmra.mrb[78].mxu1 %v170_v63 }
  0xe0   :  { %986 = vmatmul.mubr.f32.gmra.mrb[78].mxu0 %v172_v1  ;;  %605 = vmatprep.mubr.f32.mxu1 %v175_v2  ;;  %v230_v2 = vld [vmem:[%s2750_s0 + $0x6c0] sm:$0xff] }
  0xe1   :  { %990 = vmatprep.mubr.f32.mxu0 %v177_v3 }
  0xe3   :  { %606 = vmatmul.mubr.f32.gmra.mrb[80].mxu1 %v174_v4  ;;  %v232_v4 = vld [vmem:[%s2750_s0 + $0x6d0] sm:$0xff] }
  0xe4   :  { %991 = vmatmul.mubr.f32.gmra.mrb[80].mxu0 %v176_v5  ;;  %610 = vmatprep.mubr.f32.mxu1 %v179_v6  ;;  %v235_v5 = vld [vmem:[%s2750_s0 + $0x6e8] sm:$0xff] }
  0xe5   :  { %995 = vmatprep.mubr.f32.mxu0 %v181_v7  ;;  %v237_v7 = vld [vmem:[%s2750_s0 + $0x6f8] sm:$0xff] }
  0xe7   :  { %611 = vmatmul.mubr.f32.gmra.mrb[82].mxu1 %v178_v8 }
  0xe8   :  { %996 = vmatmul.mubr.f32.gmra.mrb[82].mxu0 %v180_v9  ;;  %615 = vmatprep.mubr.f32.mxu1 %v183_v10 }
  0xe9   :  { %1000 = vmatprep.mubr.f32.mxu0 %v185_v11 }
  0xeb   :  { %616 = vmatmul.mubr.f32.gmra.mrb[84].mxu1 %v182_v12 }
  0xec   :  { %1001 = vmatmul.mubr.f32.gmra.mrb[84].mxu0 %v184_v13  ;;  %620 = vmatprep.mubr.f32.mxu1 %v187_v14  ;;  %v234_v13 = vld [vmem:[%s2750_s0 + $0x6e0] sm:$0xff] }
  0xed   :  { %1005 = vmatprep.mubr.f32.mxu0 %v189_v15  ;;  %v236_v15 = vld [vmem:[%s2750_s0 + $0x6f0] sm:$0xff] }
  0xef   :  { %621 = vmatmul.mubr.f32.gmra.mrb[86].mxu1 %v186_v16  ;;  %v239_v16 = vld [vmem:[%s2750_s0 + $0x708] sm:$0xff] }
  0xf0   :  { %1006 = vmatmul.mubr.f32.gmra.mrb[86].mxu0 %v188_v17  ;;  %625 = vmatprep.mubr.f32.mxu1 %v191_v18  ;;  %v241_v18 = vld [vmem:[%s2750_s0 + $0x718] sm:$0xff] }
  0xf1   :  { %1010 = vmatprep.mubr.f32.mxu0 %v193_v19 }
  0xf3   :  { %626 = vmatmul.mubr.f32.gmra.mrb[88].mxu1 %v190_v20 }
  0xf4   :  { %1011 = vmatmul.mubr.f32.gmra.mrb[88].mxu0 %v192_v21  ;;  %630 = vmatprep.mubr.f32.mxu1 %v195_v22 }
  0xf5   :  { %1015 = vmatprep.mubr.f32.mxu0 %v197_v23 }
  0xf7   :  { %631 = vmatmul.mubr.f32.gmra.mrb[90].mxu1 %v194_v24  ;;  %v238_v24 = vld [vmem:[%s2750_s0 + $0x700] sm:$0xff] }
  0xf8   :  { %1016 = vmatmul.mubr.f32.gmra.mrb[90].mxu0 %v196_v25  ;;  %635 = vmatprep.mubr.f32.mxu1 %v199_v26  ;;  %v240_v26 = vld [vmem:[%s2750_s0 + $0x710] sm:$0xff] }
  0xf9   :  { %1020 = vmatprep.mubr.f32.mxu0 %v201_v27  ;;  %v243_v27 = vld [vmem:[%s2750_s0 + $0x728] sm:$0xff] }
  0xfb   :  { %636 = vmatmul.mubr.f32.gmra.mrb[92].mxu1 %v198_v28 }
  0xfc   :  { %1021 = vmatmul.mubr.f32.gmra.mrb[92].mxu0 %v200_v29  ;;  %640 = vmatprep.mubr.f32.mxu1 %v203_v30  ;;  %v245_v29 = vld [vmem:[%s2750_s0 + $0x738] sm:$0xff] }
  0xfd   :  { %1025 = vmatprep.mubr.f32.mxu0 %v205_v31 }
  0xff   :  { %641 = vmatmul.mubr.f32.gmra.mrb[94].mxu1 %v202_v32 }
 0x100   :  { %1026 = vmatmul.mubr.f32.gmra.mrb[94].mxu0 %v204_v33  ;;  %645 = vmatprep.mubr.f32.mxu1 %v207_v34 }
 0x101   :  { %1030 = vmatprep.mubr.f32.mxu0 %v209_v35  ;;  %v242_v35 = vld [vmem:[%s2750_s0 + $0x720] sm:$0xff] }
 0x103   :  { %646 = vmatmul.mubr.f32.gmra.mrb[96].mxu1 %v206_v36 }
 0x104   :  { %1031 = vmatmul.mubr.f32.gmra.mrb[96].mxu0 %v208_v37  ;;  %650 = vmatprep.mubr.f32.mxu1 %v211_v38  ;;  %v244_v37 = vld [vmem:[%s2750_s0 + $0x730] sm:$0xff]  ;;  %v247_v38 = vld [vmem:[%s2750_s0 + $0x748] sm:$0xff] }
 0x105   :  { %1035 = vmatprep.mubr.f32.mxu0 %v213_v39 }
 0x107   :  { %651 = vmatmul.mubr.f32.gmra.mrb[98].mxu1 %v210_v0  ;;  %v249_v0 = vld [vmem:[%s2750_s0 + $0x758] sm:$0xff] }
 0x108   :  { %1036 = vmatmul.mubr.f32.gmra.mrb[98].mxu0 %v212_v40  ;;  %655 = vmatprep.mubr.f32.mxu1 %v215_v41 }
 0x109   :  { %1040 = vmatprep.mubr.f32.mxu0 %v217_v42 }
 0x10b   :  { %656 = vmatmul.mubr.f32.gmra.mrb[100].mxu1 %v214_v43 }
 0x10c   :  { %1041 = vmatmul.mubr.f32.gmra.mrb[100].mxu0 %v216_v44  ;;  %660 = vmatprep.mubr.f32.mxu1 %v219_v45  ;;  %v246_v45 = vld [vmem:[%s2750_s0 + $0x740] sm:$0xff] }
 0x10d   :  { %1045 = vmatprep.mubr.f32.mxu0 %v221_v46 }
 0x10f   :  { %661 = vmatmul.mubr.f32.gmra.mrb[102].mxu1 %v218_v47  ;;  %v248_v47 = vld [vmem:[%s2750_s0 + $0x750] sm:$0xff] }
 0x110   :  { %1046 = vmatmul.mubr.f32.gmra.mrb[102].mxu0 %v220_v48  ;;  %665 = vmatprep.mubr.f32.mxu1 %v223_v49  ;;  %v251_v48 = vld [vmem:[%s2750_s0 + $0x768] sm:$0xff] }
 0x111   :  { %1050 = vmatprep.mubr.f32.mxu0 %v225_v50  ;;  %v253_v50 = vld [vmem:[%s2750_s0 + $0x778] sm:$0xff] }
 0x113   :  { %666 = vmatmul.mubr.f32.gmra.mrb[104].mxu1 %v222_v51 }
 0x114   :  { %1051 = vmatmul.mubr.f32.gmra.mrb[104].mxu0 %v224_v52  ;;  %670 = vmatprep.mubr.f32.mxu1 %v227_v53 }
 0x115   :  { %1055 = vmatprep.mubr.f32.mxu0 %v229_v54 }
 0x116   :  { %v407_v59 = vpop.f32.mrb[0].mxu1 }
 0x117   :  { %v408_v61 = vadd.f32 %v2360_v55, %v407_v59  ;;  %v409_v62 = vpop.f32.mrb[1].mxu1  ;;  %671 = vmatmul.mubr.f32.gmra.mrb[106].mxu1 %v226_v56  ;;  %v792_v63 = vpop.f32.mrb[0].mxu0  ;;  %v252_v59 = vld [vmem:[%s2750_s0 + $0x770] sm:$0xff] }
 0x118   :  { %v794_v1 = vpop.f32.mrb[1].mxu0  ;;  %1056 = vmatmul.mubr.f32.gmra.mrb[106].mxu0 %v228_v57  ;;  %675 = vmatprep.mubr.f32.mxu1 %v231_v58  ;;  %v250_v57 = vld [vmem:[%s2750_s0 + $0x760] sm:$0xff]  ;;  %v257_v62 = vld [vmem:[%s2750_s0 + $0x798] sm:$0xff] }
 0x119   :  { %v793_v3 = vadd.f32 %v792_v63, %v408_v61  ;;  %1060 = vmatprep.mubr.f32.mxu0 %v233_v60  ;;  %v255_v60 = vld [vmem:[%s2750_s0 + $0x788] sm:$0xff] }
 0x11a   :  { %v412_v6 = vpop.f32.mrb[2].mxu1 }
 0x11b   :  { %v1111_v8 = vmax.f32 %v793_v3, 0.0  ;;  %v413_v9 = vadd.f32 %v2360_v55, %v412_v6  ;;  %v414_v10 = vpop.f32.mrb[3].mxu1  ;;  %676 = vmatmul.mubr.f32.gmra.mrb[108].mxu1 %v230_v2  ;;  %v797_v11 = vpop.f32.mrb[2].mxu0 }
 0x11c   :  { %v799_v12 = vpop.f32.mrb[3].mxu0  ;;  %1061 = vmatmul.mubr.f32.gmra.mrb[108].mxu0 %v232_v4  ;;  %680 = vmatprep.mubr.f32.mxu1 %v235_v5  ;;  %v254_v5 = vld [vmem:[%s2750_s0 + $0x780] sm:$0xff]  ;;  %v261_v10 = vld [vmem:[%s2750_s0 + $0x7b8] sm:$0xff] }
 0x11d   :  { %1175 = vst [vmem:[%s2752_s3] sm:$0xff] %v1111_v8  ;;  %v798_v14 = vadd.f32 %v797_v11, %v413_v9  ;;  %1065 = vmatprep.mubr.f32.mxu0 %v237_v7  ;;  %v256_v7 = vld [vmem:[%s2750_s0 + $0x790] sm:$0xff]  ;;  %v259_v8 = vld [vmem:[%s2750_s0 + $0x7a8] sm:$0xff] }
 0x11e   :  { %v417_v17 = vpop.f32.mrb[4].mxu1 }
 0x11f   :  { %v1112_v19 = vmax.f32 %v798_v14, 0.0  ;;  %v418_v20 = vadd.f32 %v2360_v55, %v417_v17  ;;  %v419_v21 = vpop.f32.mrb[5].mxu1  ;;  %681 = vmatmul.mubr.f32.gmra.mrb[110].mxu1 %v234_v13  ;;  %v802_v22 = vpop.f32.mrb[4].mxu0 }
 0x120   :  { %v804_v23 = vpop.f32.mrb[5].mxu0  ;;  %1066 = vmatmul.mubr.f32.gmra.mrb[110].mxu0 %v236_v15  ;;  %685 = vmatprep.mubr.f32.mxu1 %v239_v16  ;;  %v258_v16 = vld [vmem:[%s2750_s0 + $0x7a0] sm:$0xff]  ;;  %v265_v21 = vld [vmem:[%s2750_s0 + $0x7d8] sm:$0xff] }
 0x121   :  { %1176 = vst [vmem:[%s2752_s3 + $0x8] sm:$0xff] %v1112_v19  ;;  %v803_v25 = vadd.f32 %v802_v22, %v418_v20  ;;  %1070 = vmatprep.mubr.f32.mxu0 %v241_v18  ;;  %v260_v18 = vld [vmem:[%s2750_s0 + $0x7b0] sm:$0xff]  ;;  %v263_v19 = vld [vmem:[%s2750_s0 + $0x7c8] sm:$0xff] }
 0x122   :  { %v422_v28 = vpop.f32.mrb[6].mxu1 }
 0x123   :  { %v1113_v30 = vmax.f32 %v803_v25, 0.0  ;;  %v423_v31 = vadd.f32 %v2360_v55, %v422_v28  ;;  %v424_v32 = vpop.f32.mrb[7].mxu1  ;;  %686 = vmatmul.mubr.f32.gmra.mrb[112].mxu1 %v238_v24  ;;  %v807_v33 = vpop.f32.mrb[6].mxu0 }
 0x124   :  { %v809_v34 = vpop.f32.mrb[7].mxu0  ;;  %1071 = vmatmul.mubr.f32.gmra.mrb[112].mxu0 %v240_v26  ;;  %690 = vmatprep.mubr.f32.mxu1 %v243_v27  ;;  %v262_v27 = vld [vmem:[%s2750_s0 + $0x7c0] sm:$0xff]  ;;  %v269_v32 = vld [vmem:[%s2750_s0 + $0x7f8] sm:$0xff] }
 0x125   :  { %1177 = vst [vmem:[%s2752_s3 + $0x10] sm:$0xff] %v1113_v30  ;;  %v808_v36 = vadd.f32 %v807_v33, %v423_v31  ;;  %1075 = vmatprep.mubr.f32.mxu0 %v245_v29  ;;  %v264_v29 = vld [vmem:[%s2750_s0 + $0x7d0] sm:$0xff]  ;;  %v267_v30 = vld [vmem:[%s2750_s0 + $0x7e8] sm:$0xff] }
 0x126   :  { %v427_v39 = vpop.f32.mrb[8].mxu1 }
 0x127   :  { %v1114_v40 = vmax.f32 %v808_v36, 0.0  ;;  %v428_v41 = vadd.f32 %v2360_v55, %v427_v39  ;;  %v429_v42 = vpop.f32.mrb[9].mxu1  ;;  %691 = vmatmul.mubr.f32.gmra.mrb[114].mxu1 %v242_v35  ;;  %v812_v43 = vpop.f32.mrb[8].mxu0 }
 0x128   :  { %v814_v44 = vpop.f32.mrb[9].mxu0  ;;  %1076 = vmatmul.mubr.f32.gmra.mrb[114].mxu0 %v244_v37  ;;  %695 = vmatprep.mubr.f32.mxu1 %v247_v38  ;;  %v266_v38 = vld [vmem:[%s2750_s0 + $0x7e0] sm:$0xff] }
 0x129   :  { %1178 = vst [vmem:[%s2752_s3 + $0x18] sm:$0xff] %v1114_v40  ;;  %v813_v46 = vadd.f32 %v812_v43, %v428_v41  ;;  %1080 = vmatprep.mubr.f32.mxu0 %v249_v0  ;;  %v268_v0 = vld [vmem:[%s2750_s0 + $0x7f0] sm:$0xff] }
 0x12a   :  { %v432_v49 = vpop.f32.mrb[10].mxu1 }
 0x12b   :  { %v1115_v51 = vmax.f32 %v813_v46, 0.0  ;;  %v433_v52 = vadd.f32 %v2360_v55, %v432_v49  ;;  %v434_v53 = vpop.f32.mrb[11].mxu1  ;;  %696 = vmatmul.mubr.f32.gmra.mrb[116].mxu1 %v246_v45  ;;  %v817_v54 = vpop.f32.mrb[10].mxu0 }
 0x12c   :  { %v819_v56 = vpop.f32.mrb[11].mxu0  ;;  %1081 = vmatmul.mubr.f32.gmra.mrb[116].mxu0 %v248_v47  ;;  %700 = vmatprep.mubr.f32.mxu1 %v251_v48 }
 0x12d   :  { %1179 = vst [vmem:[%s2752_s3 + $0x20] sm:$0xff] %v1115_v51  ;;  %v818_v58 = vadd.f32 %v817_v54, %v433_v52  ;;  %1085 = vmatprep.mubr.f32.mxu0 %v253_v50 }
 0x12e   :  { %v437_v61 = vpop.f32.mrb[12].mxu1 }
 0x12f   :  { %v1116_v63 = vmax.f32 %v818_v58, 0.0  ;;  %v438_v1 = vadd.f32 %v2360_v55, %v437_v61  ;;  %v439_v2 = vpop.f32.mrb[13].mxu1  ;;  %701 = vmatmul.mubr.f32.gmra.mrb[118].mxu1 %v250_v57  ;;  %v822_v3 = vpop.f32.mrb[12].mxu0 }
 0x130   :  { %v824_v4 = vpop.f32.mrb[13].mxu0  ;;  %1086 = vmatmul.mubr.f32.gmra.mrb[118].mxu0 %v252_v59  ;;  %705 = vmatprep.mubr.f32.mxu1 %v255_v60 }
 0x131   :  { %1180 = vst [vmem:[%s2752_s3 + $0x28] sm:$0xff] %v1116_v63  ;;  %v823_v6 = vadd.f32 %v822_v3, %v438_v1  ;;  %1090 = vmatprep.mubr.f32.mxu0 %v257_v62 }
 0x132   :  { %v442_v9 = vpop.f32.mrb[14].mxu1 }
 0x133   :  { %v1117_v11 = vmax.f32 %v823_v6, 0.0  ;;  %v443_v12 = vadd.f32 %v2360_v55, %v442_v9  ;;  %v444_v13 = vpop.f32.mrb[15].mxu1  ;;  %706 = vmatmul.mubr.f32.gmra.mrb[120].mxu1 %v254_v5  ;;  %v827_v14 = vpop.f32.mrb[14].mxu0 }
 0x134   :  { %v829_v15 = vpop.f32.mrb[15].mxu0  ;;  %1091 = vmatmul.mubr.f32.gmra.mrb[120].mxu0 %v256_v7  ;;  %710 = vmatprep.mubr.f32.mxu1 %v259_v8 }
 0x135   :  { %1181 = vst [vmem:[%s2752_s3 + $0x30] sm:$0xff] %v1117_v11  ;;  %v828_v17 = vadd.f32 %v827_v14, %v443_v12  ;;  %1095 = vmatprep.mubr.f32.mxu0 %v261_v10 }
 0x136   :  { %v447_v20 = vpop.f32.mrb[16].mxu1 }
 0x137   :  { %v1118_v22 = vmax.f32 %v828_v17, 0.0  ;;  %v448_v23 = vadd.f32 %v2360_v55, %v447_v20  ;;  %v449_v24 = vpop.f32.mrb[17].mxu1  ;;  %711 = vmatmul.mubr.f32.gmra.mrb[122].mxu1 %v258_v16  ;;  %v832_v25 = vpop.f32.mrb[16].mxu0 }
 0x138   :  { %v834_v26 = vpop.f32.mrb[17].mxu0  ;;  %1096 = vmatmul.mubr.f32.gmra.mrb[122].mxu0 %v260_v18  ;;  %715 = vmatprep.mubr.f32.mxu1 %v263_v19 }
 0x139   :  { %1182 = vst [vmem:[%s2752_s3 + $0x38] sm:$0xff] %v1118_v22  ;;  %v833_v28 = vadd.f32 %v832_v25, %v448_v23  ;;  %1100 = vmatprep.mubr.f32.mxu0 %v265_v21 }
 0x13a   :  { %v452_v31 = vpop.f32.mrb[18].mxu1 }
 0x13b   :  { %v1119_v33 = vmax.f32 %v833_v28, 0.0  ;;  %v453_v34 = vadd.f32 %v2360_v55, %v452_v31  ;;  %v454_v35 = vpop.f32.mrb[19].mxu1  ;;  %716 = vmatmul.mubr.f32.gmra.mrb[124].mxu1 %v262_v27  ;;  %v837_v36 = vpop.f32.mrb[18].mxu0 }
 0x13c   :  { %v839_v37 = vpop.f32.mrb[19].mxu0  ;;  %1101 = vmatmul.mubr.f32.gmra.mrb[124].mxu0 %v264_v29  ;;  %720 = vmatprep.mubr.f32.mxu1 %v267_v30 }
 0x13d   :  { %1183 = vst [vmem:[%s2752_s3 + $0x40] sm:$0xff] %v1119_v33  ;;  %v838_v39 = vadd.f32 %v837_v36, %v453_v34  ;;  %1105 = vmatprep.mubr.f32.mxu0 %v269_v32 }
 0x13e   :  { %v457_v40 = vpop.f32.mrb[20].mxu1 }
 0x13f   :  { %v1120_v41 = vmax.f32 %v838_v39, 0.0  ;;  %v458_v42 = vadd.f32 %v2360_v55, %v457_v40  ;;  %v459_v43 = vpop.f32.mrb[21].mxu1  ;;  %721 = vmatmul.mubr.f32.gmra.mrb[126].mxu1 %v266_v38  ;;  %v842_v44 = vpop.f32.mrb[20].mxu0 }
 0x140   :  { %v844_v45 = vpop.f32.mrb[21].mxu0  ;;  %1106 = vmatmul.mubr.f32.gmra.mrb[126].mxu0 %v268_v0 }
 0x141   :  { %1184 = vst [vmem:[%s2752_s3 + $0x48] sm:$0xff] %v1120_v41  ;;  %v843_v46 = vadd.f32 %v842_v44, %v458_v42 }
 0x142   :  { %v462_v47 = vpop.f32.mrb[22].mxu1 }
 0x143   :  { %v1121_v48 = vmax.f32 %v843_v46, 0.0  ;;  %v463_v49 = vadd.f32 %v2360_v55, %v462_v47  ;;  %v464_v50 = vpop.f32.mrb[23].mxu1  ;;  %v847_v51 = vpop.f32.mrb[22].mxu0 }
 0x144   :  { %v849_v52 = vpop.f32.mrb[23].mxu0 }
 0x145   :  { %1185 = vst [vmem:[%s2752_s3 + $0x50] sm:$0xff] %v1121_v48  ;;  %v848_v53 = vadd.f32 %v847_v51, %v463_v49 }
 0x146   :  { %v467_v54 = vpop.f32.mrb[24].mxu1 }
 0x147   :  { %v1122_v56 = vmax.f32 %v848_v53, 0.0  ;;  %v468_v57 = vadd.f32 %v2360_v55, %v467_v54  ;;  %v469_v58 = vpop.f32.mrb[25].mxu1  ;;  %v852_v59 = vpop.f32.mrb[24].mxu0 }
 0x148   :  { %v854_v60 = vpop.f32.mrb[25].mxu0 }
 0x149   :  { %1186 = vst [vmem:[%s2752_s3 + $0x58] sm:$0xff] %v1122_v56  ;;  %v853_v61 = vadd.f32 %v852_v59, %v468_v57 }
 0x14a   :  { %v472_v62 = vpop.f32.mrb[26].mxu1 }
 0x14b   :  { %v1123_v63 = vmax.f32 %v853_v61, 0.0  ;;  %v473_v1 = vadd.f32 %v2360_v55, %v472_v62  ;;  %v474_v2 = vpop.f32.mrb[27].mxu1  ;;  %v857_v3 = vpop.f32.mrb[26].mxu0 }
 0x14c   :  { %v859_v4 = vpop.f32.mrb[27].mxu0 }
 0x14d   :  { %1187 = vst [vmem:[%s2752_s3 + $0x60] sm:$0xff] %v1123_v63  ;;  %v858_v5 = vadd.f32 %v857_v3, %v473_v1 }
 0x14e   :  { %v477_v6 = vpop.f32.mrb[28].mxu1 }
 0x14f   :  { %v1124_v7 = vmax.f32 %v858_v5, 0.0  ;;  %v478_v8 = vadd.f32 %v2360_v55, %v477_v6  ;;  %v479_v9 = vpop.f32.mrb[29].mxu1  ;;  %v862_v10 = vpop.f32.mrb[28].mxu0 }
 0x150   :  { %v864_v11 = vpop.f32.mrb[29].mxu0 }
 0x151   :  { %1188 = vst [vmem:[%s2752_s3 + $0x68] sm:$0xff] %v1124_v7  ;;  %v863_v12 = vadd.f32 %v862_v10, %v478_v8 }
 0x152   :  { %v482_v13 = vpop.f32.mrb[30].mxu1 }
 0x153   :  { %v1125_v14 = vmax.f32 %v863_v12, 0.0  ;;  %v483_v15 = vadd.f32 %v2360_v55, %v482_v13  ;;  %v484_v16 = vpop.f32.mrb[31].mxu1  ;;  %v867_v17 = vpop.f32.mrb[30].mxu0 }
 0x154   :  { %v869_v18 = vpop.f32.mrb[31].mxu0 }
 0x155   :  { %1189 = vst [vmem:[%s2752_s3 + $0x70] sm:$0xff] %v1125_v14  ;;  %v868_v19 = vadd.f32 %v867_v17, %v483_v15 }
 0x156   :  { %v487_v20 = vpop.f32.mrb[32].mxu1 }
 0x157   :  { %v1126_v21 = vmax.f32 %v868_v19, 0.0  ;;  %v488_v22 = vadd.f32 %v2360_v55, %v487_v20  ;;  %v489_v23 = vpop.f32.mrb[33].mxu1  ;;  %v872_v24 = vpop.f32.mrb[32].mxu0 }
 0x158   :  { %v874_v25 = vpop.f32.mrb[33].mxu0 }
 0x159   :  { %1190 = vst [vmem:[%s2752_s3 + $0x78] sm:$0xff] %v1126_v21  ;;  %v873_v26 = vadd.f32 %v872_v24, %v488_v22 }
 0x15a   :  { %v492_v27 = vpop.f32.mrb[34].mxu1 }
 0x15b   :  { %v1127_v28 = vmax.f32 %v873_v26, 0.0  ;;  %v493_v29 = vadd.f32 %v2360_v55, %v492_v27  ;;  %v494_v30 = vpop.f32.mrb[35].mxu1  ;;  %v877_v31 = vpop.f32.mrb[34].mxu0 }
 0x15c   :  { %v879_v32 = vpop.f32.mrb[35].mxu0 }
 0x15d   :  { %1191 = vst [vmem:[%s2752_s3 + $0x80] sm:$0xff] %v1127_v28  ;;  %v878_v33 = vadd.f32 %v877_v31, %v493_v29 }
 0x15e   :  { %v497_v34 = vpop.f32.mrb[36].mxu1 }
 0x15f   :  { %v1128_v35 = vmax.f32 %v878_v33, 0.0  ;;  %v498_v36 = vadd.f32 %v2360_v55, %v497_v34  ;;  %v499_v37 = vpop.f32.mrb[37].mxu1  ;;  %v882_v38 = vpop.f32.mrb[36].mxu0 }
 0x160   :  { %v884_v39 = vpop.f32.mrb[37].mxu0 }
 0x161   :  { %1192 = vst [vmem:[%s2752_s3 + $0x88] sm:$0xff] %v1128_v35  ;;  %v883_v0 = vadd.f32 %v882_v38, %v498_v36 }
 0x162   :  { %v502_v40 = vpop.f32.mrb[38].mxu1 }
 0x163   :  { %v1129_v41 = vmax.f32 %v883_v0, 0.0  ;;  %v503_v42 = vadd.f32 %v2360_v55, %v502_v40  ;;  %v504_v43 = vpop.f32.mrb[39].mxu1  ;;  %v887_v44 = vpop.f32.mrb[38].mxu0 }
 0x164   :  { %v889_v45 = vpop.f32.mrb[39].mxu0 }
 0x165   :  { %1193 = vst [vmem:[%s2752_s3 + $0x90] sm:$0xff] %v1129_v41  ;;  %v888_v46 = vadd.f32 %v887_v44, %v503_v42 }
 0x166   :  { %v507_v47 = vpop.f32.mrb[40].mxu1 }
 0x167   :  { %v1130_v48 = vmax.f32 %v888_v46, 0.0  ;;  %v508_v49 = vadd.f32 %v2360_v55, %v507_v47  ;;  %v509_v50 = vpop.f32.mrb[41].mxu1  ;;  %v892_v51 = vpop.f32.mrb[40].mxu0 }
 0x168   :  { %v894_v52 = vpop.f32.mrb[41].mxu0 }
 0x169   :  { %1194 = vst [vmem:[%s2752_s3 + $0x98] sm:$0xff] %v1130_v48  ;;  %v893_v53 = vadd.f32 %v892_v51, %v508_v49 }
 0x16a   :  { %v512_v54 = vpop.f32.mrb[42].mxu1 }
 0x16b   :  { %v1131_v56 = vmax.f32 %v893_v53, 0.0  ;;  %v513_v57 = vadd.f32 %v2360_v55, %v512_v54  ;;  %v514_v58 = vpop.f32.mrb[43].mxu1  ;;  %v897_v59 = vpop.f32.mrb[42].mxu0 }
 0x16c   :  { %v899_v60 = vpop.f32.mrb[43].mxu0 }
 0x16d   :  { %1195 = vst [vmem:[%s2752_s3 + $0xa0] sm:$0xff] %v1131_v56  ;;  %v898_v61 = vadd.f32 %v897_v59, %v513_v57 }
 0x16e   :  { %v517_v62 = vpop.f32.mrb[44].mxu1 }
 0x16f   :  { %v1132_v63 = vmax.f32 %v898_v61, 0.0  ;;  %v518_v1 = vadd.f32 %v2360_v55, %v517_v62  ;;  %v519_v2 = vpop.f32.mrb[45].mxu1  ;;  %v902_v3 = vpop.f32.mrb[44].mxu0 }
 0x170   :  { %v904_v4 = vpop.f32.mrb[45].mxu0 }
 0x171   :  { %1196 = vst [vmem:[%s2752_s3 + $0xa8] sm:$0xff] %v1132_v63  ;;  %v903_v5 = vadd.f32 %v902_v3, %v518_v1 }
 0x172   :  { %v522_v6 = vpop.f32.mrb[46].mxu1 }
 0x173   :  { %v1133_v7 = vmax.f32 %v903_v5, 0.0  ;;  %v523_v8 = vadd.f32 %v2360_v55, %v522_v6  ;;  %v524_v9 = vpop.f32.mrb[47].mxu1  ;;  %v907_v10 = vpop.f32.mrb[46].mxu0 }
 0x174   :  { %v909_v11 = vpop.f32.mrb[47].mxu0 }
 0x175   :  { %1197 = vst [vmem:[%s2752_s3 + $0xb0] sm:$0xff] %v1133_v7  ;;  %v908_v12 = vadd.f32 %v907_v10, %v523_v8 }
 0x176   :  { %v527_v13 = vpop.f32.mrb[48].mxu1 }
 0x177   :  { %v1134_v14 = vmax.f32 %v908_v12, 0.0  ;;  %v528_v15 = vadd.f32 %v2360_v55, %v527_v13  ;;  %v529_v16 = vpop.f32.mrb[49].mxu1  ;;  %v912_v17 = vpop.f32.mrb[48].mxu0 }
 0x178   :  { %v914_v18 = vpop.f32.mrb[49].mxu0 }
 0x179   :  { %1198 = vst [vmem:[%s2752_s3 + $0xb8] sm:$0xff] %v1134_v14  ;;  %v913_v19 = vadd.f32 %v912_v17, %v528_v15 }
 0x17a   :  { %v532_v20 = vpop.f32.mrb[50].mxu1 }
 0x17b   :  { %v1135_v21 = vmax.f32 %v913_v19, 0.0  ;;  %v533_v22 = vadd.f32 %v2360_v55, %v532_v20  ;;  %v534_v23 = vpop.f32.mrb[51].mxu1  ;;  %v917_v24 = vpop.f32.mrb[50].mxu0 }
 0x17c   :  { %v919_v25 = vpop.f32.mrb[51].mxu0 }
 0x17d   :  { %1199 = vst [vmem:[%s2752_s3 + $0xc0] sm:$0xff] %v1135_v21  ;;  %v918_v26 = vadd.f32 %v917_v24, %v533_v22 }
 0x17e   :  { %v537_v27 = vpop.f32.mrb[52].mxu1 }
 0x17f   :  { %v1136_v28 = vmax.f32 %v918_v26, 0.0  ;;  %v538_v29 = vadd.f32 %v2360_v55, %v537_v27  ;;  %v539_v30 = vpop.f32.mrb[53].mxu1  ;;  %v922_v31 = vpop.f32.mrb[52].mxu0 }
 0x180   :  { %v924_v32 = vpop.f32.mrb[53].mxu0 }
 0x181   :  { %1200 = vst [vmem:[%s2752_s3 + $0xc8] sm:$0xff] %v1136_v28  ;;  %v923_v33 = vadd.f32 %v922_v31, %v538_v29 }
 0x182   :  { %v542_v34 = vpop.f32.mrb[54].mxu1 }
 0x183   :  { %v1137_v35 = vmax.f32 %v923_v33, 0.0  ;;  %v543_v36 = vadd.f32 %v2360_v55, %v542_v34  ;;  %v544_v37 = vpop.f32.mrb[55].mxu1  ;;  %v927_v38 = vpop.f32.mrb[54].mxu0 }
 0x184   :  { %v929_v39 = vpop.f32.mrb[55].mxu0 }
 0x185   :  { %1201 = vst [vmem:[%s2752_s3 + $0xd0] sm:$0xff] %v1137_v35  ;;  %v928_v0 = vadd.f32 %v927_v38, %v543_v36 }
 0x186   :  { %v547_v40 = vpop.f32.mrb[56].mxu1 }
 0x187   :  { %v1138_v41 = vmax.f32 %v928_v0, 0.0  ;;  %v548_v42 = vadd.f32 %v2360_v55, %v547_v40  ;;  %v549_v43 = vpop.f32.mrb[57].mxu1  ;;  %v932_v44 = vpop.f32.mrb[56].mxu0 }
 0x188   :  { %v934_v45 = vpop.f32.mrb[57].mxu0 }
 0x189   :  { %1202 = vst [vmem:[%s2752_s3 + $0xd8] sm:$0xff] %v1138_v41  ;;  %v933_v46 = vadd.f32 %v932_v44, %v548_v42 }
 0x18a   :  { %v552_v47 = vpop.f32.mrb[58].mxu1 }
 0x18b   :  { %v1139_v48 = vmax.f32 %v933_v46, 0.0  ;;  %v553_v49 = vadd.f32 %v2360_v55, %v552_v47  ;;  %v554_v50 = vpop.f32.mrb[59].mxu1  ;;  %v937_v51 = vpop.f32.mrb[58].mxu0 }
 0x18c   :  { %v939_v52 = vpop.f32.mrb[59].mxu0 }
 0x18d   :  { %1203 = vst [vmem:[%s2752_s3 + $0xe0] sm:$0xff] %v1139_v48  ;;  %v938_v53 = vadd.f32 %v937_v51, %v553_v49 }
 0x18e   :  { %v557_v54 = vpop.f32.mrb[60].mxu1 }
 0x18f   :  { %v1140_v56 = vmax.f32 %v938_v53, 0.0  ;;  %v558_v57 = vadd.f32 %v2360_v55, %v557_v54  ;;  %v559_v58 = vpop.f32.mrb[61].mxu1  ;;  %v942_v59 = vpop.f32.mrb[60].mxu0 }
 0x190   :  { %v944_v60 = vpop.f32.mrb[61].mxu0 }
 0x191   :  { %1204 = vst [vmem:[%s2752_s3 + $0xe8] sm:$0xff] %v1140_v56  ;;  %v943_v61 = vadd.f32 %v942_v59, %v558_v57 }
 0x192   :  { %v562_v62 = vpop.f32.mrb[62].mxu1 }
 0x193   :  { %v1141_v63 = vmax.f32 %v943_v61, 0.0  ;;  %v563_v1 = vadd.f32 %v2360_v55, %v562_v62  ;;  %v564_v2 = vpop.f32.mrb[63].mxu1  ;;  %v947_v3 = vpop.f32.mrb[62].mxu0 }
 0x194   :  { %v949_v4 = vpop.f32.mrb[63].mxu0 }
 0x195   :  { %1205 = vst [vmem:[%s2752_s3 + $0xf0] sm:$0xff] %v1141_v63  ;;  %v948_v5 = vadd.f32 %v947_v3, %v563_v1 }
 0x196   :  { %v567_v6 = vpop.f32.mrb[64].mxu1 }
 0x197   :  { %v1142_v7 = vmax.f32 %v948_v5, 0.0  ;;  %v568_v8 = vadd.f32 %v2360_v55, %v567_v6  ;;  %v569_v9 = vpop.f32.mrb[65].mxu1  ;;  %v952_v10 = vpop.f32.mrb[64].mxu0 }
 0x198   :  { %v954_v11 = vpop.f32.mrb[65].mxu0 }
 0x199   :  { %1206 = vst [vmem:[%s2752_s3 + $0xf8] sm:$0xff] %v1142_v7  ;;  %v953_v12 = vadd.f32 %v952_v10, %v568_v8 }
 0x19a   :  { %v572_v13 = vpop.f32.mrb[66].mxu1 }
 0x19b   :  { %v1143_v14 = vmax.f32 %v953_v12, 0.0  ;;  %v573_v15 = vadd.f32 %v2360_v55, %v572_v13  ;;  %v574_v16 = vpop.f32.mrb[67].mxu1  ;;  %v957_v17 = vpop.f32.mrb[66].mxu0 }
 0x19c   :  { %v959_v18 = vpop.f32.mrb[67].mxu0 }
 0x19d   :  { %1207 = vst [vmem:[%s2752_s3 + $0x100] sm:$0xff] %v1143_v14  ;;  %v958_v19 = vadd.f32 %v957_v17, %v573_v15 }
 0x19e   :  { %v577_v20 = vpop.f32.mrb[68].mxu1 }
 0x19f   :  { %v1144_v21 = vmax.f32 %v958_v19, 0.0  ;;  %v578_v22 = vadd.f32 %v2360_v55, %v577_v20  ;;  %v579_v23 = vpop.f32.mrb[69].mxu1  ;;  %v962_v24 = vpop.f32.mrb[68].mxu0 }
 0x1a0   :  { %v964_v25 = vpop.f32.mrb[69].mxu0 }
 0x1a1   :  { %1208 = vst [vmem:[%s2752_s3 + $0x108] sm:$0xff] %v1144_v21  ;;  %v963_v26 = vadd.f32 %v962_v24, %v578_v22 }
 0x1a2   :  { %v582_v27 = vpop.f32.mrb[70].mxu1 }
 0x1a3   :  { %v1145_v28 = vmax.f32 %v963_v26, 0.0  ;;  %v583_v29 = vadd.f32 %v2360_v55, %v582_v27  ;;  %v584_v30 = vpop.f32.mrb[71].mxu1  ;;  %v967_v31 = vpop.f32.mrb[70].mxu0 }
 0x1a4   :  { %v969_v32 = vpop.f32.mrb[71].mxu0 }
 0x1a5   :  { %1209 = vst [vmem:[%s2752_s3 + $0x110] sm:$0xff] %v1145_v28  ;;  %v968_v33 = vadd.f32 %v967_v31, %v583_v29 }
 0x1a6   :  { %v587_v34 = vpop.f32.mrb[72].mxu1 }
 0x1a7   :  { %v1146_v35 = vmax.f32 %v968_v33, 0.0  ;;  %v588_v36 = vadd.f32 %v2360_v55, %v587_v34  ;;  %v589_v37 = vpop.f32.mrb[73].mxu1  ;;  %v972_v38 = vpop.f32.mrb[72].mxu0 }
 0x1a8   :  { %v974_v39 = vpop.f32.mrb[73].mxu0 }
 0x1a9   :  { %1210 = vst [vmem:[%s2752_s3 + $0x118] sm:$0xff] %v1146_v35  ;;  %v973_v0 = vadd.f32 %v972_v38, %v588_v36 }
 0x1aa   :  { %v592_v40 = vpop.f32.mrb[74].mxu1 }
 0x1ab   :  { %v1147_v41 = vmax.f32 %v973_v0, 0.0  ;;  %v593_v42 = vadd.f32 %v2360_v55, %v592_v40  ;;  %v594_v43 = vpop.f32.mrb[75].mxu1  ;;  %v977_v44 = vpop.f32.mrb[74].mxu0 }
 0x1ac   :  { %v979_v45 = vpop.f32.mrb[75].mxu0 }
 0x1ad   :  { %1211 = vst [vmem:[%s2752_s3 + $0x120] sm:$0xff] %v1147_v41  ;;  %v978_v46 = vadd.f32 %v977_v44, %v593_v42 }
 0x1ae   :  { %v597_v47 = vpop.f32.mrb[76].mxu1 }
 0x1af   :  { %v1148_v48 = vmax.f32 %v978_v46, 0.0  ;;  %v598_v49 = vadd.f32 %v2360_v55, %v597_v47  ;;  %v599_v50 = vpop.f32.mrb[77].mxu1  ;;  %v982_v51 = vpop.f32.mrb[76].mxu0 }
 0x1b0   :  { %v984_v52 = vpop.f32.mrb[77].mxu0 }
 0x1b1   :  { %1212 = vst [vmem:[%s2752_s3 + $0x128] sm:$0xff] %v1148_v48  ;;  %v983_v53 = vadd.f32 %v982_v51, %v598_v49 }
 0x1b2   :  { %v602_v54 = vpop.f32.mrb[78].mxu1 }
 0x1b3   :  { %v1149_v56 = vmax.f32 %v983_v53, 0.0  ;;  %v603_v57 = vadd.f32 %v2360_v55, %v602_v54  ;;  %v604_v58 = vpop.f32.mrb[79].mxu1  ;;  %v987_v59 = vpop.f32.mrb[78].mxu0 }
 0x1b4   :  { %v989_v60 = vpop.f32.mrb[79].mxu0 }
 0x1b5   :  { %1213 = vst [vmem:[%s2752_s3 + $0x130] sm:$0xff] %v1149_v56  ;;  %v988_v61 = vadd.f32 %v987_v59, %v603_v57 }
 0x1b6   :  { %v607_v62 = vpop.f32.mrb[80].mxu1 }
 0x1b7   :  { %v1150_v63 = vmax.f32 %v988_v61, 0.0  ;;  %v608_v1 = vadd.f32 %v2360_v55, %v607_v62  ;;  %v609_v2 = vpop.f32.mrb[81].mxu1  ;;  %v992_v3 = vpop.f32.mrb[80].mxu0 }
 0x1b8   :  { %v994_v4 = vpop.f32.mrb[81].mxu0 }
 0x1b9   :  { %1214 = vst [vmem:[%s2752_s3 + $0x138] sm:$0xff] %v1150_v63  ;;  %v993_v5 = vadd.f32 %v992_v3, %v608_v1 }
 0x1ba   :  { %v612_v6 = vpop.f32.mrb[82].mxu1 }
 0x1bb   :  { %v1151_v7 = vmax.f32 %v993_v5, 0.0  ;;  %v613_v8 = vadd.f32 %v2360_v55, %v612_v6  ;;  %v614_v9 = vpop.f32.mrb[83].mxu1  ;;  %v997_v10 = vpop.f32.mrb[82].mxu0 }
 0x1bc   :  { %v999_v11 = vpop.f32.mrb[83].mxu0 }
 0x1bd   :  { %1215 = vst [vmem:[%s2752_s3 + $0x140] sm:$0xff] %v1151_v7  ;;  %v998_v12 = vadd.f32 %v997_v10, %v613_v8 }
 0x1be   :  { %v617_v13 = vpop.f32.mrb[84].mxu1 }
 0x1bf   :  { %v1152_v14 = vmax.f32 %v998_v12, 0.0  ;;  %v618_v15 = vadd.f32 %v2360_v55, %v617_v13  ;;  %v619_v16 = vpop.f32.mrb[85].mxu1  ;;  %v1002_v17 = vpop.f32.mrb[84].mxu0 }
 0x1c0   :  { %v1004_v18 = vpop.f32.mrb[85].mxu0 }
 0x1c1   :  { %1216 = vst [vmem:[%s2752_s3 + $0x148] sm:$0xff] %v1152_v14  ;;  %v1003_v19 = vadd.f32 %v1002_v17, %v618_v15 }
 0x1c2   :  { %v622_v20 = vpop.f32.mrb[86].mxu1 }
 0x1c3   :  { %v1153_v21 = vmax.f32 %v1003_v19, 0.0  ;;  %v623_v22 = vadd.f32 %v2360_v55, %v622_v20  ;;  %v624_v23 = vpop.f32.mrb[87].mxu1  ;;  %v1007_v24 = vpop.f32.mrb[86].mxu0 }
 0x1c4   :  { %v1009_v25 = vpop.f32.mrb[87].mxu0 }
 0x1c5   :  { %1217 = vst [vmem:[%s2752_s3 + $0x150] sm:$0xff] %v1153_v21  ;;  %v1008_v26 = vadd.f32 %v1007_v24, %v623_v22 }
 0x1c6   :  { %v627_v27 = vpop.f32.mrb[88].mxu1 }
 0x1c7   :  { %v1154_v28 = vmax.f32 %v1008_v26, 0.0  ;;  %v628_v29 = vadd.f32 %v2360_v55, %v627_v27  ;;  %v629_v30 = vpop.f32.mrb[89].mxu1  ;;  %v1012_v31 = vpop.f32.mrb[88].mxu0 }
 0x1c8   :  { %v1014_v32 = vpop.f32.mrb[89].mxu0 }
 0x1c9   :  { %1218 = vst [vmem:[%s2752_s3 + $0x158] sm:$0xff] %v1154_v28  ;;  %v1013_v33 = vadd.f32 %v1012_v31, %v628_v29  ;;  %v2700_v29 = vld [vmem:[%s2751_s2] ss:$0 sm:$0xff] }
 0x1ca   :  { %v632_v34 = vpop.f32.mrb[90].mxu1 }
 0x1cb   :  { %v1155_v35 = vmax.f32 %v1013_v33, 0.0  ;;  %v633_v36 = vadd.f32 %v2360_v55, %v632_v34  ;;  %v634_v37 = vpop.f32.mrb[91].mxu1  ;;  %v1017_v38 = vpop.f32.mrb[90].mxu0 }
 0x1cc   :  { %v1019_v39 = vpop.f32.mrb[91].mxu0 }
 0x1cd   :  { %1219 = vst [vmem:[%s2752_s3 + $0x160] sm:$0xff] %v1155_v35  ;;  %v1018_v0 = vadd.f32 %v1017_v38, %v633_v36 }
 0x1ce   :  { %v637_v40 = vpop.f32.mrb[92].mxu1 }
 0x1cf   :  { %v1156_v41 = vmax.f32 %v1018_v0, 0.0  ;;  %v638_v42 = vadd.f32 %v2360_v55, %v637_v40  ;;  %v639_v43 = vpop.f32.mrb[93].mxu1  ;;  %v1022_v44 = vpop.f32.mrb[92].mxu0 }
 0x1d0   :  { %v1024_v45 = vpop.f32.mrb[93].mxu0 }
 0x1d1   :  { %1220 = vst [vmem:[%s2752_s3 + $0x168] sm:$0xff] %v1156_v41  ;;  %v1023_v46 = vadd.f32 %v1022_v44, %v638_v42 }
 0x1d2   :  { %v642_v47 = vpop.f32.mrb[94].mxu1 }
 0x1d3   :  { %v1157_v48 = vmax.f32 %v1023_v46, 0.0  ;;  %v643_v49 = vadd.f32 %v2360_v55, %v642_v47  ;;  %v644_v50 = vpop.f32.mrb[95].mxu1  ;;  %v1027_v51 = vpop.f32.mrb[94].mxu0 }
 0x1d4   :  { %v1029_v52 = vpop.f32.mrb[95].mxu0 }
 0x1d5   :  { %1221 = vst [vmem:[%s2752_s3 + $0x170] sm:$0xff] %v1157_v48  ;;  %v1028_v53 = vadd.f32 %v1027_v51, %v643_v49 }
 0x1d6   :  { %v647_v54 = vpop.f32.mrb[96].mxu1 }
 0x1d7   :  { %v1158_v56 = vmax.f32 %v1028_v53, 0.0  ;;  %v648_v57 = vadd.f32 %v2360_v55, %v647_v54  ;;  %v649_v58 = vpop.f32.mrb[97].mxu1  ;;  %v1032_v59 = vpop.f32.mrb[96].mxu0 }
 0x1d8   :  { %v1034_v60 = vpop.f32.mrb[97].mxu0 }
 0x1d9   :  { %1222 = vst [vmem:[%s2752_s3 + $0x178] sm:$0xff] %v1158_v56  ;;  %v1033_v61 = vadd.f32 %v1032_v59, %v648_v57 }
 0x1da   :  { %v652_v62 = vpop.f32.mrb[98].mxu1 }
 0x1db   :  { %v1159_v63 = vmax.f32 %v1033_v61, 0.0  ;;  %v653_v1 = vadd.f32 %v2360_v55, %v652_v62  ;;  %v654_v2 = vpop.f32.mrb[99].mxu1  ;;  %v1037_v3 = vpop.f32.mrb[98].mxu0 }
 0x1dc   :  { %v1039_v4 = vpop.f32.mrb[99].mxu0 }
 0x1dd   :  { %1223 = vst [vmem:[%s2752_s3 + $0x180] sm:$0xff] %v1159_v63  ;;  %v1038_v5 = vadd.f32 %v1037_v3, %v653_v1 }
 0x1de   :  { %v657_v6 = vpop.f32.mrb[100].mxu1 }
 0x1df   :  { %v1160_v7 = vmax.f32 %v1038_v5, 0.0  ;;  %v658_v8 = vadd.f32 %v2360_v55, %v657_v6  ;;  %v659_v9 = vpop.f32.mrb[101].mxu1  ;;  %v1042_v10 = vpop.f32.mrb[100].mxu0 }
 0x1e0   :  { %v1044_v11 = vpop.f32.mrb[101].mxu0 }
 0x1e1   :  { %1224 = vst [vmem:[%s2752_s3 + $0x188] sm:$0xff] %v1160_v7  ;;  %v1043_v12 = vadd.f32 %v1042_v10, %v658_v8 }
 0x1e2   :  { %v662_v13 = vpop.f32.mrb[102].mxu1 }
 0x1e3   :  { %v1161_v14 = vmax.f32 %v1043_v12, 0.0  ;;  %v663_v15 = vadd.f32 %v2360_v55, %v662_v13  ;;  %v664_v16 = vpop.f32.mrb[103].mxu1  ;;  %v1047_v17 = vpop.f32.mrb[102].mxu0 }
 0x1e4   :  { %v1049_v18 = vpop.f32.mrb[103].mxu0 }
 0x1e5   :  { %1225 = vst [vmem:[%s2752_s3 + $0x190] sm:$0xff] %v1161_v14  ;;  %v1048_v19 = vadd.f32 %v1047_v17, %v663_v15 }
 0x1e6   :  { %v667_v20 = vpop.f32.mrb[104].mxu1 }
 0x1e7   :  { %v1162_v21 = vmax.f32 %v1048_v19, 0.0  ;;  %v668_v22 = vadd.f32 %v2360_v55, %v667_v20  ;;  %v669_v23 = vpop.f32.mrb[105].mxu1  ;;  %v1052_v24 = vpop.f32.mrb[104].mxu0 }
 0x1e8   :  { %v1054_v25 = vpop.f32.mrb[105].mxu0 }
 0x1e9   :  { %1226 = vst [vmem:[%s2752_s3 + $0x198] sm:$0xff] %v1162_v21  ;;  %v1053_v26 = vadd.f32 %v1052_v24, %v668_v22 }
 0x1ea   :  { %v672_v27 = vpop.f32.mrb[106].mxu1 }
 0x1eb   :  { %v1163_v28 = vmax.f32 %v1053_v26, 0.0  ;;  %v673_v30 = vadd.f32 %v2700_v29, %v672_v27  ;;  %v674_v31 = vpop.f32.mrb[107].mxu1  ;;  %v1057_v32 = vpop.f32.mrb[106].mxu0 }
 0x1ec   :  { %v1059_v55 = vpop.f32.mrb[107].mxu0 }
 0x1ed   :  { %1227 = vst [vmem:[%s2752_s3 + $0x1a0] sm:$0xff] %v1163_v28  ;;  %v1058_v33 = vadd.f32 %v1057_v32, %v673_v30 }
 0x1ee   :  { %v677_v34 = vpop.f32.mrb[108].mxu1 }
 0x1ef   :  { %v1164_v35 = vmax.f32 %v1058_v33, 0.0  ;;  %v678_v36 = vadd.f32 %v2700_v29, %v677_v34  ;;  %v679_v37 = vpop.f32.mrb[109].mxu1  ;;  %v1062_v38 = vpop.f32.mrb[108].mxu0 }
 0x1f0   :  { %v1064_v39 = vpop.f32.mrb[109].mxu0 }
 0x1f1   :  { %1228 = vst [vmem:[%s2752_s3 + $0x1a8] sm:$0xff] %v1164_v35  ;;  %v1063_v0 = vadd.f32 %v1062_v38, %v678_v36 }
 0x1f2   :  { %v682_v40 = vpop.f32.mrb[110].mxu1 }
 0x1f3   :  { %v1165_v41 = vmax.f32 %v1063_v0, 0.0  ;;  %v683_v42 = vadd.f32 %v2700_v29, %v682_v40  ;;  %v684_v43 = vpop.f32.mrb[111].mxu1  ;;  %v1067_v44 = vpop.f32.mrb[110].mxu0 }
 0x1f4   :  { %v1069_v45 = vpop.f32.mrb[111].mxu0 }
 0x1f5   :  { %1229 = vst [vmem:[%s2752_s3 + $0x1b0] sm:$0xff] %v1165_v41  ;;  %v1068_v46 = vadd.f32 %v1067_v44, %v683_v42 }
 0x1f6   :  { %v687_v47 = vpop.f32.mrb[112].mxu1 }
 0x1f7   :  { %v1166_v48 = vmax.f32 %v1068_v46, 0.0  ;;  %v688_v49 = vadd.f32 %v2700_v29, %v687_v47  ;;  %v689_v50 = vpop.f32.mrb[113].mxu1  ;;  %v1072_v51 = vpop.f32.mrb[112].mxu0 }
 0x1f8   :  { %v1074_v52 = vpop.f32.mrb[113].mxu0 }
 0x1f9   :  { %1230 = vst [vmem:[%s2752_s3 + $0x1b8] sm:$0xff] %v1166_v48  ;;  %v1073_v53 = vadd.f32 %v1072_v51, %v688_v49 }
 0x1fa   :  { %v692_v54 = vpop.f32.mrb[114].mxu1 }
 0x1fb   :  { %v1167_v56 = vmax.f32 %v1073_v53, 0.0  ;;  %v693_v57 = vadd.f32 %v2700_v29, %v692_v54  ;;  %v694_v58 = vpop.f32.mrb[115].mxu1  ;;  %v1077_v59 = vpop.f32.mrb[114].mxu0 }
 0x1fc   :  { %v1079_v60 = vpop.f32.mrb[115].mxu0 }
 0x1fd   :  { %1231 = vst [vmem:[%s2752_s3 + $0x1c0] sm:$0xff] %v1167_v56  ;;  %v1078_v61 = vadd.f32 %v1077_v59, %v693_v57 }
 0x1fe   :  { %v697_v62 = vpop.f32.mrb[116].mxu1 }
 0x1ff   :  { %v1168_v63 = vmax.f32 %v1078_v61, 0.0  ;;  %v698_v1 = vadd.f32 %v2700_v29, %v697_v62  ;;  %v699_v2 = vpop.f32.mrb[117].mxu1  ;;  %v1082_v3 = vpop.f32.mrb[116].mxu0 }
 0x200   :  { %v1084_v4 = vpop.f32.mrb[117].mxu0 }
 0x201   :  { %1232 = vst [vmem:[%s2752_s3 + $0x1c8] sm:$0xff] %v1168_v63  ;;  %v1083_v5 = vadd.f32 %v1082_v3, %v698_v1 }
 0x202   :  { %v702_v6 = vpop.f32.mrb[118].mxu1 }
 0x203   :  { %v1169_v7 = vmax.f32 %v1083_v5, 0.0  ;;  %v703_v8 = vadd.f32 %v2700_v29, %v702_v6  ;;  %v704_v9 = vpop.f32.mrb[119].mxu1  ;;  %v1087_v10 = vpop.f32.mrb[118].mxu0 }
 0x204   :  { %v1089_v11 = vpop.f32.mrb[119].mxu0 }
 0x205   :  { %1233 = vst [vmem:[%s2752_s3 + $0x1d0] sm:$0xff] %v1169_v7  ;;  %v1088_v12 = vadd.f32 %v1087_v10, %v703_v8 }
 0x206   :  { %v707_v13 = vpop.f32.mrb[120].mxu1 }
 0x207   :  { %v1170_v14 = vmax.f32 %v1088_v12, 0.0  ;;  %v708_v15 = vadd.f32 %v2700_v29, %v707_v13  ;;  %v709_v16 = vpop.f32.mrb[121].mxu1  ;;  %v1092_v17 = vpop.f32.mrb[120].mxu0 }
 0x208   :  { %v1094_v18 = vpop.f32.mrb[121].mxu0 }
 0x209   :  { %1234 = vst [vmem:[%s2752_s3 + $0x1d8] sm:$0xff] %v1170_v14  ;;  %v1093_v19 = vadd.f32 %v1092_v17, %v708_v15 }
 0x20a   :  { %v712_v20 = vpop.f32.mrb[122].mxu1 }
 0x20b   :  { %v1171_v21 = vmax.f32 %v1093_v19, 0.0  ;;  %v713_v22 = vadd.f32 %v2700_v29, %v712_v20  ;;  %v714_v23 = vpop.f32.mrb[123].mxu1  ;;  %v1097_v24 = vpop.f32.mrb[122].mxu0 }
 0x20c   :  { %v1099_v25 = vpop.f32.mrb[123].mxu0 }
 0x20d   :  { %1235 = vst [vmem:[%s2752_s3 + $0x1e0] sm:$0xff] %v1171_v21  ;;  %v1098_v26 = vadd.f32 %v1097_v24, %v713_v22 }
 0x20e   :  { %v717_v27 = vpop.f32.mrb[124].mxu1 }
 0x20f   :  { %v1172_v28 = vmax.f32 %v1098_v26, 0.0  ;;  %v718_v30 = vadd.f32 %v2700_v29, %v717_v27  ;;  %v719_v31 = vpop.f32.mrb[125].mxu1  ;;  %v1102_v32 = vpop.f32.mrb[124].mxu0 }
 0x210   :  { %v1104_v55 = vpop.f32.mrb[125].mxu0 }
 0x211   :  { %1236 = vst [vmem:[%s2752_s3 + $0x1e8] sm:$0xff] %v1172_v28  ;;  %v1103_v33 = vadd.f32 %v1102_v32, %v718_v30 }
 0x212   :  { %v722_v34 = vpop.f32.mrb[126].mxu1 }
 0x213   :  { %v1173_v35 = vmax.f32 %v1103_v33, 0.0  ;;  %v723_v36 = vadd.f32 %v2700_v29, %v722_v34  ;;  %v724_v37 = vpop.f32.mrb[127].mxu1  ;;  %v1107_v38 = vpop.f32.mrb[126].mxu0 }
 0x214   :  { %v1109_v39 = vpop.f32.mrb[127].mxu0 }
 0x215   :  { %1237 = vst [vmem:[%s2752_s3 + $0x1f0] sm:$0xff] %v1173_v35  ;;  %v1108_v0 = vadd.f32 %v1107_v38, %v723_v36 }
 0x217   :  { %v1174_v40 = vmax.f32 %v1108_v0, 0.0 }
 0x219   :  { %1238 = vst [vmem:[%s2752_s3 + $0x1f8] sm:$0xff] %v1174_v40 }

// kernel: celeba_encoder_forward.7
= control target key start
LH: loop header
LB: loop body
LE: loop exit
PB: predicated region body
PF: predicated region fallthrough
CT: control target
= control target key end

     0   :  { %s1173_s1 = inlined_call_operand.vmem [shape: f32[512,128], index: 1, kind: input, shape index: {}]   ;;  %s1174_s0 = inlined_call_operand.vmem [shape: f32[128,512], index: 0, kind: input, shape index: {}]   ;;  %s1175_s2 = inlined_call_operand.vmem [shape: f32[1,128], index: 2, kind: input, shape index: {}]   ;;  %s1176_s3 = inlined_call_operand.vmem [shape: f32[128,128], index: 3, kind: output, shape index: {}]  }
   0x1   :  { %v94_v0 = vld [vmem:[%s1173_s1 + $0x80] sm:$0xff]  ;;  %v95_v1 = vld [vmem:[%s1173_s1 + $0x88] sm:$0xff]  ;;  %v96_v11 = vld [vmem:[%s1173_s1 + $0x90] sm:$0xff] }
   0x2   :  { %v78_v2 = vld [vmem:[%s1173_s1] sm:$0xff]  ;;  %v636_v3 = vpack.c.bf16 %v95_v1, %v94_v0  ;;  %v79_v4 = vld [vmem:[%s1173_s1 + $0x8] sm:$0xff]  ;;  %v97_v13 = vld [vmem:[%s1173_s1 + $0x98] sm:$0xff] }
   0x3   :  { %v126_v5 = vld [vmem:[%s1173_s1 + $0x180] sm:$0xff]  ;;  %v127_v6 = vld [vmem:[%s1173_s1 + $0x188] sm:$0xff]  ;;  %v638_v7 = vpack.c.bf16 %v79_v4, %v78_v2  ;;  %v80_v14 = vld [vmem:[%s1173_s1 + $0x10] sm:$0xff]  ;;  %v640_v16 = vpack.c.bf16 %v97_v13, %v96_v11 }
   0x4   :  { %v668_v8 = vpack.c.bf16 %v127_v6, %v126_v5  ;;  %v110_v9 = vld [vmem:[%s1173_s1 + $0x100] sm:$0xff]  ;;  %v111_v10 = vld [vmem:[%s1173_s1 + $0x108] sm:$0xff]  ;;  %637 = vmatprep.subr.bf16.mxu0 %v636_v3  ;;  %v81_v15 = vld [vmem:[%s1173_s1 + $0x18] sm:$0xff] }
   0x5   :  { %v670_v12 = vpack.c.bf16 %v111_v10, %v110_v9  ;;  %639 = vmatpush3.bf16.msra.mxu0 %v638_v7  ;;  %v642_v17 = vpack.c.bf16 %v81_v15, %v80_v14  ;;  %v128_v18 = vld [vmem:[%s1173_s1 + $0x190] sm:$0xff]  ;;  %v129_v19 = vld [vmem:[%s1173_s1 + $0x198] sm:$0xff]  ;;  %v98_v23 = vld [vmem:[%s1173_s1 + $0xa0] sm:$0xff] }
   0x6   :  { %669 = vmatprep.subr.bf16.mxu1 %v668_v8  ;;  %v112_v20 = vld [vmem:[%s1173_s1 + $0x110] sm:$0xff]  ;;  %v672_v21 = vpack.c.bf16 %v129_v19, %v128_v18  ;;  %v113_v22 = vld [vmem:[%s1173_s1 + $0x118] sm:$0xff]  ;;  %v99_v24 = vld [vmem:[%s1173_s1 + $0xa8] sm:$0xff]  ;;  %641 = vmatprep.subr.bf16.mxu0 %v640_v16 }
   0x7   :  { %671 = vmatpush3.bf16.msra.mxu1 %v670_v12  ;;  %v674_v25 = vpack.c.bf16 %v113_v22, %v112_v20  ;;  %v644_v26 = vpack.c.bf16 %v99_v24, %v98_v23  ;;  %v82_v27 = vld [vmem:[%s1173_s1 + $0x20] sm:$0xff]  ;;  %v83_v28 = vld [vmem:[%s1173_s1 + $0x28] sm:$0xff]  ;;  %v100_v35 = vld [vmem:[%s1173_s1 + $0xb0] sm:$0xff] }
   0x8   :  { %v130_v29 = vld [vmem:[%s1173_s1 + $0x1a0] sm:$0xff]  ;;  %673 = vmatprep.subr.bf16.mxu1 %v672_v21  ;;  %v131_v30 = vld [vmem:[%s1173_s1 + $0x1a8] sm:$0xff]  ;;  %v646_v33 = vpack.c.bf16 %v83_v28, %v82_v27  ;;  %v101_v36 = vld [vmem:[%s1173_s1 + $0xb8] sm:$0xff] }
   0x9   :  { %v114_v31 = vld [vmem:[%s1173_s1 + $0x120] sm:$0xff]  ;;  %v115_v32 = vld [vmem:[%s1173_s1 + $0x128] sm:$0xff]  ;;  %643 = vmatpush3.bf16.msra.mxu0 %v642_v17  ;;  %v676_v34 = vpack.c.bf16 %v131_v30, %v130_v29  ;;  %v84_v37 = vld [vmem:[%s1173_s1 + $0x30] sm:$0xff]  ;;  %v648_v39 = vpack.c.bf16 %v101_v36, %v100_v35 }
   0xa   :  { %645 = vmatprep.subr.bf16.mxu0 %v644_v26  ;;  %v678_v38 = vpack.c.bf16 %v115_v32, %v114_v31  ;;  %v85_v40 = vld [vmem:[%s1173_s1 + $0x38] sm:$0xff]  ;;  %v132_v41 = vld [vmem:[%s1173_s1 + $0x1b0] sm:$0xff]  ;;  %v102_v46 = vld [vmem:[%s1173_s1 + $0xc0] sm:$0xff] }
   0xb   :  { %675 = vmatpush3.bf16.msra.mxu1 %v674_v25  ;;  %v133_v42 = vld [vmem:[%s1173_s1 + $0x1b8] sm:$0xff]  ;;  %v116_v44 = vld [vmem:[%s1173_s1 + $0x130] sm:$0xff]  ;;  %v103_v47 = vld [vmem:[%s1173_s1 + $0xc8] sm:$0xff]  ;;  %v650_v48 = vpack.c.bf16 %v85_v40, %v84_v37 }
   0xc   :  { %677 = vmatprep.subr.bf16.mxu1 %v676_v34  ;;  %v680_v43 = vpack.c.bf16 %v133_v42, %v132_v41  ;;  %v117_v45 = vld [vmem:[%s1173_s1 + $0x138] sm:$0xff]  ;;  %v134_v49 = vld [vmem:[%s1173_s1 + $0x1c0] sm:$0xff]  ;;  %v135_v50 = vld [vmem:[%s1173_s1 + $0x1c8] sm:$0xff]  ;;  %v652_v52 = vpack.c.bf16 %v103_v47, %v102_v46 }
   0xd   :  { %647 = vmatpush3.bf16.msra.mxu0 %v646_v33  ;;  %v682_v51 = vpack.c.bf16 %v117_v45, %v116_v44  ;;  %v86_v53 = vld [vmem:[%s1173_s1 + $0x40] sm:$0xff]  ;;  %v87_v54 = vld [vmem:[%s1173_s1 + $0x48] sm:$0xff]  ;;  %v684_v56 = vpack.c.bf16 %v135_v50, %v134_v49  ;;  %v104_v58 = vld [vmem:[%s1173_s1 + $0xd0] sm:$0xff] }
   0xe   :  { %649 = vmatprep.subr.bf16.mxu0 %v648_v39  ;;  %v118_v55 = vld [vmem:[%s1173_s1 + $0x140] sm:$0xff]  ;;  %v119_v57 = vld [vmem:[%s1173_s1 + $0x148] sm:$0xff]  ;;  %v105_v59 = vld [vmem:[%s1173_s1 + $0xd8] sm:$0xff]  ;;  %v654_v62 = vpack.c.bf16 %v87_v54, %v86_v53 }
   0xf   :  { %679 = vmatpush3.bf16.msra.mxu1 %v678_v38  ;;  %v136_v60 = vld [vmem:[%s1173_s1 + $0x1d0] sm:$0xff]  ;;  %v137_v61 = vld [vmem:[%s1173_s1 + $0x1d8] sm:$0xff]  ;;  %v686_v63 = vpack.c.bf16 %v119_v57, %v118_v55  ;;  %v656_v0 = vpack.c.bf16 %v105_v59, %v104_v58  ;;  %v106_v6 = vld [vmem:[%s1173_s1 + $0xe0] sm:$0xff] }
  0x10   :  { %681 = vmatprep.subr.bf16.mxu1 %v680_v43  ;;  %v88_v1 = vld [vmem:[%s1173_s1 + $0x50] sm:$0xff]  ;;  %v89_v2 = vld [vmem:[%s1173_s1 + $0x58] sm:$0xff]  ;;  %v688_v4 = vpack.c.bf16 %v137_v61, %v136_v60  ;;  %v107_v7 = vld [vmem:[%s1173_s1 + $0xe8] sm:$0xff] }
  0x11   :  { %651 = vmatpush3.bf16.msra.mxu0 %v650_v48  ;;  %v120_v3 = vld [vmem:[%s1173_s1 + $0x150] sm:$0xff]  ;;  %v121_v5 = vld [vmem:[%s1173_s1 + $0x158] sm:$0xff]  ;;  %v138_v8 = vld [vmem:[%s1173_s1 + $0x1e0] sm:$0xff]  ;;  %v658_v10 = vpack.c.bf16 %v89_v2, %v88_v1  ;;  %v660_v14 = vpack.c.bf16 %v107_v7, %v106_v6 }
  0x12   :  { %653 = vmatprep.subr.bf16.mxu0 %v652_v52  ;;  %v139_v9 = vld [vmem:[%s1173_s1 + $0x1e8] sm:$0xff]  ;;  %v90_v11 = vld [vmem:[%s1173_s1 + $0x60] sm:$0xff]  ;;  %v690_v13 = vpack.c.bf16 %v121_v5, %v120_v3  ;;  %v108_v19 = vld [vmem:[%s1173_s1 + $0xf0] sm:$0xff] }
  0x13   :  { %683 = vmatpush3.bf16.msra.mxu1 %v682_v51  ;;  %v91_v12 = vld [vmem:[%s1173_s1 + $0x68] sm:$0xff]  ;;  %v122_v15 = vld [vmem:[%s1173_s1 + $0x160] sm:$0xff]  ;;  %v692_v18 = vpack.c.bf16 %v139_v9, %v138_v8  ;;  %v109_v20 = vld [vmem:[%s1173_s1 + $0xf8] sm:$0xff] }
  0x14   :  { %685 = vmatprep.subr.bf16.mxu1 %v684_v56  ;;  %v123_v16 = vld [vmem:[%s1173_s1 + $0x168] sm:$0xff]  ;;  %v17_v21 = vld [vmem:[%s1174_s0 + $0x18] sm:$0xff]  ;;  %v140_v22 = vld [vmem:[%s1173_s1 + $0x1f0] sm:$0xff]  ;;  %v662_v24 = vpack.c.bf16 %v91_v12, %v90_v11  ;;  %v664_v26 = vpack.c.bf16 %v109_v20, %v108_v19 }
  0x15   :  { %655 = vmatpush3.bf16.msra.mxu0 %v654_v62  ;;  %v15_v17 = vld [vmem:[%s1174_s0 + $0x8] sm:$0xff]  ;;  %v141_v23 = vld [vmem:[%s1173_s1 + $0x1f8] sm:$0xff]  ;;  %358 = vmatprep.mubr.f32.mxu1 %v17_v21  ;;  %v694_v25 = vpack.c.bf16 %v123_v16, %v122_v15  ;;  %v92_v27 = vld [vmem:[%s1173_s1 + $0x70] sm:$0xff] }
  0x16   :  { %657 = vmatprep.subr.bf16.mxu0 %v656_v0  ;;  %213 = vmatprep.mubr.f32.mxu0 %v15_v17  ;;  %v93_v28 = vld [vmem:[%s1173_s1 + $0x78] sm:$0xff]  ;;  %v696_v29 = vpack.c.bf16 %v141_v23, %v140_v22  ;;  %v124_v30 = vld [vmem:[%s1173_s1 + $0x170] sm:$0xff]  ;;  %v14_v34 = vld [vmem:[%s1174_s0] sm:$0xff] }
  0x17   :  { %687 = vmatpush3.bf16.msra.mxu1 %v686_v63  ;;  %v125_v31 = vld [vmem:[%s1173_s1 + $0x178] sm:$0xff]  ;;  %v666_v32 = vpack.c.bf16 %v93_v28, %v92_v27  ;;  %v16_v35 = vld [vmem:[%s1174_s0 + $0x10] sm:$0xff]  ;;  %v19_v36 = vld [vmem:[%s1174_s0 + $0x28] sm:$0xff] }
  0x18   :  { %689 = vmatprep.subr.bf16.mxu1 %v688_v4  ;;  %v698_v33 = vpack.c.bf16 %v125_v31, %v124_v30  ;;  %v21_v37 = vld [vmem:[%s1174_s0 + $0x38] sm:$0xff]  ;;  %v18_v38 = vld [vmem:[%s1174_s0 + $0x20] sm:$0xff]  ;;  %v20_v39 = vld [vmem:[%s1174_s0 + $0x30] sm:$0xff] }
  0x19   :  { %659 = vmatpush3.bf16.msra.mxu0 %v658_v10  ;;  %v23_v40 = vld [vmem:[%s1174_s0 + $0x48] sm:$0xff]  ;;  %v25_v41 = vld [vmem:[%s1174_s0 + $0x58] sm:$0xff]  ;;  %v22_v42 = vld [vmem:[%s1174_s0 + $0x40] sm:$0xff] }
  0x1a   :  { %661 = vmatprep.subr.bf16.mxu0 %v660_v14  ;;  %v24_v43 = vld [vmem:[%s1174_s0 + $0x50] sm:$0xff]  ;;  %v27_v44 = vld [vmem:[%s1174_s0 + $0x68] sm:$0xff]  ;;  %v29_v45 = vld [vmem:[%s1174_s0 + $0x78] sm:$0xff] }
  0x1b   :  { %691 = vmatpush3.bf16.msra.mxu1 %v690_v13  ;;  %v26_v46 = vld [vmem:[%s1174_s0 + $0x60] sm:$0xff]  ;;  %v28_v47 = vld [vmem:[%s1174_s0 + $0x70] sm:$0xff]  ;;  %v31_v48 = vld [vmem:[%s1174_s0 + $0x88] sm:$0xff] }
  0x1c   :  { %693 = vmatprep.subr.bf16.mxu1 %v692_v18  ;;  %v33_v49 = vld [vmem:[%s1174_s0 + $0x98] sm:$0xff]  ;;  %v30_v50 = vld [vmem:[%s1174_s0 + $0x80] sm:$0xff]  ;;  %v32_v51 = vld [vmem:[%s1174_s0 + $0x90] sm:$0xff] }
  0x1d   :  { %663 = vmatpush3.bf16.msra.mxu0 %v662_v24  ;;  %v35_v52 = vld [vmem:[%s1174_s0 + $0xa8] sm:$0xff]  ;;  %v37_v53 = vld [vmem:[%s1174_s0 + $0xb8] sm:$0xff]  ;;  %v34_v54 = vld [vmem:[%s1174_s0 + $0xa0] sm:$0xff] }
  0x1e   :  { %665 = vmatprep.subr.bf16.mxu0 %v664_v26  ;;  %v36_v55 = vld [vmem:[%s1174_s0 + $0xb0] sm:$0xff]  ;;  %v39_v56 = vld [vmem:[%s1174_s0 + $0xc8] sm:$0xff]  ;;  %v41_v57 = vld [vmem:[%s1174_s0 + $0xd8] sm:$0xff] }
  0x1f   :  { %695 = vmatpush3.bf16.msra.mxu1 %v694_v25  ;;  %v38_v58 = vld [vmem:[%s1174_s0 + $0xc0] sm:$0xff]  ;;  %v40_v59 = vld [vmem:[%s1174_s0 + $0xd0] sm:$0xff]  ;;  %v43_v60 = vld [vmem:[%s1174_s0 + $0xe8] sm:$0xff] }
  0x20   :  { %697 = vmatprep.subr.bf16.mxu1 %v696_v29  ;;  %v45_v61 = vld [vmem:[%s1174_s0 + $0xf8] sm:$0xff]  ;;  %v42_v62 = vld [vmem:[%s1174_s0 + $0xe0] sm:$0xff]  ;;  %v44_v63 = vld [vmem:[%s1174_s0 + $0xf0] sm:$0xff] }
  0x21   :  { %667 = vmatpush3.bf16.msra.mxu0 %v666_v32  ;;  %v47_v0 = vld [vmem:[%s1174_s0 + $0x108] sm:$0xff]  ;;  %v49_v1 = vld [vmem:[%s1174_s0 + $0x118] sm:$0xff]  ;;  %v46_v2 = vld [vmem:[%s1174_s0 + $0x100] sm:$0xff] }
  0x22   :  { %v48_v3 = vld [vmem:[%s1174_s0 + $0x110] sm:$0xff]  ;;  %v51_v4 = vld [vmem:[%s1174_s0 + $0x128] sm:$0xff]  ;;  %v53_v5 = vld [vmem:[%s1174_s0 + $0x138] sm:$0xff] }
  0x23   :  { %699 = vmatpush3.bf16.msra.mxu1 %v698_v33  ;;  %v50_v6 = vld [vmem:[%s1174_s0 + $0x120] sm:$0xff]  ;;  %v52_v7 = vld [vmem:[%s1174_s0 + $0x130] sm:$0xff]  ;;  %v55_v8 = vld [vmem:[%s1174_s0 + $0x148] sm:$0xff] }
  0x24   :  { %214 = vmatmul.mubr.f32.vlgmr.msra.gmra.mrb[0].mxu0 %v14_v34  ;;  %v57_v9 = vld [vmem:[%s1174_s0 + $0x158] sm:$0xff]  ;;  %v54_v10 = vld [vmem:[%s1174_s0 + $0x140] sm:$0xff]  ;;  %v56_v11 = vld [vmem:[%s1174_s0 + $0x150] sm:$0xff] }
  0x25   :  { %218 = vmatprep.mubr.f32.mxu0 %v19_v36  ;;  %v59_v12 = vld [vmem:[%s1174_s0 + $0x168] sm:$0xff]  ;;  %v61_v13 = vld [vmem:[%s1174_s0 + $0x178] sm:$0xff]  ;;  %v58_v14 = vld [vmem:[%s1174_s0 + $0x160] sm:$0xff] }
  0x26   :  { %359 = vmatmul.mubr.f32.vlgmr.msra.gmra.mrb[0].mxu1 %v16_v35  ;;  %v60_v15 = vld [vmem:[%s1174_s0 + $0x170] sm:$0xff]  ;;  %v63_v16 = vld [vmem:[%s1174_s0 + $0x188] sm:$0xff]  ;;  %v65_v17 = vld [vmem:[%s1174_s0 + $0x198] sm:$0xff] }
  0x27   :  { %363 = vmatprep.mubr.f32.mxu1 %v21_v37  ;;  %v62_v18 = vld [vmem:[%s1174_s0 + $0x180] sm:$0xff]  ;;  %v64_v19 = vld [vmem:[%s1174_s0 + $0x190] sm:$0xff]  ;;  %v67_v20 = vld [vmem:[%s1174_s0 + $0x1a8] sm:$0xff] }
  0x28   :  { %219 = vmatmul.mubr.f32.gmra.mrb[2].mxu0 %v18_v38  ;;  %v69_v21 = vld [vmem:[%s1174_s0 + $0x1b8] sm:$0xff]  ;;  %v66_v22 = vld [vmem:[%s1174_s0 + $0x1a0] sm:$0xff]  ;;  %v68_v23 = vld [vmem:[%s1174_s0 + $0x1b0] sm:$0xff] }
  0x29   :  { %223 = vmatprep.mubr.f32.mxu0 %v23_v40  ;;  %v71_v24 = vld [vmem:[%s1174_s0 + $0x1c8] sm:$0xff]  ;;  %v73_v25 = vld [vmem:[%s1174_s0 + $0x1d8] sm:$0xff]  ;;  %v70_v26 = vld [vmem:[%s1174_s0 + $0x1c0] sm:$0xff] }
  0x2a   :  { %364 = vmatmul.mubr.f32.gmra.mrb[2].mxu1 %v20_v39  ;;  %v72_v27 = vld [vmem:[%s1174_s0 + $0x1d0] sm:$0xff]  ;;  %v75_v28 = vld [vmem:[%s1174_s0 + $0x1e8] sm:$0xff]  ;;  %v77_v29 = vld [vmem:[%s1174_s0 + $0x1f8] sm:$0xff] }
  0x2b   :  { %368 = vmatprep.mubr.f32.mxu1 %v25_v41  ;;  %v74_v30 = vld [vmem:[%s1174_s0 + $0x1e0] sm:$0xff]  ;;  %v76_v31 = vld [vmem:[%s1174_s0 + $0x1f0] sm:$0xff] }
  0x2c   :  { %224 = vmatmul.mubr.f32.gmra.mrb[4].mxu0 %v22_v42  ;;  %v1107_v33 = vld [vmem:[%s1175_s2] ss:$0 sm:$0xff] }
  0x2d   :  { %228 = vmatprep.mubr.f32.mxu0 %v27_v44 }
  0x2e   :  { %369 = vmatmul.mubr.f32.gmra.mrb[4].mxu1 %v24_v43 }
  0x2f   :  { %373 = vmatprep.mubr.f32.mxu1 %v29_v45 }
  0x30   :  { %229 = vmatmul.mubr.f32.gmra.mrb[6].mxu0 %v26_v46 }
  0x31   :  { %233 = vmatprep.mubr.f32.mxu0 %v31_v48 }
  0x32   :  { %374 = vmatmul.mubr.f32.gmra.mrb[6].mxu1 %v28_v47 }
  0x33   :  { %378 = vmatprep.mubr.f32.mxu1 %v33_v49 }
  0x34   :  { %234 = vmatmul.mubr.f32.gmra.mrb[8].mxu0 %v30_v50 }
  0x35   :  { %238 = vmatprep.mubr.f32.mxu0 %v35_v52 }
  0x36   :  { %379 = vmatmul.mubr.f32.gmra.mrb[8].mxu1 %v32_v51 }
  0x37   :  { %383 = vmatprep.mubr.f32.mxu1 %v37_v53 }
  0x38   :  { %239 = vmatmul.mubr.f32.gmra.mrb[10].mxu0 %v34_v54 }
  0x39   :  { %243 = vmatprep.mubr.f32.mxu0 %v39_v56 }
  0x3a   :  { %384 = vmatmul.mubr.f32.gmra.mrb[10].mxu1 %v36_v55 }
  0x3b   :  { %388 = vmatprep.mubr.f32.mxu1 %v41_v57 }
  0x3c   :  { %244 = vmatmul.mubr.f32.gmra.mrb[12].mxu0 %v38_v58 }
  0x3d   :  { %248 = vmatprep.mubr.f32.mxu0 %v43_v60 }
  0x3e   :  { %389 = vmatmul.mubr.f32.gmra.mrb[12].mxu1 %v40_v59 }
  0x3f   :  { %393 = vmatprep.mubr.f32.mxu1 %v45_v61 }
  0x40   :  { %249 = vmatmul.mubr.f32.gmra.mrb[14].mxu0 %v42_v62 }
  0x41   :  { %253 = vmatprep.mubr.f32.mxu0 %v47_v0 }
  0x42   :  { %394 = vmatmul.mubr.f32.gmra.mrb[14].mxu1 %v44_v63 }
  0x43   :  { %398 = vmatprep.mubr.f32.mxu1 %v49_v1 }
  0x44   :  { %254 = vmatmul.mubr.f32.gmra.mrb[16].mxu0 %v46_v2 }
  0x45   :  { %258 = vmatprep.mubr.f32.mxu0 %v51_v4 }
  0x46   :  { %399 = vmatmul.mubr.f32.gmra.mrb[16].mxu1 %v48_v3 }
  0x47   :  { %403 = vmatprep.mubr.f32.mxu1 %v53_v5 }
  0x48   :  { %259 = vmatmul.mubr.f32.gmra.mrb[18].mxu0 %v50_v6 }
  0x49   :  { %263 = vmatprep.mubr.f32.mxu0 %v55_v8 }
  0x4a   :  { %404 = vmatmul.mubr.f32.gmra.mrb[18].mxu1 %v52_v7 }
  0x4b   :  { %408 = vmatprep.mubr.f32.mxu1 %v57_v9 }
  0x4c   :  { %264 = vmatmul.mubr.f32.gmra.mrb[20].mxu0 %v54_v10 }
  0x4d   :  { %268 = vmatprep.mubr.f32.mxu0 %v59_v12 }
  0x4e   :  { %409 = vmatmul.mubr.f32.gmra.mrb[20].mxu1 %v56_v11 }
  0x4f   :  { %413 = vmatprep.mubr.f32.mxu1 %v61_v13 }
  0x50   :  { %269 = vmatmul.mubr.f32.gmra.mrb[22].mxu0 %v58_v14 }
  0x51   :  { %273 = vmatprep.mubr.f32.mxu0 %v63_v16 }
  0x52   :  { %414 = vmatmul.mubr.f32.gmra.mrb[22].mxu1 %v60_v15 }
  0x53   :  { %418 = vmatprep.mubr.f32.mxu1 %v65_v17 }
  0x54   :  { %274 = vmatmul.mubr.f32.gmra.mrb[24].mxu0 %v62_v18 }
  0x55   :  { %278 = vmatprep.mubr.f32.mxu0 %v67_v20 }
  0x56   :  { %419 = vmatmul.mubr.f32.gmra.mrb[24].mxu1 %v64_v19 }
  0x57   :  { %423 = vmatprep.mubr.f32.mxu1 %v69_v21 }
  0x58   :  { %279 = vmatmul.mubr.f32.gmra.mrb[26].mxu0 %v66_v22 }
  0x59   :  { %283 = vmatprep.mubr.f32.mxu0 %v71_v24 }
  0x5a   :  { %424 = vmatmul.mubr.f32.gmra.mrb[26].mxu1 %v68_v23 }
  0x5b   :  { %428 = vmatprep.mubr.f32.mxu1 %v73_v25 }
  0x5c   :  { %284 = vmatmul.mubr.f32.gmra.mrb[28].mxu0 %v70_v26 }
  0x5d   :  { %288 = vmatprep.mubr.f32.mxu0 %v75_v28 }
  0x5e   :  { %429 = vmatmul.mubr.f32.gmra.mrb[28].mxu1 %v72_v27 }
  0x5f   :  { %433 = vmatprep.mubr.f32.mxu1 %v77_v29 }
  0x60   :  { %289 = vmatmul.mubr.f32.gmra.mrb[30].mxu0 %v74_v30 }
  0x62   :  { %434 = vmatmul.mubr.f32.gmra.mrb[30].mxu1 %v76_v31 }
  0xf7   :  { %v508_v32 = vpop.f32.mrb[0].mxu0 }
  0xf8   :  { %v509_v34 = vpop.f32.mrb[1].mxu0 }
  0xf9   :  { %v588_v35 = vpop.f32.mrb[0].mxu1  ;;  %v510_v36 = vadd.f32 %v509_v34, %v508_v32 }
  0xfa   :  { %v589_v37 = vpop.f32.mrb[1].mxu1 }
  0xfb   :  { %v590_v38 = vadd.f32 %v589_v37, %v588_v35  ;;  %v216_v39 = vadd.f32 %v510_v36, %v1107_v33  ;;  %v511_v40 = vpop.f32.mrb[2].mxu0 }
  0xfc   :  { %v512_v41 = vpop.f32.mrb[3].mxu0 }
  0xfd   :  { %v591_v42 = vpop.f32.mrb[2].mxu1  ;;  %v361_v43 = vadd.f32 %v590_v38, %v216_v39  ;;  %v513_v44 = vadd.f32 %v512_v41, %v511_v40 }
  0xfe   :  { %v592_v45 = vpop.f32.mrb[3].mxu1 }
  0xff   :  { %v593_v46 = vadd.f32 %v592_v45, %v591_v42  ;;  %v439_v47 = vmax.f32 %v361_v43, 0.0  ;;  %v221_v48 = vadd.f32 %v513_v44, %v1107_v33  ;;  %v514_v49 = vpop.f32.mrb[4].mxu0 }
 0x100   :  { %v515_v50 = vpop.f32.mrb[5].mxu0 }
 0x101   :  { %v594_v51 = vpop.f32.mrb[4].mxu1  ;;  %455 = vst [vmem:[%s1176_s3] sm:$0xff] %v439_v47  ;;  %v366_v52 = vadd.f32 %v593_v46, %v221_v48  ;;  %v516_v53 = vadd.f32 %v515_v50, %v514_v49 }
 0x102   :  { %v595_v54 = vpop.f32.mrb[5].mxu1 }
 0x103   :  { %v596_v55 = vadd.f32 %v595_v54, %v594_v51  ;;  %v440_v56 = vmax.f32 %v366_v52, 0.0  ;;  %v226_v57 = vadd.f32 %v516_v53, %v1107_v33  ;;  %v517_v58 = vpop.f32.mrb[6].mxu0 }
 0x104   :  { %v518_v59 = vpop.f32.mrb[7].mxu0 }
 0x105   :  { %v597_v60 = vpop.f32.mrb[6].mxu1  ;;  %456 = vst [vmem:[%s1176_s3 + $0x8] sm:$0xff] %v440_v56  ;;  %v371_v61 = vadd.f32 %v596_v55, %v226_v57  ;;  %v519_v62 = vadd.f32 %v518_v59, %v517_v58 }
 0x106   :  { %v598_v63 = vpop.f32.mrb[7].mxu1 }
 0x107   :  { %v599_v0 = vadd.f32 %v598_v63, %v597_v60  ;;  %v441_v1 = vmax.f32 %v371_v61, 0.0  ;;  %v231_v2 = vadd.f32 %v519_v62, %v1107_v33  ;;  %v520_v3 = vpop.f32.mrb[8].mxu0 }
 0x108   :  { %v521_v4 = vpop.f32.mrb[9].mxu0 }
 0x109   :  { %v600_v5 = vpop.f32.mrb[8].mxu1  ;;  %457 = vst [vmem:[%s1176_s3 + $0x10] sm:$0xff] %v441_v1  ;;  %v376_v6 = vadd.f32 %v599_v0, %v231_v2  ;;  %v522_v7 = vadd.f32 %v521_v4, %v520_v3 }
 0x10a   :  { %v601_v8 = vpop.f32.mrb[9].mxu1 }
 0x10b   :  { %v602_v9 = vadd.f32 %v601_v8, %v600_v5  ;;  %v442_v10 = vmax.f32 %v376_v6, 0.0  ;;  %v236_v11 = vadd.f32 %v522_v7, %v1107_v33  ;;  %v523_v12 = vpop.f32.mrb[10].mxu0 }
 0x10c   :  { %v524_v13 = vpop.f32.mrb[11].mxu0 }
 0x10d   :  { %v603_v14 = vpop.f32.mrb[10].mxu1  ;;  %458 = vst [vmem:[%s1176_s3 + $0x18] sm:$0xff] %v442_v10  ;;  %v381_v15 = vadd.f32 %v602_v9, %v236_v11  ;;  %v525_v16 = vadd.f32 %v524_v13, %v523_v12 }
 0x10e   :  { %v604_v17 = vpop.f32.mrb[11].mxu1 }
 0x10f   :  { %v605_v18 = vadd.f32 %v604_v17, %v603_v14  ;;  %v443_v19 = vmax.f32 %v381_v15, 0.0  ;;  %v241_v20 = vadd.f32 %v525_v16, %v1107_v33  ;;  %v526_v21 = vpop.f32.mrb[12].mxu0 }
 0x110   :  { %v527_v22 = vpop.f32.mrb[13].mxu0 }
 0x111   :  { %v606_v23 = vpop.f32.mrb[12].mxu1  ;;  %459 = vst [vmem:[%s1176_s3 + $0x20] sm:$0xff] %v443_v19  ;;  %v386_v24 = vadd.f32 %v605_v18, %v241_v20  ;;  %v528_v25 = vadd.f32 %v527_v22, %v526_v21 }
 0x112   :  { %v607_v26 = vpop.f32.mrb[13].mxu1 }
 0x113   :  { %v608_v27 = vadd.f32 %v607_v26, %v606_v23  ;;  %v444_v28 = vmax.f32 %v386_v24, 0.0  ;;  %v246_v29 = vadd.f32 %v528_v25, %v1107_v33  ;;  %v529_v30 = vpop.f32.mrb[14].mxu0 }
 0x114   :  { %v530_v31 = vpop.f32.mrb[15].mxu0 }
 0x115   :  { %v609_v32 = vpop.f32.mrb[14].mxu1  ;;  %460 = vst [vmem:[%s1176_s3 + $0x28] sm:$0xff] %v444_v28  ;;  %v391_v34 = vadd.f32 %v608_v27, %v246_v29  ;;  %v531_v35 = vadd.f32 %v530_v31, %v529_v30 }
 0x116   :  { %v610_v36 = vpop.f32.mrb[15].mxu1 }
 0x117   :  { %v611_v37 = vadd.f32 %v610_v36, %v609_v32  ;;  %v445_v38 = vmax.f32 %v391_v34, 0.0  ;;  %v251_v39 = vadd.f32 %v531_v35, %v1107_v33  ;;  %v532_v40 = vpop.f32.mrb[16].mxu0 }
 0x118   :  { %v533_v41 = vpop.f32.mrb[17].mxu0 }
 0x119   :  { %v612_v42 = vpop.f32.mrb[16].mxu1  ;;  %461 = vst [vmem:[%s1176_s3 + $0x30] sm:$0xff] %v445_v38  ;;  %v396_v43 = vadd.f32 %v611_v37, %v251_v39  ;;  %v534_v44 = vadd.f32 %v533_v41, %v532_v40 }
 0x11a   :  { %v613_v45 = vpop.f32.mrb[17].mxu1 }
 0x11b   :  { %v614_v46 = vadd.f32 %v613_v45, %v612_v42  ;;  %v446_v47 = vmax.f32 %v396_v43, 0.0  ;;  %v256_v48 = vadd.f32 %v534_v44, %v1107_v33  ;;  %v535_v49 = vpop.f32.mrb[18].mxu0 }
 0x11c   :  { %v536_v50 = vpop.f32.mrb[19].mxu0 }
 0x11d   :  { %v615_v51 = vpop.f32.mrb[18].mxu1  ;;  %462 = vst [vmem:[%s1176_s3 + $0x38] sm:$0xff] %v446_v47  ;;  %v401_v52 = vadd.f32 %v614_v46, %v256_v48  ;;  %v537_v53 = vadd.f32 %v536_v50, %v535_v49 }
 0x11e   :  { %v616_v54 = vpop.f32.mrb[19].mxu1 }
 0x11f   :  { %v617_v55 = vadd.f32 %v616_v54, %v615_v51  ;;  %v447_v56 = vmax.f32 %v401_v52, 0.0  ;;  %v261_v57 = vadd.f32 %v537_v53, %v1107_v33  ;;  %v538_v58 = vpop.f32.mrb[20].mxu0 }
 0x120   :  { %v539_v59 = vpop.f32.mrb[21].mxu0 }
 0x121   :  { %v618_v60 = vpop.f32.mrb[20].mxu1  ;;  %463 = vst [vmem:[%s1176_s3 + $0x40] sm:$0xff] %v447_v56  ;;  %v406_v61 = vadd.f32 %v617_v55, %v261_v57  ;;  %v540_v62 = vadd.f32 %v539_v59, %v538_v58 }
 0x122   :  { %v619_v63 = vpop.f32.mrb[21].mxu1 }
 0x123   :  { %v620_v0 = vadd.f32 %v619_v63, %v618_v60  ;;  %v448_v1 = vmax.f32 %v406_v61, 0.0  ;;  %v266_v2 = vadd.f32 %v540_v62, %v1107_v33  ;;  %v541_v3 = vpop.f32.mrb[22].mxu0 }
 0x124   :  { %v542_v4 = vpop.f32.mrb[23].mxu0 }
 0x125   :  { %v621_v5 = vpop.f32.mrb[22].mxu1  ;;  %464 = vst [vmem:[%s1176_s3 + $0x48] sm:$0xff] %v448_v1  ;;  %v411_v6 = vadd.f32 %v620_v0, %v266_v2  ;;  %v543_v7 = vadd.f32 %v542_v4, %v541_v3 }
 0x126   :  { %v622_v8 = vpop.f32.mrb[23].mxu1 }
 0x127   :  { %v623_v9 = vadd.f32 %v622_v8, %v621_v5  ;;  %v449_v10 = vmax.f32 %v411_v6, 0.0  ;;  %v271_v11 = vadd.f32 %v543_v7, %v1107_v33  ;;  %v544_v12 = vpop.f32.mrb[24].mxu0 }
 0x128   :  { %v545_v13 = vpop.f32.mrb[25].mxu0 }
 0x129   :  { %v624_v14 = vpop.f32.mrb[24].mxu1  ;;  %465 = vst [vmem:[%s1176_s3 + $0x50] sm:$0xff] %v449_v10  ;;  %v416_v15 = vadd.f32 %v623_v9, %v271_v11  ;;  %v546_v16 = vadd.f32 %v545_v13, %v544_v12 }
 0x12a   :  { %v625_v17 = vpop.f32.mrb[25].mxu1 }
 0x12b   :  { %v626_v18 = vadd.f32 %v625_v17, %v624_v14  ;;  %v450_v19 = vmax.f32 %v416_v15, 0.0  ;;  %v276_v20 = vadd.f32 %v546_v16, %v1107_v33  ;;  %v547_v21 = vpop.f32.mrb[26].mxu0 }
 0x12c   :  { %v548_v22 = vpop.f32.mrb[27].mxu0 }
 0x12d   :  { %v627_v23 = vpop.f32.mrb[26].mxu1  ;;  %466 = vst [vmem:[%s1176_s3 + $0x58] sm:$0xff] %v450_v19  ;;  %v421_v24 = vadd.f32 %v626_v18, %v276_v20  ;;  %v549_v25 = vadd.f32 %v548_v22, %v547_v21 }
 0x12e   :  { %v628_v26 = vpop.f32.mrb[27].mxu1 }
 0x12f   :  { %v629_v27 = vadd.f32 %v628_v26, %v627_v23  ;;  %v451_v28 = vmax.f32 %v421_v24, 0.0  ;;  %v281_v29 = vadd.f32 %v549_v25, %v1107_v33  ;;  %v550_v30 = vpop.f32.mrb[28].mxu0 }
 0x130   :  { %v551_v31 = vpop.f32.mrb[29].mxu0 }
 0x131   :  { %v630_v32 = vpop.f32.mrb[28].mxu1  ;;  %467 = vst [vmem:[%s1176_s3 + $0x60] sm:$0xff] %v451_v28  ;;  %v426_v34 = vadd.f32 %v629_v27, %v281_v29  ;;  %v552_v35 = vadd.f32 %v551_v31, %v550_v30 }
 0x132   :  { %v631_v36 = vpop.f32.mrb[29].mxu1 }
 0x133   :  { %v632_v37 = vadd.f32 %v631_v36, %v630_v32  ;;  %v452_v38 = vmax.f32 %v426_v34, 0.0  ;;  %v286_v39 = vadd.f32 %v552_v35, %v1107_v33  ;;  %v553_v40 = vpop.f32.mrb[30].mxu0 }
 0x134   :  { %v554_v41 = vpop.f32.mrb[31].mxu0 }
 0x135   :  { %v633_v42 = vpop.f32.mrb[30].mxu1  ;;  %468 = vst [vmem:[%s1176_s3 + $0x68] sm:$0xff] %v452_v38  ;;  %v431_v43 = vadd.f32 %v632_v37, %v286_v39  ;;  %v555_v44 = vadd.f32 %v554_v41, %v553_v40 }
 0x136   :  { %v634_v45 = vpop.f32.mrb[31].mxu1 }
 0x137   :  { %v635_v46 = vadd.f32 %v634_v45, %v633_v42  ;;  %v453_v47 = vmax.f32 %v431_v43, 0.0  ;;  %v291_v48 = vadd.f32 %v555_v44, %v1107_v33 }
 0x139   :  { %469 = vst [vmem:[%s1176_s3 + $0x70] sm:$0xff] %v453_v47  ;;  %v436_v49 = vadd.f32 %v635_v46, %v291_v48 }
 0x13b   :  { %v454_v50 = vmax.f32 %v436_v49, 0.0 }
 0x13d   :  { %470 = vst [vmem:[%s1176_s3 + $0x78] sm:$0xff] %v454_v50 }

// kernel: celeba_encoder_forward.8
= control target key start
LH: loop header
LB: loop body
LE: loop exit
PB: predicated region body
PF: predicated region fallthrough
CT: control target
= control target key end

     0   :  { %s1353_s1 = inlined_call_operand.vmem [shape: f32[1024,128], index: 1, kind: input, shape index: {}]   ;;  %s1354_s0 = inlined_call_operand.vmem [shape: f32[32,1024], index: 0, kind: input, shape index: {}]   ;;  %s1355_s2 = inlined_call_operand.vmem [shape: f32[1,128], index: 2, kind: input, shape index: {}]   ;;  %s1356_s3 = inlined_call_operand.vmem [shape: f32[32,128], index: 3, kind: output, shape index: {}]  }
   0x1   :  { %v62_v0 = vld [vmem:[%s1353_s1 + $0x80] sm:$0xff]  ;;  %v63_v1 = vld [vmem:[%s1353_s1 + $0x88] sm:$0xff]  ;;  %v64_v11 = vld [vmem:[%s1353_s1 + $0x90] sm:$0xff] }
   0x2   :  { %v46_v2 = vld [vmem:[%s1353_s1] sm:$0xff]  ;;  %v710_v3 = vpack.c.bf16 %v63_v1, %v62_v0  ;;  %v47_v4 = vld [vmem:[%s1353_s1 + $0x8] sm:$0xff]  ;;  %v65_v13 = vld [vmem:[%s1353_s1 + $0x98] sm:$0xff] }
   0x3   :  { %v94_v5 = vld [vmem:[%s1353_s1 + $0x180] sm:$0xff]  ;;  %v95_v6 = vld [vmem:[%s1353_s1 + $0x188] sm:$0xff]  ;;  %v712_v7 = vpack.c.bf16 %v47_v4, %v46_v2  ;;  %v48_v14 = vld [vmem:[%s1353_s1 + $0x10] sm:$0xff]  ;;  %v714_v16 = vpack.c.bf16 %v65_v13, %v64_v11 }
   0x4   :  { %v742_v8 = vpack.c.bf16 %v95_v6, %v94_v5  ;;  %v78_v9 = vld [vmem:[%s1353_s1 + $0x100] sm:$0xff]  ;;  %v79_v10 = vld [vmem:[%s1353_s1 + $0x108] sm:$0xff]  ;;  %711 = vmatprep.subr.bf16.mxu0 %v710_v3  ;;  %v49_v15 = vld [vmem:[%s1353_s1 + $0x18] sm:$0xff] }
   0x5   :  { %v744_v12 = vpack.c.bf16 %v79_v10, %v78_v9  ;;  %713 = vmatpush3.bf16.msra.mxu0 %v712_v7  ;;  %v716_v17 = vpack.c.bf16 %v49_v15, %v48_v14  ;;  %v96_v18 = vld [vmem:[%s1353_s1 + $0x190] sm:$0xff]  ;;  %v97_v19 = vld [vmem:[%s1353_s1 + $0x198] sm:$0xff]  ;;  %v66_v23 = vld [vmem:[%s1353_s1 + $0xa0] sm:$0xff] }
   0x6   :  { %743 = vmatprep.subr.bf16.mxu1 %v742_v8  ;;  %v80_v20 = vld [vmem:[%s1353_s1 + $0x110] sm:$0xff]  ;;  %v746_v21 = vpack.c.bf16 %v97_v19, %v96_v18  ;;  %v81_v22 = vld [vmem:[%s1353_s1 + $0x118] sm:$0xff]  ;;  %v67_v24 = vld [vmem:[%s1353_s1 + $0xa8] sm:$0xff]  ;;  %715 = vmatprep.subr.bf16.mxu0 %v714_v16 }
   0x7   :  { %745 = vmatpush3.bf16.msra.mxu1 %v744_v12  ;;  %v748_v25 = vpack.c.bf16 %v81_v22, %v80_v20  ;;  %v718_v26 = vpack.c.bf16 %v67_v24, %v66_v23  ;;  %v50_v27 = vld [vmem:[%s1353_s1 + $0x20] sm:$0xff]  ;;  %v51_v28 = vld [vmem:[%s1353_s1 + $0x28] sm:$0xff]  ;;  %v68_v35 = vld [vmem:[%s1353_s1 + $0xb0] sm:$0xff] }
   0x8   :  { %v98_v29 = vld [vmem:[%s1353_s1 + $0x1a0] sm:$0xff]  ;;  %747 = vmatprep.subr.bf16.mxu1 %v746_v21  ;;  %v99_v30 = vld [vmem:[%s1353_s1 + $0x1a8] sm:$0xff]  ;;  %v720_v33 = vpack.c.bf16 %v51_v28, %v50_v27  ;;  %v69_v36 = vld [vmem:[%s1353_s1 + $0xb8] sm:$0xff] }
   0x9   :  { %v82_v31 = vld [vmem:[%s1353_s1 + $0x120] sm:$0xff]  ;;  %v83_v32 = vld [vmem:[%s1353_s1 + $0x128] sm:$0xff]  ;;  %717 = vmatpush3.bf16.msra.mxu0 %v716_v17  ;;  %v750_v34 = vpack.c.bf16 %v99_v30, %v98_v29  ;;  %v52_v37 = vld [vmem:[%s1353_s1 + $0x30] sm:$0xff]  ;;  %v722_v39 = vpack.c.bf16 %v69_v36, %v68_v35 }
   0xa   :  { %719 = vmatprep.subr.bf16.mxu0 %v718_v26  ;;  %v752_v38 = vpack.c.bf16 %v83_v32, %v82_v31  ;;  %v53_v40 = vld [vmem:[%s1353_s1 + $0x38] sm:$0xff]  ;;  %v100_v41 = vld [vmem:[%s1353_s1 + $0x1b0] sm:$0xff]  ;;  %v70_v46 = vld [vmem:[%s1353_s1 + $0xc0] sm:$0xff] }
   0xb   :  { %749 = vmatpush3.bf16.msra.mxu1 %v748_v25  ;;  %v101_v42 = vld [vmem:[%s1353_s1 + $0x1b8] sm:$0xff]  ;;  %v84_v44 = vld [vmem:[%s1353_s1 + $0x130] sm:$0xff]  ;;  %v71_v47 = vld [vmem:[%s1353_s1 + $0xc8] sm:$0xff]  ;;  %v724_v48 = vpack.c.bf16 %v53_v40, %v52_v37 }
   0xc   :  { %751 = vmatprep.subr.bf16.mxu1 %v750_v34  ;;  %v754_v43 = vpack.c.bf16 %v101_v42, %v100_v41  ;;  %v85_v45 = vld [vmem:[%s1353_s1 + $0x138] sm:$0xff]  ;;  %v102_v49 = vld [vmem:[%s1353_s1 + $0x1c0] sm:$0xff]  ;;  %v103_v50 = vld [vmem:[%s1353_s1 + $0x1c8] sm:$0xff]  ;;  %v726_v52 = vpack.c.bf16 %v71_v47, %v70_v46 }
   0xd   :  { %721 = vmatpush3.bf16.msra.mxu0 %v720_v33  ;;  %v756_v51 = vpack.c.bf16 %v85_v45, %v84_v44  ;;  %v54_v53 = vld [vmem:[%s1353_s1 + $0x40] sm:$0xff]  ;;  %v55_v54 = vld [vmem:[%s1353_s1 + $0x48] sm:$0xff]  ;;  %v758_v56 = vpack.c.bf16 %v103_v50, %v102_v49  ;;  %v72_v58 = vld [vmem:[%s1353_s1 + $0xd0] sm:$0xff] }
   0xe   :  { %723 = vmatprep.subr.bf16.mxu0 %v722_v39  ;;  %v86_v55 = vld [vmem:[%s1353_s1 + $0x140] sm:$0xff]  ;;  %v87_v57 = vld [vmem:[%s1353_s1 + $0x148] sm:$0xff]  ;;  %v73_v59 = vld [vmem:[%s1353_s1 + $0xd8] sm:$0xff]  ;;  %v728_v62 = vpack.c.bf16 %v55_v54, %v54_v53 }
   0xf   :  { %753 = vmatpush3.bf16.msra.mxu1 %v752_v38  ;;  %v104_v60 = vld [vmem:[%s1353_s1 + $0x1d0] sm:$0xff]  ;;  %v105_v61 = vld [vmem:[%s1353_s1 + $0x1d8] sm:$0xff]  ;;  %v760_v63 = vpack.c.bf16 %v87_v57, %v86_v55  ;;  %v730_v0 = vpack.c.bf16 %v73_v59, %v72_v58  ;;  %v74_v6 = vld [vmem:[%s1353_s1 + $0xe0] sm:$0xff] }
  0x10   :  { %755 = vmatprep.subr.bf16.mxu1 %v754_v43  ;;  %v56_v1 = vld [vmem:[%s1353_s1 + $0x50] sm:$0xff]  ;;  %v57_v2 = vld [vmem:[%s1353_s1 + $0x58] sm:$0xff]  ;;  %v762_v4 = vpack.c.bf16 %v105_v61, %v104_v60  ;;  %v75_v7 = vld [vmem:[%s1353_s1 + $0xe8] sm:$0xff] }
  0x11   :  { %725 = vmatpush3.bf16.msra.mxu0 %v724_v48  ;;  %v88_v3 = vld [vmem:[%s1353_s1 + $0x150] sm:$0xff]  ;;  %v89_v5 = vld [vmem:[%s1353_s1 + $0x158] sm:$0xff]  ;;  %v106_v8 = vld [vmem:[%s1353_s1 + $0x1e0] sm:$0xff]  ;;  %v732_v10 = vpack.c.bf16 %v57_v2, %v56_v1  ;;  %v734_v14 = vpack.c.bf16 %v75_v7, %v74_v6 }
  0x12   :  { %727 = vmatprep.subr.bf16.mxu0 %v726_v52  ;;  %v107_v9 = vld [vmem:[%s1353_s1 + $0x1e8] sm:$0xff]  ;;  %v58_v11 = vld [vmem:[%s1353_s1 + $0x60] sm:$0xff]  ;;  %v764_v13 = vpack.c.bf16 %v89_v5, %v88_v3  ;;  %v76_v19 = vld [vmem:[%s1353_s1 + $0xf0] sm:$0xff] }
  0x13   :  { %757 = vmatpush3.bf16.msra.mxu1 %v756_v51  ;;  %v59_v12 = vld [vmem:[%s1353_s1 + $0x68] sm:$0xff]  ;;  %v90_v15 = vld [vmem:[%s1353_s1 + $0x160] sm:$0xff]  ;;  %v766_v18 = vpack.c.bf16 %v107_v9, %v106_v8  ;;  %v77_v20 = vld [vmem:[%s1353_s1 + $0xf8] sm:$0xff] }
  0x14   :  { %759 = vmatprep.subr.bf16.mxu1 %v758_v56  ;;  %v91_v16 = vld [vmem:[%s1353_s1 + $0x168] sm:$0xff]  ;;  %v17_v21 = vld [vmem:[%s1354_s0 + $0x18] sm:$0xff]  ;;  %v108_v22 = vld [vmem:[%s1353_s1 + $0x1f0] sm:$0xff]  ;;  %v736_v24 = vpack.c.bf16 %v59_v12, %v58_v11  ;;  %v738_v26 = vpack.c.bf16 %v77_v20, %v76_v19 }
  0x15   :  { %729 = vmatpush3.bf16.msra.mxu0 %v728_v62  ;;  %v15_v17 = vld [vmem:[%s1354_s0 + $0x8] sm:$0xff]  ;;  %v109_v23 = vld [vmem:[%s1353_s1 + $0x1f8] sm:$0xff]  ;;  %330 = vmatprep.mubr.f32.mxu1 %v17_v21  ;;  %v768_v25 = vpack.c.bf16 %v91_v16, %v90_v15  ;;  %v60_v27 = vld [vmem:[%s1353_s1 + $0x70] sm:$0xff] }
  0x16   :  { %731 = vmatprep.subr.bf16.mxu0 %v730_v0  ;;  %245 = vmatprep.mubr.f32.mxu0 %v15_v17  ;;  %v61_v28 = vld [vmem:[%s1353_s1 + $0x78] sm:$0xff]  ;;  %v92_v29 = vld [vmem:[%s1353_s1 + $0x170] sm:$0xff]  ;;  %v770_v30 = vpack.c.bf16 %v109_v23, %v108_v22  ;;  %v126_v32 = vld [vmem:[%s1353_s1 + $0x280] sm:$0xff] }
  0x17   :  { %761 = vmatpush3.bf16.msra.mxu1 %v760_v63  ;;  %v93_v31 = vld [vmem:[%s1353_s1 + $0x178] sm:$0xff]  ;;  %v127_v33 = vld [vmem:[%s1353_s1 + $0x288] sm:$0xff]  ;;  %v158_v34 = vld [vmem:[%s1353_s1 + $0x380] sm:$0xff]  ;;  %v740_v36 = vpack.c.bf16 %v61_v28, %v60_v27 }
  0x18   :  { %763 = vmatprep.subr.bf16.mxu1 %v762_v4  ;;  %v159_v35 = vld [vmem:[%s1353_s1 + $0x388] sm:$0xff]  ;;  %v772_v37 = vpack.c.bf16 %v93_v31, %v92_v29  ;;  %v774_v38 = vpack.c.bf16 %v127_v33, %v126_v32  ;;  %v110_v39 = vld [vmem:[%s1353_s1 + $0x200] sm:$0xff]  ;;  %v128_v44 = vld [vmem:[%s1353_s1 + $0x290] sm:$0xff] }
  0x19   :  { %733 = vmatpush3.bf16.msra.mxu0 %v732_v10  ;;  %v111_v40 = vld [vmem:[%s1353_s1 + $0x208] sm:$0xff]  ;;  %v142_v41 = vld [vmem:[%s1353_s1 + $0x300] sm:$0xff]  ;;  %v806_v42 = vpack.c.bf16 %v159_v35, %v158_v34  ;;  %v129_v45 = vld [vmem:[%s1353_s1 + $0x298] sm:$0xff] }
  0x1a   :  { %735 = vmatprep.subr.bf16.mxu0 %v734_v14  ;;  %v143_v43 = vld [vmem:[%s1353_s1 + $0x308] sm:$0xff]  ;;  %v160_v46 = vld [vmem:[%s1353_s1 + $0x390] sm:$0xff]  ;;  %v161_v47 = vld [vmem:[%s1353_s1 + $0x398] sm:$0xff]  ;;  %v776_v49 = vpack.c.bf16 %v111_v40, %v110_v39  ;;  %v778_v52 = vpack.c.bf16 %v129_v45, %v128_v44 }
  0x1b   :  { %765 = vmatpush3.bf16.msra.mxu1 %v764_v13  ;;  %v14_v48 = vld [vmem:[%s1354_s0] sm:$0xff]  ;;  %v16_v50 = vld [vmem:[%s1354_s0 + $0x10] sm:$0xff]  ;;  %v808_v51 = vpack.c.bf16 %v143_v43, %v142_v41  ;;  %v113_v54 = vld [vmem:[%s1353_s1 + $0x218] sm:$0xff]  ;;  %v810_v56 = vpack.c.bf16 %v161_v47, %v160_v46 }
  0x1c   :  { %767 = vmatprep.subr.bf16.mxu1 %v766_v18  ;;  %v112_v53 = vld [vmem:[%s1353_s1 + $0x210] sm:$0xff]  ;;  %v145_v57 = vld [vmem:[%s1353_s1 + $0x318] sm:$0xff]  ;;  %v130_v58 = vld [vmem:[%s1353_s1 + $0x2a0] sm:$0xff] }
  0x1d   :  { %737 = vmatpush3.bf16.msra.mxu0 %v736_v24  ;;  %v144_v55 = vld [vmem:[%s1353_s1 + $0x310] sm:$0xff]  ;;  %v131_v59 = vld [vmem:[%s1353_s1 + $0x2a8] sm:$0xff]  ;;  %v162_v60 = vld [vmem:[%s1353_s1 + $0x3a0] sm:$0xff]  ;;  %v780_v63 = vpack.c.bf16 %v113_v54, %v112_v53 }
  0x1e   :  { %739 = vmatprep.subr.bf16.mxu0 %v738_v26  ;;  %v163_v61 = vld [vmem:[%s1353_s1 + $0x3a8] sm:$0xff]  ;;  %v114_v0 = vld [vmem:[%s1353_s1 + $0x220] sm:$0xff]  ;;  %v25_v2 = vld [vmem:[%s1354_s0 + $0x58] sm:$0xff]  ;;  %v812_v3 = vpack.c.bf16 %v145_v57, %v144_v55  ;;  %v782_v4 = vpack.c.bf16 %v131_v59, %v130_v58 }
  0x1f   :  { %769 = vmatpush3.bf16.msra.mxu1 %v768_v25  ;;  %v23_v62 = vld [vmem:[%s1354_s0 + $0x48] sm:$0xff]  ;;  %v22_v1 = vld [vmem:[%s1354_s0 + $0x40] sm:$0xff]  ;;  %v24_v7 = vld [vmem:[%s1354_s0 + $0x50] sm:$0xff]  ;;  %v814_v8 = vpack.c.bf16 %v163_v61, %v162_v60 }
  0x20   :  { %771 = vmatprep.subr.bf16.mxu1 %v770_v30  ;;  %v115_v5 = vld [vmem:[%s1353_s1 + $0x228] sm:$0xff]  ;;  %v146_v6 = vld [vmem:[%s1353_s1 + $0x320] sm:$0xff]  ;;  %v132_v10 = vld [vmem:[%s1353_s1 + $0x2b0] sm:$0xff] }
  0x21   :  { %741 = vmatpush3.bf16.msra.mxu0 %v740_v36  ;;  %v147_v9 = vld [vmem:[%s1353_s1 + $0x328] sm:$0xff]  ;;  %v133_v11 = vld [vmem:[%s1353_s1 + $0x2b8] sm:$0xff]  ;;  %v164_v12 = vld [vmem:[%s1353_s1 + $0x3b0] sm:$0xff]  ;;  %v784_v15 = vpack.c.bf16 %v115_v5, %v114_v0 }
  0x22   :  { %775 = vmatprep.subr.bf16.mxu0 %v774_v38  ;;  %v165_v13 = vld [vmem:[%s1353_s1 + $0x3b8] sm:$0xff]  ;;  %v31_v14 = vld [vmem:[%s1354_s0 + $0x88] sm:$0xff]  ;;  %v116_v16 = vld [vmem:[%s1353_s1 + $0x230] sm:$0xff]  ;;  %v816_v19 = vpack.c.bf16 %v147_v9, %v146_v6  ;;  %v786_v20 = vpack.c.bf16 %v133_v11, %v132_v10 }
  0x23   :  { %773 = vmatpush3.bf16.msra.mxu1 %v772_v37  ;;  %v30_v17 = vld [vmem:[%s1354_s0 + $0x80] sm:$0xff]  ;;  %v33_v18 = vld [vmem:[%s1354_s0 + $0x98] sm:$0xff]  ;;  %v148_v22 = vld [vmem:[%s1353_s1 + $0x330] sm:$0xff]  ;;  %v818_v24 = vpack.c.bf16 %v165_v13, %v164_v12 }
  0x24   :  { %807 = vmatprep.subr.bf16.mxu1 %v806_v42  ;;  %246 = vmatmul.mubr.f32.vlgmr.msra.gmra.mrb[0].mxu0 %v14_v48  ;;  %v117_v21 = vld [vmem:[%s1353_s1 + $0x238] sm:$0xff]  ;;  %v32_v23 = vld [vmem:[%s1354_s0 + $0x90] sm:$0xff]  ;;  %v134_v26 = vld [vmem:[%s1353_s1 + $0x2c0] sm:$0xff] }
  0x25   :  { %777 = vmatpush3.bf16.msra.mxu0 %v776_v49  ;;  %250 = vmatprep.mubr.f32.mxu0 %v23_v62  ;;  %v149_v25 = vld [vmem:[%s1353_s1 + $0x338] sm:$0xff]  ;;  %v135_v27 = vld [vmem:[%s1353_s1 + $0x2c8] sm:$0xff]  ;;  %v166_v28 = vld [vmem:[%s1353_s1 + $0x3c0] sm:$0xff]  ;;  %v788_v31 = vpack.c.bf16 %v117_v21, %v116_v16 }
  0x26   :  { %331 = vmatmul.mubr.f32.vlgmr.msra.gmra.mrb[0].mxu1 %v16_v50  ;;  %779 = vmatprep.subr.bf16.mxu0 %v778_v52  ;;  %v167_v29 = vld [vmem:[%s1353_s1 + $0x3c8] sm:$0xff]  ;;  %v118_v32 = vld [vmem:[%s1353_s1 + $0x240] sm:$0xff]  ;;  %v41_v34 = vld [vmem:[%s1354_s0 + $0xd8] sm:$0xff]  ;;  %v820_v35 = vpack.c.bf16 %v149_v25, %v148_v22  ;;  %v790_v36 = vpack.c.bf16 %v135_v27, %v134_v26 }
  0x27   :  { %809 = vmatpush3.bf16.msra.mxu1 %v808_v51  ;;  %335 = vmatprep.mubr.f32.mxu1 %v25_v2  ;;  %v39_v30 = vld [vmem:[%s1354_s0 + $0xc8] sm:$0xff]  ;;  %v38_v33 = vld [vmem:[%s1354_s0 + $0xc0] sm:$0xff]  ;;  %v40_v39 = vld [vmem:[%s1354_s0 + $0xd0] sm:$0xff]  ;;  %v822_v40 = vpack.c.bf16 %v167_v29, %v166_v28 }
  0x28   :  { %811 = vmatprep.subr.bf16.mxu1 %v810_v56  ;;  %251 = vmatmul.mubr.f32.gmra.mrb[2].mxu0 %v22_v1  ;;  %v119_v37 = vld [vmem:[%s1353_s1 + $0x248] sm:$0xff]  ;;  %v150_v38 = vld [vmem:[%s1353_s1 + $0x340] sm:$0xff]  ;;  %v136_v42 = vld [vmem:[%s1353_s1 + $0x2d0] sm:$0xff] }
  0x29   :  { %781 = vmatpush3.bf16.msra.mxu0 %v780_v63  ;;  %255 = vmatprep.mubr.f32.mxu0 %v31_v14  ;;  %v151_v41 = vld [vmem:[%s1353_s1 + $0x348] sm:$0xff]  ;;  %v137_v43 = vld [vmem:[%s1353_s1 + $0x2d8] sm:$0xff]  ;;  %v168_v44 = vld [vmem:[%s1353_s1 + $0x3d0] sm:$0xff]  ;;  %v792_v46 = vpack.c.bf16 %v119_v37, %v118_v32 }
  0x2a   :  { %336 = vmatmul.mubr.f32.gmra.mrb[2].mxu1 %v24_v7  ;;  %783 = vmatprep.subr.bf16.mxu0 %v782_v4  ;;  %v169_v45 = vld [vmem:[%s1353_s1 + $0x3d8] sm:$0xff]  ;;  %v19_v47 = vld [vmem:[%s1354_s0 + $0x28] sm:$0xff]  ;;  %v824_v49 = vpack.c.bf16 %v151_v41, %v150_v38  ;;  %v794_v50 = vpack.c.bf16 %v137_v43, %v136_v42  ;;  %v120_v51 = vld [vmem:[%s1353_s1 + $0x250] sm:$0xff] }
  0x2b   :  { %813 = vmatpush3.bf16.msra.mxu1 %v812_v3  ;;  %340 = vmatprep.mubr.f32.mxu1 %v33_v18  ;;  %v21_v48 = vld [vmem:[%s1354_s0 + $0x38] sm:$0xff]  ;;  %v152_v53 = vld [vmem:[%s1353_s1 + $0x350] sm:$0xff]  ;;  %v826_v54 = vpack.c.bf16 %v169_v45, %v168_v44  ;;  %v138_v56 = vld [vmem:[%s1353_s1 + $0x2e0] sm:$0xff] }
  0x2c   :  { %815 = vmatprep.subr.bf16.mxu1 %v814_v8  ;;  %256 = vmatmul.mubr.f32.gmra.mrb[4].mxu0 %v30_v17  ;;  %v121_v52 = vld [vmem:[%s1353_s1 + $0x258] sm:$0xff]  ;;  %v139_v57 = vld [vmem:[%s1353_s1 + $0x2e8] sm:$0xff]  ;;  %v170_v58 = vld [vmem:[%s1353_s1 + $0x3e0] sm:$0xff] }
  0x2d   :  { %785 = vmatpush3.bf16.msra.mxu0 %v784_v15  ;;  %260 = vmatprep.mubr.f32.mxu0 %v39_v30  ;;  %v153_v55 = vld [vmem:[%s1353_s1 + $0x358] sm:$0xff]  ;;  %v171_v59 = vld [vmem:[%s1353_s1 + $0x3e8] sm:$0xff]  ;;  %v796_v60 = vpack.c.bf16 %v121_v52, %v120_v51  ;;  %v798_v62 = vpack.c.bf16 %v139_v57, %v138_v56  ;;  %v122_v63 = vld [vmem:[%s1353_s1 + $0x260] sm:$0xff] }
  0x2e   :  { %341 = vmatmul.mubr.f32.gmra.mrb[4].mxu1 %v32_v23  ;;  %787 = vmatprep.subr.bf16.mxu0 %v786_v20  ;;  %v828_v61 = vpack.c.bf16 %v153_v55, %v152_v53  ;;  %v123_v0 = vld [vmem:[%s1353_s1 + $0x268] sm:$0xff]  ;;  %v154_v1 = vld [vmem:[%s1353_s1 + $0x360] sm:$0xff]  ;;  %v830_v2 = vpack.c.bf16 %v171_v59, %v170_v58  ;;  %v140_v4 = vld [vmem:[%s1353_s1 + $0x2f0] sm:$0xff] }
  0x2f   :  { %817 = vmatpush3.bf16.msra.mxu1 %v816_v19  ;;  %345 = vmatprep.mubr.f32.mxu1 %v41_v34  ;;  %v155_v3 = vld [vmem:[%s1353_s1 + $0x368] sm:$0xff]  ;;  %v141_v5 = vld [vmem:[%s1353_s1 + $0x2f8] sm:$0xff]  ;;  %v172_v6 = vld [vmem:[%s1353_s1 + $0x3f0] sm:$0xff]  ;;  %v800_v8 = vpack.c.bf16 %v123_v0, %v122_v63 }
  0x30   :  { %819 = vmatprep.subr.bf16.mxu1 %v818_v24  ;;  %261 = vmatmul.mubr.f32.gmra.mrb[6].mxu0 %v38_v33  ;;  %v173_v7 = vld [vmem:[%s1353_s1 + $0x3f8] sm:$0xff]  ;;  %v832_v9 = vpack.c.bf16 %v155_v3, %v154_v1  ;;  %v802_v10 = vpack.c.bf16 %v141_v5, %v140_v4  ;;  %v124_v11 = vld [vmem:[%s1353_s1 + $0x270] sm:$0xff]  ;;  %v18_v18 = vld [vmem:[%s1354_s0 + $0x20] sm:$0xff] }
  0x31   :  { %789 = vmatpush3.bf16.msra.mxu0 %v788_v31  ;;  %415 = vmatprep.mubr.f32.mxu0 %v19_v47  ;;  %v125_v12 = vld [vmem:[%s1353_s1 + $0x278] sm:$0xff]  ;;  %v834_v13 = vpack.c.bf16 %v173_v7, %v172_v6  ;;  %v156_v14 = vld [vmem:[%s1353_s1 + $0x370] sm:$0xff]  ;;  %v27_v20 = vld [vmem:[%s1354_s0 + $0x68] sm:$0xff] }
  0x32   :  { %346 = vmatmul.mubr.f32.gmra.mrb[6].mxu1 %v40_v39  ;;  %791 = vmatprep.subr.bf16.mxu0 %v790_v36  ;;  %v157_v15 = vld [vmem:[%s1353_s1 + $0x378] sm:$0xff]  ;;  %v804_v16 = vpack.c.bf16 %v125_v12, %v124_v11  ;;  %v20_v19 = vld [vmem:[%s1354_s0 + $0x30] sm:$0xff]  ;;  %v26_v22 = vld [vmem:[%s1354_s0 + $0x60] sm:$0xff] }
  0x33   :  { %821 = vmatpush3.bf16.msra.mxu1 %v820_v35  ;;  %500 = vmatprep.mubr.f32.mxu1 %v21_v48  ;;  %v836_v17 = vpack.c.bf16 %v157_v15, %v156_v14  ;;  %v29_v21 = vld [vmem:[%s1354_s0 + $0x78] sm:$0xff]  ;;  %v28_v23 = vld [vmem:[%s1354_s0 + $0x70] sm:$0xff]  ;;  %v35_v24 = vld [vmem:[%s1354_s0 + $0xa8] sm:$0xff] }
  0x34   :  { %823 = vmatprep.subr.bf16.mxu1 %v822_v40  ;;  %v37_v25 = vld [vmem:[%s1354_s0 + $0xb8] sm:$0xff]  ;;  %v34_v26 = vld [vmem:[%s1354_s0 + $0xa0] sm:$0xff]  ;;  %v36_v27 = vld [vmem:[%s1354_s0 + $0xb0] sm:$0xff] }
  0x35   :  { %793 = vmatpush3.bf16.msra.mxu0 %v792_v46  ;;  %v43_v28 = vld [vmem:[%s1354_s0 + $0xe8] sm:$0xff]  ;;  %v45_v29 = vld [vmem:[%s1354_s0 + $0xf8] sm:$0xff]  ;;  %v42_v30 = vld [vmem:[%s1354_s0 + $0xe0] sm:$0xff] }
  0x36   :  { %795 = vmatprep.subr.bf16.mxu0 %v794_v50  ;;  %v44_v31 = vld [vmem:[%s1354_s0 + $0xf0] sm:$0xff]  ;;  %v533_v33 = vld [vmem:[%s1355_s2] ss:$0 sm:$0xff] }
  0x37   :  { %825 = vmatpush3.bf16.msra.mxu1 %v824_v49 }
  0x38   :  { %827 = vmatprep.subr.bf16.mxu1 %v826_v54 }
  0x39   :  { %797 = vmatpush3.bf16.msra.mxu0 %v796_v60 }
  0x3a   :  { %799 = vmatprep.subr.bf16.mxu0 %v798_v62 }
  0x3b   :  { %829 = vmatpush3.bf16.msra.mxu1 %v828_v61 }
  0x3c   :  { %831 = vmatprep.subr.bf16.mxu1 %v830_v2 }
  0x3d   :  { %801 = vmatpush3.bf16.msra.mxu0 %v800_v8 }
  0x3e   :  { %803 = vmatprep.subr.bf16.mxu0 %v802_v10 }
  0x3f   :  { %833 = vmatpush3.bf16.msra.mxu1 %v832_v9 }
  0x40   :  { %835 = vmatprep.subr.bf16.mxu1 %v834_v13 }
  0x41   :  { %805 = vmatpush3.bf16.msra.mxu0 %v804_v16 }
  0x43   :  { %837 = vmatpush3.bf16.msra.mxu1 %v836_v17 }
  0x44   :  { %416 = vmatmul.mubr.f32.vlgmr.msra.gmra.mrb[8].mxu0 %v18_v18 }
  0x45   :  { %420 = vmatprep.mubr.f32.mxu0 %v27_v20 }
  0x46   :  { %501 = vmatmul.mubr.f32.vlgmr.msra.gmra.mrb[8].mxu1 %v20_v19 }
  0x47   :  { %505 = vmatprep.mubr.f32.mxu1 %v29_v21 }
  0x48   :  { %421 = vmatmul.mubr.f32.gmra.mrb[10].mxu0 %v26_v22 }
  0x49   :  { %425 = vmatprep.mubr.f32.mxu0 %v35_v24 }
  0x4a   :  { %506 = vmatmul.mubr.f32.gmra.mrb[10].mxu1 %v28_v23 }
  0x4b   :  { %510 = vmatprep.mubr.f32.mxu1 %v37_v25 }
  0x4c   :  { %426 = vmatmul.mubr.f32.gmra.mrb[12].mxu0 %v34_v26 }
  0x4d   :  { %430 = vmatprep.mubr.f32.mxu0 %v43_v28 }
  0x4e   :  { %511 = vmatmul.mubr.f32.gmra.mrb[12].mxu1 %v36_v27 }
  0x4f   :  { %515 = vmatprep.mubr.f32.mxu1 %v45_v29 }
  0x50   :  { %431 = vmatmul.mubr.f32.gmra.mrb[14].mxu0 %v42_v30 }
  0x52   :  { %516 = vmatmul.mubr.f32.gmra.mrb[14].mxu1 %v44_v31 }
  0xf7   :  { %v566_v32 = vpop.f32.mrb[0].mxu0 }
  0xf8   :  { %v567_v34 = vpop.f32.mrb[1].mxu0 }
  0xf9   :  { %v610_v35 = vpop.f32.mrb[0].mxu1  ;;  %v568_v36 = vadd.f32 %v567_v34, %v566_v32 }
  0xfa   :  { %v611_v37 = vpop.f32.mrb[1].mxu1 }
  0xfb   :  { %v612_v38 = vadd.f32 %v611_v37, %v610_v35  ;;  %v248_v39 = vadd.f32 %v568_v36, %v533_v33  ;;  %v569_v40 = vpop.f32.mrb[2].mxu0 }
  0xfc   :  { %v570_v41 = vpop.f32.mrb[3].mxu0 }
  0xfd   :  { %v613_v42 = vpop.f32.mrb[2].mxu1  ;;  %v333_v43 = vadd.f32 %v612_v38, %v248_v39  ;;  %v571_v44 = vadd.f32 %v570_v41, %v569_v40 }
  0xfe   :  { %v614_v45 = vpop.f32.mrb[3].mxu1 }
  0xff   :  { %v615_v46 = vadd.f32 %v614_v45, %v613_v42  ;;  %v253_v47 = vadd.f32 %v571_v44, %v533_v33  ;;  %v572_v48 = vpop.f32.mrb[4].mxu0 }
 0x100   :  { %v573_v49 = vpop.f32.mrb[5].mxu0 }
 0x101   :  { %v616_v50 = vpop.f32.mrb[4].mxu1  ;;  %v338_v51 = vadd.f32 %v615_v46, %v253_v47  ;;  %v574_v52 = vadd.f32 %v573_v49, %v572_v48 }
 0x102   :  { %v617_v53 = vpop.f32.mrb[5].mxu1 }
 0x103   :  { %v618_v54 = vadd.f32 %v617_v53, %v616_v50  ;;  %v258_v55 = vadd.f32 %v574_v52, %v533_v33  ;;  %v575_v56 = vpop.f32.mrb[6].mxu0 }
 0x104   :  { %v576_v57 = vpop.f32.mrb[7].mxu0 }
 0x105   :  { %v619_v58 = vpop.f32.mrb[6].mxu1  ;;  %v343_v59 = vadd.f32 %v618_v54, %v258_v55  ;;  %v577_v60 = vadd.f32 %v576_v57, %v575_v56 }
 0x106   :  { %v620_v61 = vpop.f32.mrb[7].mxu1 }
 0x107   :  { %v621_v62 = vadd.f32 %v620_v61, %v619_v58  ;;  %v263_v63 = vadd.f32 %v577_v60, %v533_v33 }
 0x109   :  { %v348_v0 = vadd.f32 %v621_v62, %v263_v63 }
 0x117   :  { %v654_v1 = vpop.f32.mrb[8].mxu0 }
 0x118   :  { %v655_v2 = vpop.f32.mrb[9].mxu0 }
 0x119   :  { %v698_v3 = vpop.f32.mrb[8].mxu1  ;;  %v656_v4 = vadd.f32 %v655_v2, %v654_v1 }
 0x11a   :  { %v699_v5 = vpop.f32.mrb[9].mxu1 }
 0x11b   :  { %v700_v6 = vadd.f32 %v699_v5, %v698_v3  ;;  %v418_v7 = vadd.f32 %v656_v4, %v333_v43  ;;  %v657_v8 = vpop.f32.mrb[10].mxu0 }
 0x11c   :  { %v658_v9 = vpop.f32.mrb[11].mxu0 }
 0x11d   :  { %v701_v10 = vpop.f32.mrb[10].mxu1  ;;  %v503_v11 = vadd.f32 %v700_v6, %v418_v7  ;;  %v659_v12 = vadd.f32 %v658_v9, %v657_v8 }
 0x11e   :  { %v702_v13 = vpop.f32.mrb[11].mxu1 }
 0x11f   :  { %v703_v14 = vadd.f32 %v702_v13, %v701_v10  ;;  %v521_v15 = vmax.f32 %v503_v11, 0.0  ;;  %v423_v16 = vadd.f32 %v659_v12, %v338_v51  ;;  %v660_v17 = vpop.f32.mrb[12].mxu0 }
 0x120   :  { %v661_v18 = vpop.f32.mrb[13].mxu0 }
 0x121   :  { %v704_v19 = vpop.f32.mrb[12].mxu1  ;;  %525 = vst [vmem:[%s1356_s3] sm:$0xff] %v521_v15  ;;  %v508_v20 = vadd.f32 %v703_v14, %v423_v16  ;;  %v662_v21 = vadd.f32 %v661_v18, %v660_v17 }
 0x122   :  { %v705_v22 = vpop.f32.mrb[13].mxu1 }
 0x123   :  { %v706_v23 = vadd.f32 %v705_v22, %v704_v19  ;;  %v522_v24 = vmax.f32 %v508_v20, 0.0  ;;  %v428_v25 = vadd.f32 %v662_v21, %v343_v59  ;;  %v663_v26 = vpop.f32.mrb[14].mxu0 }
 0x124   :  { %v664_v27 = vpop.f32.mrb[15].mxu0 }
 0x125   :  { %v707_v28 = vpop.f32.mrb[14].mxu1  ;;  %526 = vst [vmem:[%s1356_s3 + $0x8] sm:$0xff] %v522_v24  ;;  %v513_v29 = vadd.f32 %v706_v23, %v428_v25  ;;  %v665_v30 = vadd.f32 %v664_v27, %v663_v26 }
 0x126   :  { %v708_v31 = vpop.f32.mrb[15].mxu1 }
 0x127   :  { %v709_v32 = vadd.f32 %v708_v31, %v707_v28  ;;  %v523_v33 = vmax.f32 %v513_v29, 0.0  ;;  %v433_v34 = vadd.f32 %v665_v30, %v348_v0 }
 0x129   :  { %527 = vst [vmem:[%s1356_s3 + $0x10] sm:$0xff] %v523_v33  ;;  %v518_v35 = vadd.f32 %v709_v32, %v433_v34 }
 0x12b   :  { %v524_v36 = vmax.f32 %v518_v35, 0.0 }
 0x12d   :  { %528 = vst [vmem:[%s1356_s3 + $0x18] sm:$0xff] %v524_v36 }

// kernel: celeba_encoder_forward.9
= control target key start
LH: loop header
LB: loop body
LE: loop exit
PB: predicated region body
PF: predicated region fallthrough
CT: control target
= control target key end

     0   :  { %14 = vsyncpa [#allocation3], 0  ;;  %v1842_v47 = vmov 1983009808   ;;  %v305_v49 = vlaneseq  ;;  %s2794_s0 = inlined_call_operand.vmem [shape: f32[2,2048], index: 0, kind: input, shape index: {}]   ;;  %s2795_s1 = inlined_call_operand.vmem [shape: f32[2048,64], index: 1, kind: input, shape index: {}]   ;;  %s2796_s2 = inlined_call_operand.vmem [shape: f32[1,64], index: 2, kind: input, shape index: {}]   ;;  %s2797_s3 = inlined_call_operand.vmem [shape: f32[64,128], index: 3, kind: input, shape index: {}]   ;;  %s2798_s4 = inlined_call_operand.vmem [shape: f32[1,128], index: 4, kind: input, shape index: {}]   ;;  %s2799_s5 = inlined_call_operand.vmem [shape: f32[64,128], index: 5, kind: input, shape index: {}]   ;;  %s2800_s6 = inlined_call_operand.vmem [shape: f32[1,128], index: 6, kind: input, shape index: {}]   ;;  %s2801_s7 = inlined_call_operand.hbm [shape: f32[2,128], index: 7, kind: output, shape index: {0}]   ;;  %s2802_s8 = inlined_call_operand.hbm [shape: f32[2,128], index: 8, kind: output, shape index: {1}]  }
   0x1   :  { %v50_v0 = vld [vmem:[%s2795_s1 + $0x80] sm:$0xff]  ;;  %v51_v1 = vld [vmem:[%s2795_s1 + $0x88] sm:$0xff]  ;;  %v52_v11 = vld [vmem:[%s2795_s1 + $0x90] sm:$0xff]  ;;  %v303_v48 = vunpack.c.l.s4 %v1842_v47 }
   0x2   :  { %v34_v2 = vld [vmem:[%s2795_s1] sm:$0xff]  ;;  %v1500_v3 = vpack.c.bf16 %v51_v1, %v50_v0  ;;  %v35_v4 = vld [vmem:[%s2795_s1 + $0x8] sm:$0xff]  ;;  %v53_v13 = vld [vmem:[%s2795_s1 + $0x98] sm:$0xff]  ;;  %v306_v0 = vshrl.u32 %v305_v49, 7 }
   0x3   :  { %v82_v5 = vld [vmem:[%s2795_s1 + $0x180] sm:$0xff]  ;;  %v83_v6 = vld [vmem:[%s2795_s1 + $0x188] sm:$0xff]  ;;  %v1502_v7 = vpack.c.bf16 %v35_v4, %v34_v2  ;;  %v36_v14 = vld [vmem:[%s2795_s1 + $0x10] sm:$0xff]  ;;  %v1504_v16 = vpack.c.bf16 %v53_v13, %v52_v11  ;;  %v304_v63 = vunpack.c.0.s8 %v303_v48 }
   0x4   :  { %v1532_v8 = vpack.c.bf16 %v83_v6, %v82_v5  ;;  %v66_v9 = vld [vmem:[%s2795_s1 + $0x100] sm:$0xff]  ;;  %v67_v10 = vld [vmem:[%s2795_s1 + $0x108] sm:$0xff]  ;;  %1501 = vmatprep.subr.bf16.mxu0 %v1500_v3  ;;  %v37_v15 = vld [vmem:[%s2795_s1 + $0x18] sm:$0xff] }
   0x5   :  { %v1534_v12 = vpack.c.bf16 %v67_v10, %v66_v9  ;;  %1503 = vmatpush3.bf16.msra.mxu0 %v1502_v7  ;;  %v1506_v17 = vpack.c.bf16 %v37_v15, %v36_v14  ;;  %v84_v18 = vld [vmem:[%s2795_s1 + $0x190] sm:$0xff]  ;;  %v85_v19 = vld [vmem:[%s2795_s1 + $0x198] sm:$0xff]  ;;  %v54_v23 = vld [vmem:[%s2795_s1 + $0xa0] sm:$0xff]  ;;  %v2043_v13 = vsub.s32 %v304_v63, %v306_v0 }
   0x6   :  { %1533 = vmatprep.subr.bf16.mxu1 %v1532_v8  ;;  %v68_v20 = vld [vmem:[%s2795_s1 + $0x110] sm:$0xff]  ;;  %v1536_v21 = vpack.c.bf16 %v85_v19, %v84_v18  ;;  %v69_v22 = vld [vmem:[%s2795_s1 + $0x118] sm:$0xff]  ;;  %v55_v24 = vld [vmem:[%s2795_s1 + $0xa8] sm:$0xff]  ;;  %1505 = vmatprep.subr.bf16.mxu0 %v1504_v16 }
   0x7   :  { %1535 = vmatpush3.bf16.msra.mxu1 %v1534_v12  ;;  %v1538_v25 = vpack.c.bf16 %v69_v22, %v68_v20  ;;  %v1508_v26 = vpack.c.bf16 %v55_v24, %v54_v23  ;;  %v38_v27 = vld [vmem:[%s2795_s1 + $0x20] sm:$0xff]  ;;  %v39_v28 = vld [vmem:[%s2795_s1 + $0x28] sm:$0xff]  ;;  %v56_v35 = vld [vmem:[%s2795_s1 + $0xb0] sm:$0xff] }
   0x8   :  { %v86_v29 = vld [vmem:[%s2795_s1 + $0x1a0] sm:$0xff]  ;;  %1537 = vmatprep.subr.bf16.mxu1 %v1536_v21  ;;  %v87_v30 = vld [vmem:[%s2795_s1 + $0x1a8] sm:$0xff]  ;;  %v1510_v33 = vpack.c.bf16 %v39_v28, %v38_v27  ;;  %v57_v36 = vld [vmem:[%s2795_s1 + $0xb8] sm:$0xff] }
   0x9   :  { %v70_v31 = vld [vmem:[%s2795_s1 + $0x120] sm:$0xff]  ;;  %v71_v32 = vld [vmem:[%s2795_s1 + $0x128] sm:$0xff]  ;;  %1507 = vmatpush3.bf16.msra.mxu0 %v1506_v17  ;;  %v1540_v34 = vpack.c.bf16 %v87_v30, %v86_v29  ;;  %v40_v37 = vld [vmem:[%s2795_s1 + $0x30] sm:$0xff]  ;;  %v1512_v39 = vpack.c.bf16 %v57_v36, %v56_v35 }
   0xa   :  { %1509 = vmatprep.subr.bf16.mxu0 %v1508_v26  ;;  %v1542_v38 = vpack.c.bf16 %v71_v32, %v70_v31  ;;  %v41_v40 = vld [vmem:[%s2795_s1 + $0x38] sm:$0xff]  ;;  %v88_v41 = vld [vmem:[%s2795_s1 + $0x1b0] sm:$0xff]  ;;  %v58_v46 = vld [vmem:[%s2795_s1 + $0xc0] sm:$0xff] }
   0xb   :  { %1539 = vmatpush3.bf16.msra.mxu1 %v1538_v25  ;;  %v89_v42 = vld [vmem:[%s2795_s1 + $0x1b8] sm:$0xff]  ;;  %v72_v44 = vld [vmem:[%s2795_s1 + $0x130] sm:$0xff]  ;;  %v59_v50 = vld [vmem:[%s2795_s1 + $0xc8] sm:$0xff]  ;;  %v1514_v51 = vpack.c.bf16 %v41_v40, %v40_v37 }
   0xc   :  { %1541 = vmatprep.subr.bf16.mxu1 %v1540_v34  ;;  %v1544_v43 = vpack.c.bf16 %v89_v42, %v88_v41  ;;  %v73_v45 = vld [vmem:[%s2795_s1 + $0x138] sm:$0xff]  ;;  %v90_v52 = vld [vmem:[%s2795_s1 + $0x1c0] sm:$0xff]  ;;  %v91_v53 = vld [vmem:[%s2795_s1 + $0x1c8] sm:$0xff]  ;;  %v1516_v55 = vpack.c.bf16 %v59_v50, %v58_v46 }
   0xd   :  { %1511 = vmatpush3.bf16.msra.mxu0 %v1510_v33  ;;  %v1546_v54 = vpack.c.bf16 %v73_v45, %v72_v44  ;;  %v42_v56 = vld [vmem:[%s2795_s1 + $0x40] sm:$0xff]  ;;  %v43_v57 = vld [vmem:[%s2795_s1 + $0x48] sm:$0xff]  ;;  %v1548_v59 = vpack.c.bf16 %v91_v53, %v90_v52  ;;  %v60_v61 = vld [vmem:[%s2795_s1 + $0xd0] sm:$0xff] }
   0xe   :  { %1513 = vmatprep.subr.bf16.mxu0 %v1512_v39  ;;  %v74_v58 = vld [vmem:[%s2795_s1 + $0x140] sm:$0xff]  ;;  %v75_v60 = vld [vmem:[%s2795_s1 + $0x148] sm:$0xff]  ;;  %v61_v62 = vld [vmem:[%s2795_s1 + $0xd8] sm:$0xff]  ;;  %v1518_v3 = vpack.c.bf16 %v43_v57, %v42_v56 }
   0xf   :  { %1543 = vmatpush3.bf16.msra.mxu1 %v1542_v38  ;;  %v92_v1 = vld [vmem:[%s2795_s1 + $0x1d0] sm:$0xff]  ;;  %v93_v2 = vld [vmem:[%s2795_s1 + $0x1d8] sm:$0xff]  ;;  %v1550_v4 = vpack.c.bf16 %v75_v60, %v74_v58  ;;  %v1520_v5 = vpack.c.bf16 %v61_v62, %v60_v61  ;;  %v62_v11 = vld [vmem:[%s2795_s1 + $0xe0] sm:$0xff] }
  0x10   :  { %1545 = vmatprep.subr.bf16.mxu1 %v1544_v43  ;;  %v44_v6 = vld [vmem:[%s2795_s1 + $0x50] sm:$0xff]  ;;  %v45_v7 = vld [vmem:[%s2795_s1 + $0x58] sm:$0xff]  ;;  %v1552_v9 = vpack.c.bf16 %v93_v2, %v92_v1  ;;  %v63_v12 = vld [vmem:[%s2795_s1 + $0xe8] sm:$0xff] }
  0x11   :  { %1515 = vmatpush3.bf16.msra.mxu0 %v1514_v51  ;;  %v76_v8 = vld [vmem:[%s2795_s1 + $0x150] sm:$0xff]  ;;  %v77_v10 = vld [vmem:[%s2795_s1 + $0x158] sm:$0xff]  ;;  %v94_v14 = vld [vmem:[%s2795_s1 + $0x1e0] sm:$0xff]  ;;  %v1522_v16 = vpack.c.bf16 %v45_v7, %v44_v6  ;;  %v1524_v19 = vpack.c.bf16 %v63_v12, %v62_v11 }
  0x12   :  { %1517 = vmatprep.subr.bf16.mxu0 %v1516_v55  ;;  %v95_v15 = vld [vmem:[%s2795_s1 + $0x1e8] sm:$0xff]  ;;  %v46_v17 = vld [vmem:[%s2795_s1 + $0x60] sm:$0xff]  ;;  %v1554_v18 = vpack.c.bf16 %v77_v10, %v76_v8  ;;  %v64_v25 = vld [vmem:[%s2795_s1 + $0xf0] sm:$0xff] }
  0x13   :  { %1547 = vmatpush3.bf16.msra.mxu1 %v1546_v54  ;;  %v47_v20 = vld [vmem:[%s2795_s1 + $0x68] sm:$0xff]  ;;  %v78_v21 = vld [vmem:[%s2795_s1 + $0x160] sm:$0xff]  ;;  %v1556_v23 = vpack.c.bf16 %v95_v15, %v94_v14  ;;  %v65_v26 = vld [vmem:[%s2795_s1 + $0xf8] sm:$0xff] }
  0x14   :  { %1549 = vmatprep.subr.bf16.mxu1 %v1548_v59  ;;  %v30_v22 = vld [vmem:[%s2794_s0] sm:$0xff]  ;;  %v79_v24 = vld [vmem:[%s2795_s1 + $0x168] sm:$0xff]  ;;  %v96_v29 = vld [vmem:[%s2795_s1 + $0x1f0] sm:$0xff]  ;;  %v1526_v31 = vpack.c.bf16 %v47_v20, %v46_v17  ;;  %v1528_v35 = vpack.c.bf16 %v65_v26, %v64_v25 }
  0x15   :  { %1519 = vmatpush3.bf16.msra.mxu0 %v1518_v3  ;;  %v308_v27 = vrot.slane %v30_v22, %v2043_v13  ;;  %v301_v28 = vcombine.high %v30_v22, %v30_v22  ;;  %v97_v30 = vld [vmem:[%s2795_s1 + $0x1f8] sm:$0xff]  ;;  %v1558_v34 = vpack.c.bf16 %v79_v24, %v78_v21  ;;  %v48_v36 = vld [vmem:[%s2795_s1 + $0x70] sm:$0xff]  ;;  %v114_v41 = vld [vmem:[%s2795_s1 + $0x280] sm:$0xff] }
  0x16   :  { %1521 = vmatprep.subr.bf16.mxu0 %v1520_v5  ;;  %v49_v37 = vld [vmem:[%s2795_s1 + $0x78] sm:$0xff]  ;;  %v80_v38 = vld [vmem:[%s2795_s1 + $0x170] sm:$0xff]  ;;  %v1560_v39 = vpack.c.bf16 %v97_v30, %v96_v29  ;;  %v115_v42 = vld [vmem:[%s2795_s1 + $0x288] sm:$0xff] }
  0x17   :  { %1551 = vmatpush3.bf16.msra.mxu1 %v1550_v4  ;;  %v316_v32 = vcombine.high %v308_v27, %v308_v27  ;;  %v315_v33 = vrot.slane %v301_v28, %v2043_v13  ;;  %v81_v40 = vld [vmem:[%s2795_s1 + $0x178] sm:$0xff]  ;;  %v146_v44 = vld [vmem:[%s2795_s1 + $0x380] sm:$0xff]  ;;  %v147_v45 = vld [vmem:[%s2795_s1 + $0x388] sm:$0xff]  ;;  %v1530_v46 = vpack.c.bf16 %v49_v37, %v48_v36  ;;  %v1564_v48 = vpack.c.bf16 %v115_v42, %v114_v41 }
  0x18   :  { %1553 = vmatprep.subr.bf16.mxu1 %v1552_v9  ;;  %v1562_v47 = vpack.c.bf16 %v81_v40, %v80_v38  ;;  %v98_v49 = vld [vmem:[%s2795_s1 + $0x200] sm:$0xff]  ;;  %v99_v50 = vld [vmem:[%s2795_s1 + $0x208] sm:$0xff]  ;;  %v1596_v52 = vpack.c.bf16 %v147_v45, %v146_v44  ;;  %v116_v54 = vld [vmem:[%s2795_s1 + $0x290] sm:$0xff] }
  0x19   :  { %1523 = vmatpush3.bf16.msra.mxu0 %v1522_v16  ;;  %449 = vmatprep.mubr.f32.mxu0 %v316_v32  ;;  %v317_v43 = vcombine.high %v315_v33, %v315_v33  ;;  %v130_v51 = vld [vmem:[%s2795_s1 + $0x300] sm:$0xff]  ;;  %v131_v53 = vld [vmem:[%s2795_s1 + $0x308] sm:$0xff]  ;;  %v117_v55 = vld [vmem:[%s2795_s1 + $0x298] sm:$0xff]  ;;  %v1566_v58 = vpack.c.bf16 %v99_v50, %v98_v49 }
  0x1a   :  { %1525 = vmatprep.subr.bf16.mxu0 %v1524_v19  ;;  %v148_v56 = vld [vmem:[%s2795_s1 + $0x390] sm:$0xff]  ;;  %v149_v57 = vld [vmem:[%s2795_s1 + $0x398] sm:$0xff]  ;;  %v1598_v59 = vpack.c.bf16 %v131_v53, %v130_v51  ;;  %v1568_v60 = vpack.c.bf16 %v117_v55, %v116_v54  ;;  %v118_v2 = vld [vmem:[%s2795_s1 + $0x2a0] sm:$0xff] }
  0x1b   :  { %1555 = vmatpush3.bf16.msra.mxu1 %v1554_v18  ;;  %519 = vmatprep.mubr.f32.mxu1 %v317_v43  ;;  %v100_v61 = vld [vmem:[%s2795_s1 + $0x210] sm:$0xff]  ;;  %v101_v62 = vld [vmem:[%s2795_s1 + $0x218] sm:$0xff]  ;;  %v1600_v0 = vpack.c.bf16 %v149_v57, %v148_v56  ;;  %v119_v3 = vld [vmem:[%s2795_s1 + $0x2a8] sm:$0xff] }
  0x1c   :  { %1557 = vmatprep.subr.bf16.mxu1 %v1556_v23  ;;  %v132_v63 = vld [vmem:[%s2795_s1 + $0x310] sm:$0xff]  ;;  %v133_v1 = vld [vmem:[%s2795_s1 + $0x318] sm:$0xff]  ;;  %v150_v4 = vld [vmem:[%s2795_s1 + $0x3a0] sm:$0xff]  ;;  %v1570_v6 = vpack.c.bf16 %v101_v62, %v100_v61  ;;  %v1572_v8 = vpack.c.bf16 %v119_v3, %v118_v2 }
  0x1d   :  { %1527 = vmatpush3.bf16.msra.mxu0 %v1526_v31  ;;  %v151_v5 = vld [vmem:[%s2795_s1 + $0x3a8] sm:$0xff]  ;;  %v1602_v7 = vpack.c.bf16 %v133_v1, %v132_v63  ;;  %v102_v9 = vld [vmem:[%s2795_s1 + $0x220] sm:$0xff]  ;;  %v120_v15 = vld [vmem:[%s2795_s1 + $0x2b0] sm:$0xff] }
  0x1e   :  { %1529 = vmatprep.subr.bf16.mxu0 %v1528_v35  ;;  %v103_v10 = vld [vmem:[%s2795_s1 + $0x228] sm:$0xff]  ;;  %v134_v11 = vld [vmem:[%s2795_s1 + $0x320] sm:$0xff]  ;;  %v1604_v12 = vpack.c.bf16 %v151_v5, %v150_v4  ;;  %v121_v16 = vld [vmem:[%s2795_s1 + $0x2b8] sm:$0xff] }
  0x1f   :  { %1559 = vmatpush3.bf16.msra.mxu1 %v1558_v34  ;;  %v135_v14 = vld [vmem:[%s2795_s1 + $0x328] sm:$0xff]  ;;  %v152_v17 = vld [vmem:[%s2795_s1 + $0x3b0] sm:$0xff]  ;;  %v153_v18 = vld [vmem:[%s2795_s1 + $0x3b8] sm:$0xff]  ;;  %v1574_v19 = vpack.c.bf16 %v103_v10, %v102_v9  ;;  %v1576_v21 = vpack.c.bf16 %v121_v16, %v120_v15 }
  0x20   :  { %1561 = vmatprep.subr.bf16.mxu1 %v1560_v39  ;;  %v1606_v20 = vpack.c.bf16 %v135_v14, %v134_v11  ;;  %v104_v22 = vld [vmem:[%s2795_s1 + $0x230] sm:$0xff]  ;;  %v105_v23 = vld [vmem:[%s2795_s1 + $0x238] sm:$0xff]  ;;  %v1608_v25 = vpack.c.bf16 %v153_v18, %v152_v17  ;;  %v123_v28 = vld [vmem:[%s2795_s1 + $0x2c8] sm:$0xff] }
  0x21   :  { %1531 = vmatpush3.bf16.msra.mxu0 %v1530_v46  ;;  %v136_v24 = vld [vmem:[%s2795_s1 + $0x330] sm:$0xff]  ;;  %v137_v26 = vld [vmem:[%s2795_s1 + $0x338] sm:$0xff]  ;;  %v154_v29 = vld [vmem:[%s2795_s1 + $0x3c0] sm:$0xff]  ;;  %v1578_v32 = vpack.c.bf16 %v105_v23, %v104_v22 }
  0x22   :  { %1565 = vmatprep.subr.bf16.mxu0 %v1564_v48  ;;  %v155_v30 = vld [vmem:[%s2795_s1 + $0x3c8] sm:$0xff]  ;;  %v1610_v35 = vpack.c.bf16 %v137_v26, %v136_v24  ;;  %v106_v37 = vld [vmem:[%s2795_s1 + $0x240] sm:$0xff]  ;;  %v124_v42 = vld [vmem:[%s2795_s1 + $0x2d0] sm:$0xff] }
  0x23   :  { %1563 = vmatpush3.bf16.msra.mxu1 %v1562_v47  ;;  %v31_v31 = vld [vmem:[%s2794_s0 + $0x8] sm:$0xff]  ;;  %v138_v39 = vld [vmem:[%s2795_s1 + $0x340] sm:$0xff]  ;;  %v1612_v40 = vpack.c.bf16 %v155_v30, %v154_v29  ;;  %v125_v43 = vld [vmem:[%s2795_s1 + $0x2d8] sm:$0xff] }
  0x24   :  { %1597 = vmatprep.subr.bf16.mxu1 %v1596_v52  ;;  %450 = vmatmul.mubr.f32.vlgmr.msra.gmra.mrb[0].mxu0 %v308_v27  ;;  %v122_v27 = vld [vmem:[%s2795_s1 + $0x2c0] sm:$0xff]  ;;  %v318_v34 = vcombine.high %v31_v31, %v31_v31  ;;  %v107_v38 = vld [vmem:[%s2795_s1 + $0x248] sm:$0xff]  ;;  %v156_v46 = vld [vmem:[%s2795_s1 + $0x3d0] sm:$0xff]  ;;  %v1584_v51 = vpack.c.bf16 %v125_v43, %v124_v42 }
  0x25   :  { %1567 = vmatpush3.bf16.msra.mxu0 %v1566_v58  ;;  %v1580_v36 = vpack.c.bf16 %v123_v28, %v122_v27  ;;  %v139_v41 = vld [vmem:[%s2795_s1 + $0x348] sm:$0xff]  ;;  %v157_v47 = vld [vmem:[%s2795_s1 + $0x3d8] sm:$0xff]  ;;  %v1582_v48 = vpack.c.bf16 %v107_v38, %v106_v37  ;;  %v108_v52 = vld [vmem:[%s2795_s1 + $0x250] sm:$0xff] }
  0x26   :  { %520 = vmatmul.mubr.f32.vlgmr.msra.gmra.mrb[0].mxu1 %v315_v33  ;;  %1569 = vmatprep.subr.bf16.mxu0 %v1568_v60  ;;  %v2204_v33 = vrot.slane %v31_v31, %v2043_v13  ;;  %v2227_v45 = vrot.slane %v318_v34, %v2043_v13  ;;  %v1614_v50 = vpack.c.bf16 %v139_v41, %v138_v39  ;;  %v109_v53 = vld [vmem:[%s2795_s1 + $0x258] sm:$0xff]  ;;  %v140_v54 = vld [vmem:[%s2795_s1 + $0x350] sm:$0xff]  ;;  %v126_v57 = vld [vmem:[%s2795_s1 + $0x2e0] sm:$0xff] }
  0x27   :  { %1599 = vmatpush3.bf16.msra.mxu1 %v1598_v59  ;;  %v1616_v55 = vpack.c.bf16 %v157_v47, %v156_v46  ;;  %v141_v56 = vld [vmem:[%s2795_s1 + $0x358] sm:$0xff]  ;;  %v127_v58 = vld [vmem:[%s2795_s1 + $0x2e8] sm:$0xff]  ;;  %v158_v59 = vld [vmem:[%s2795_s1 + $0x3e0] sm:$0xff]  ;;  %v1586_v61 = vpack.c.bf16 %v109_v53, %v108_v52 }
  0x28   :  { %1601 = vmatprep.subr.bf16.mxu1 %v1600_v0  ;;  %v333_v44 = vcombine.high %v2204_v33, %v2204_v33  ;;  %v334_v49 = vcombine.high %v2227_v45, %v2227_v45  ;;  %v159_v60 = vld [vmem:[%s2795_s1 + $0x3e8] sm:$0xff]  ;;  %v1618_v62 = vpack.c.bf16 %v141_v56, %v140_v54  ;;  %v1588_v63 = vpack.c.bf16 %v127_v58, %v126_v57  ;;  %v110_v0 = vld [vmem:[%s2795_s1 + $0x260] sm:$0xff]  ;;  %v128_v5 = vld [vmem:[%s2795_s1 + $0x2f0] sm:$0xff] }
  0x29   :  { %1571 = vmatpush3.bf16.msra.mxu0 %v1570_v6  ;;  %v111_v1 = vld [vmem:[%s2795_s1 + $0x268] sm:$0xff]  ;;  %v142_v2 = vld [vmem:[%s2795_s1 + $0x360] sm:$0xff]  ;;  %v1620_v3 = vpack.c.bf16 %v159_v60, %v158_v59  ;;  %v129_v6 = vld [vmem:[%s2795_s1 + $0x2f8] sm:$0xff] }
  0x2a   :  { %1573 = vmatprep.subr.bf16.mxu0 %v1572_v8  ;;  %589 = vmatprep.mubr.f32.mxu0 %v333_v44  ;;  %v143_v4 = vld [vmem:[%s2795_s1 + $0x368] sm:$0xff]  ;;  %v161_v8 = vld [vmem:[%s2795_s1 + $0x3f8] sm:$0xff]  ;;  %v1590_v9 = vpack.c.bf16 %v111_v1, %v110_v0  ;;  %v1592_v11 = vpack.c.bf16 %v129_v6, %v128_v5  ;;  %v144_v15 = vld [vmem:[%s2795_s1 + $0x370] sm:$0xff] }
  0x2b   :  { %1603 = vmatpush3.bf16.msra.mxu1 %v1602_v7  ;;  %659 = vmatprep.mubr.f32.mxu1 %v334_v49  ;;  %v160_v7 = vld [vmem:[%s2795_s1 + $0x3f0] sm:$0xff]  ;;  %v1622_v10 = vpack.c.bf16 %v143_v4, %v142_v2  ;;  %v113_v14 = vld [vmem:[%s2795_s1 + $0x278] sm:$0xff]  ;;  %v178_v18 = vld [vmem:[%s2795_s1 + $0x480] sm:$0xff] }
  0x2c   :  { %1605 = vmatprep.subr.bf16.mxu1 %v1604_v12  ;;  %v112_v12 = vld [vmem:[%s2795_s1 + $0x270] sm:$0xff]  ;;  %v1624_v16 = vpack.c.bf16 %v161_v8, %v160_v7  ;;  %v145_v17 = vld [vmem:[%s2795_s1 + $0x378] sm:$0xff]  ;;  %v162_v23 = vld [vmem:[%s2795_s1 + $0x400] sm:$0xff] }
  0x2d   :  { %1575 = vmatpush3.bf16.msra.mxu0 %v1574_v19  ;;  %v179_v19 = vld [vmem:[%s2795_s1 + $0x488] sm:$0xff]  ;;  %v1594_v22 = vpack.c.bf16 %v113_v14, %v112_v12  ;;  %v1626_v24 = vpack.c.bf16 %v145_v17, %v144_v15  ;;  %v194_v27 = vld [vmem:[%s2795_s1 + $0x500] sm:$0xff]  ;;  %v180_v30 = vld [vmem:[%s2795_s1 + $0x490] sm:$0xff] }
  0x2e   :  { %1577 = vmatprep.subr.bf16.mxu0 %v1576_v21  ;;  %v211_v21 = vld [vmem:[%s2795_s1 + $0x588] sm:$0xff]  ;;  %v181_v31 = vld [vmem:[%s2795_s1 + $0x498] sm:$0xff]  ;;  %v32_v37 = vld [vmem:[%s2794_s0 + $0x10] sm:$0xff] }
  0x2f   :  { %1607 = vmatpush3.bf16.msra.mxu1 %v1606_v20  ;;  %v210_v20 = vld [vmem:[%s2795_s1 + $0x580] sm:$0xff]  ;;  %v163_v26 = vld [vmem:[%s2795_s1 + $0x408] sm:$0xff]  ;;  %v213_v34 = vld [vmem:[%s2795_s1 + $0x598] sm:$0xff]  ;;  %v1632_v38 = vpack.c.bf16 %v181_v31, %v180_v30  ;;  %v2346_v42 = vrot.slane %v32_v37, %v2043_v13  ;;  %v335_v43 = vcombine.high %v32_v37, %v32_v37 }
  0x30   :  { %1609 = vmatprep.subr.bf16.mxu1 %v1608_v25  ;;  %v1628_v25 = vpack.c.bf16 %v179_v19, %v178_v18  ;;  %v195_v28 = vld [vmem:[%s2795_s1 + $0x508] sm:$0xff]  ;;  %v1660_v29 = vpack.c.bf16 %v211_v21, %v210_v20  ;;  %v164_v39 = vld [vmem:[%s2795_s1 + $0x410] sm:$0xff]  ;;  %v197_v46 = vld [vmem:[%s2795_s1 + $0x518] sm:$0xff] }
  0x31   :  { %1579 = vmatpush3.bf16.msra.mxu0 %v1578_v32  ;;  %v212_v32 = vld [vmem:[%s2795_s1 + $0x590] sm:$0xff]  ;;  %v182_v47 = vld [vmem:[%s2795_s1 + $0x4a0] sm:$0xff]  ;;  %v2367_v52 = vrot.slane %v335_v43, %v2043_v13  ;;  %v167_v56 = vld [vmem:[%s2795_s1 + $0x428] sm:$0xff] }
  0x32   :  { %1581 = vmatprep.subr.bf16.mxu0 %v1580_v36  ;;  %v1662_v36 = vpack.c.bf16 %v195_v28, %v194_v27  ;;  %v196_v41 = vld [vmem:[%s2795_s1 + $0x510] sm:$0xff]  ;;  %v1664_v44 = vpack.c.bf16 %v213_v34, %v212_v32  ;;  %v214_v49 = vld [vmem:[%s2795_s1 + $0x5a0] sm:$0xff]  ;;  %v199_v59 = vld [vmem:[%s2795_s1 + $0x528] sm:$0xff] }
  0x33   :  { %1611 = vmatpush3.bf16.msra.mxu1 %v1610_v35  ;;  %v1630_v35 = vpack.c.bf16 %v163_v26, %v162_v23  ;;  %v198_v57 = vld [vmem:[%s2795_s1 + $0x520] sm:$0xff]  ;;  %v184_v60 = vld [vmem:[%s2795_s1 + $0x4b0] sm:$0xff]  ;;  %v169_v4 = vld [vmem:[%s2795_s1 + $0x438] sm:$0xff] }
  0x34   :  { %1613 = vmatprep.subr.bf16.mxu1 %v1612_v40  ;;  %v165_v40 = vld [vmem:[%s2795_s1 + $0x418] sm:$0xff]  ;;  %v1670_v1 = vpack.c.bf16 %v199_v59, %v198_v57  ;;  %v200_v5 = vld [vmem:[%s2795_s1 + $0x530] sm:$0xff]  ;;  %v186_v8 = vld [vmem:[%s2795_s1 + $0x4c0] sm:$0xff] }
  0x35   :  { %1583 = vmatpush3.bf16.msra.mxu0 %v1582_v48  ;;  %v183_v48 = vld [vmem:[%s2795_s1 + $0x4a8] sm:$0xff]  ;;  %v1634_v53 = vpack.c.bf16 %v165_v40, %v164_v39  ;;  %v201_v7 = vld [vmem:[%s2795_s1 + $0x538] sm:$0xff]  ;;  %v202_v18 = vld [vmem:[%s2795_s1 + $0x540] sm:$0xff] }
  0x36   :  { %1585 = vmatprep.subr.bf16.mxu0 %v1584_v51  ;;  %v350_v51 = vcombine.high %v2346_v42, %v2346_v42  ;;  %v1636_v54 = vpack.c.bf16 %v183_v48, %v182_v47  ;;  %v1674_v14 = vpack.c.bf16 %v201_v7, %v200_v5  ;;  %v171_v17 = vld [vmem:[%s2795_s1 + $0x448] sm:$0xff]  ;;  %v188_v21 = vld [vmem:[%s2795_s1 + $0x4d0] sm:$0xff]  ;;  %v205_v32 = vld [vmem:[%s2795_s1 + $0x558] sm:$0xff] }
  0x37   :  { %1615 = vmatpush3.bf16.msra.mxu1 %v1614_v50  ;;  %v215_v50 = vld [vmem:[%s2795_s1 + $0x5a8] sm:$0xff]  ;;  %v220_v23 = vld [vmem:[%s2795_s1 + $0x5d0] sm:$0xff]  ;;  %v190_v34 = vld [vmem:[%s2795_s1 + $0x4e0] sm:$0xff] }
  0x38   :  { %1617 = vmatprep.subr.bf16.mxu1 %v1616_v55  ;;  %v166_v55 = vld [vmem:[%s2795_s1 + $0x420] sm:$0xff]  ;;  %v1668_v58 = vpack.c.bf16 %v215_v50, %v214_v49  ;;  %v203_v20 = vld [vmem:[%s2795_s1 + $0x548] sm:$0xff]  ;;  %v172_v28 = vld [vmem:[%s2795_s1 + $0x450] sm:$0xff] }
  0x39   :  { %1587 = vmatpush3.bf16.msra.mxu0 %v1586_v61  ;;  %v185_v61 = vld [vmem:[%s2795_s1 + $0x4b8] sm:$0xff]  ;;  %v1638_v0 = vpack.c.bf16 %v167_v56, %v166_v55  ;;  %v1678_v26 = vpack.c.bf16 %v203_v20, %v202_v18  ;;  %v204_v30 = vld [vmem:[%s2795_s1 + $0x550] sm:$0xff]  ;;  %v223_v37 = vld [vmem:[%s2795_s1 + $0x5e8] sm:$0xff] }
  0x3a   :  { %1589 = vmatprep.subr.bf16.mxu0 %v1588_v63  ;;  %v217_v63 = vld [vmem:[%s2795_s1 + $0x5b8] sm:$0xff]  ;;  %v1640_v2 = vpack.c.bf16 %v185_v61, %v184_v60  ;;  %v174_v39 = vld [vmem:[%s2795_s1 + $0x460] sm:$0xff]  ;;  %v1682_v40 = vpack.c.bf16 %v205_v32, %v204_v30  ;;  %v175_v43 = vld [vmem:[%s2795_s1 + $0x468] sm:$0xff] }
  0x3b   :  { %1619 = vmatpush3.bf16.msra.mxu1 %v1618_v62  ;;  %v216_v62 = vld [vmem:[%s2795_s1 + $0x5b0] sm:$0xff]  ;;  %v193_v49 = vld [vmem:[%s2795_s1 + $0x4f8] sm:$0xff] }
  0x3c   :  { %1621 = vmatprep.subr.bf16.mxu1 %v1620_v3  ;;  %v168_v3 = vld [vmem:[%s2795_s1 + $0x430] sm:$0xff]  ;;  %v1672_v6 = vpack.c.bf16 %v217_v63, %v216_v62 }
  0x3d   :  { %1591 = vmatpush3.bf16.msra.mxu0 %v1590_v9  ;;  %v187_v9 = vld [vmem:[%s2795_s1 + $0x4c8] sm:$0xff]  ;;  %v1642_v12 = vpack.c.bf16 %v169_v4, %v168_v3  ;;  %v192_v48 = vld [vmem:[%s2795_s1 + $0x4f0] sm:$0xff] }
  0x3e   :  { %1593 = vmatprep.subr.bf16.mxu0 %v1592_v11  ;;  %v219_v11 = vld [vmem:[%s2795_s1 + $0x5c8] sm:$0xff]  ;;  %v1644_v15 = vpack.c.bf16 %v187_v9, %v186_v8 }
  0x3f   :  { %1623 = vmatpush3.bf16.msra.mxu1 %v1622_v10  ;;  %v218_v10 = vld [vmem:[%s2795_s1 + $0x5c0] sm:$0xff] }
  0x40   :  { %1625 = vmatprep.subr.bf16.mxu1 %v1624_v16  ;;  %v170_v16 = vld [vmem:[%s2795_s1 + $0x440] sm:$0xff]  ;;  %v1676_v19 = vpack.c.bf16 %v219_v11, %v218_v10 }
  0x41   :  { %1595 = vmatpush3.bf16.msra.mxu0 %v1594_v22  ;;  %v189_v22 = vld [vmem:[%s2795_s1 + $0x4d8] sm:$0xff] }
  0x42   :  { %1629 = vmatprep.subr.bf16.mxu0 %v1628_v25  ;;  %v1646_v25 = vpack.c.bf16 %v171_v17, %v170_v16  ;;  %v1648_v27 = vpack.c.bf16 %v189_v22, %v188_v21 }
  0x43   :  { %1627 = vmatpush3.bf16.msra.mxu1 %v1626_v24  ;;  %v221_v24 = vld [vmem:[%s2795_s1 + $0x5d8] sm:$0xff] }
  0x44   :  { %1661 = vmatprep.subr.bf16.mxu1 %v1660_v29  ;;  %590 = vmatmul.mubr.f32.vlgmr.msra.gmra.mrb[2].mxu0 %v2204_v33  ;;  %v1666_v33 = vpack.c.bf16 %v197_v46, %v196_v41  ;;  %v173_v29 = vld [vmem:[%s2795_s1 + $0x458] sm:$0xff]  ;;  %v1680_v31 = vpack.c.bf16 %v221_v24, %v220_v23  ;;  %v207_v46 = vld [vmem:[%s2795_s1 + $0x568] sm:$0xff] }
  0x45   :  { %1631 = vmatpush3.bf16.msra.mxu0 %v1630_v35  ;;  %729 = vmatprep.mubr.f32.mxu0 %v350_v51  ;;  %v191_v35 = vld [vmem:[%s2795_s1 + $0x4e8] sm:$0xff] }
  0x46   :  { %660 = vmatmul.mubr.f32.vlgmr.msra.gmra.mrb[2].mxu1 %v2227_v45  ;;  %1633 = vmatprep.subr.bf16.mxu0 %v1632_v38  ;;  %v351_v45 = vcombine.high %v2367_v52, %v2367_v52  ;;  %v1650_v38 = vpack.c.bf16 %v173_v29, %v172_v28  ;;  %v1652_v41 = vpack.c.bf16 %v191_v35, %v190_v34 }
  0x47   :  { %1663 = vmatpush3.bf16.msra.mxu1 %v1662_v36  ;;  %v222_v36 = vld [vmem:[%s2795_s1 + $0x5e0] sm:$0xff] }
  0x48   :  { %1665 = vmatprep.subr.bf16.mxu1 %v1664_v44  ;;  %799 = vmatprep.mubr.f32.mxu1 %v351_v45  ;;  %v206_v44 = vld [vmem:[%s2795_s1 + $0x560] sm:$0xff]  ;;  %v1684_v47 = vpack.c.bf16 %v223_v37, %v222_v36 }
  0x49   :  { %1635 = vmatpush3.bf16.msra.mxu0 %v1634_v53 }
  0x4a   :  { %1637 = vmatprep.subr.bf16.mxu0 %v1636_v54 }
  0x4b   :  { %1667 = vmatpush3.bf16.msra.mxu1 %v1666_v33 }
  0x4c   :  { %1669 = vmatprep.subr.bf16.mxu1 %v1668_v58 }
  0x4d   :  { %1639 = vmatpush3.bf16.msra.mxu0 %v1638_v0 }
  0x4e   :  { %1641 = vmatprep.subr.bf16.mxu0 %v1640_v2 }
  0x4f   :  { %1671 = vmatpush3.bf16.msra.mxu1 %v1670_v1 }
  0x50   :  { %1673 = vmatprep.subr.bf16.mxu1 %v1672_v6 }
  0x51   :  { %1643 = vmatpush3.bf16.msra.mxu0 %v1642_v12 }
  0x52   :  { %1645 = vmatprep.subr.bf16.mxu0 %v1644_v15 }
  0x53   :  { %1675 = vmatpush3.bf16.msra.mxu1 %v1674_v14 }
  0x54   :  { %1677 = vmatprep.subr.bf16.mxu1 %v1676_v19 }
  0x55   :  { %1647 = vmatpush3.bf16.msra.mxu0 %v1646_v25 }
  0x56   :  { %1649 = vmatprep.subr.bf16.mxu0 %v1648_v27 }
  0x57   :  { %1679 = vmatpush3.bf16.msra.mxu1 %v1678_v26 }
  0x58   :  { %1681 = vmatprep.subr.bf16.mxu1 %v1680_v31 }
  0x59   :  { %15 = vsyncpa [#allocation5], 0  ;;  %v224_v50 = vld [vmem:[%s2795_s1 + $0x5f0] sm:$0xff]  ;;  %v225_v51 = vld [vmem:[%s2795_s1 + $0x5f8] sm:$0xff]  ;;  %1651 = vmatpush3.bf16.msra.mxu0 %v1650_v38  ;;  %v1654_v53 = vpack.c.bf16 %v175_v43, %v174_v39  ;;  %v1686_v54 = vpack.c.bf16 %v207_v46, %v206_v44  ;;  %v1656_v55 = vpack.c.bf16 %v193_v49, %v192_v48  ;;  %vm1844_vm0 = vmmov 0   ;;  %s1846_s22 = smov [#allocation2]  }
  0x5a   :  { %v33_v33 = vld [vmem:[%s2794_s0 + $0x18] sm:$0xff]  ;;  %1653 = vmatprep.subr.bf16.mxu0 %v1652_v41  ;;  %v176_v56 = vld [vmem:[%s2795_s1 + $0x470] sm:$0xff]  ;;  %v1688_v58 = vpack.c.bf16 %v225_v51, %v224_v50  ;;  %v242_v60 = vld [vmem:[%s2795_s1 + $0x680] sm:$0xff]  ;;  %vm961_vm1 = vcmask 523264   ;;  %s1137_s23 = sshll.u32 %s1846_s22, 4  ;;  %s1138_s23 = int_to_ptr.vmem [resolvable:$true] %s1137_s23 }
  0x5b   :  { %1683 = vmatpush3.bf16.msra.mxu1 %v1682_v40  ;;  %v177_v57 = vld [vmem:[%s2795_s1 + $0x478] sm:$0xff]  ;;  %v208_v45 = vld [vmem:[%s2795_s1 + $0x570] sm:$0xff]  ;;  %v243_v61 = vld [vmem:[%s2795_s1 + $0x688] sm:$0xff]  ;;  %v352_v0 = vcombine.high %v33_v33, %v33_v33  ;;  %v2538_v11 = vrot.slane %v33_v33, %v2043_v13  ;;  %s1794_s24 = scalar_lea.vmem %s1138_s23, 32  ;;  %p1799_p1 = scmp.lt.s32.totalorder %s1138_s23, %s1138_s23 }
  0x5c   :  { %1685 = vmatprep.subr.bf16.mxu1 %v1684_v47  ;;  %v209_v59 = vld [vmem:[%s2795_s1 + $0x578] sm:$0xff]  ;;  %v274_v62 = vld [vmem:[%s2795_s1 + $0x780] sm:$0xff]  ;;  %v275_v63 = vld [vmem:[%s2795_s1 + $0x788] sm:$0xff]  ;;  %v1658_v1 = vpack.c.bf16 %v177_v57, %v176_v56  ;;  %v1692_v3 = vpack.c.bf16 %v243_v61, %v242_v60  ;;  %p1795_p0 = scmp.ne.s32.totalorder %s1138_s23, %s1794_s24  ;;  %p1800_p2 = scmp.lt.s32.totalorder %s1794_s24, %s1794_s24 }
  0x5d   :  { %1655 = vmatpush3.bf16.msra.mxu0 %v1654_v53  ;;  %v1690_v2 = vpack.c.bf16 %v209_v59, %v208_v45  ;;  %v226_v4 = vld [vmem:[%s2795_s1 + $0x600] sm:$0xff]  ;;  %v227_v5 = vld [vmem:[%s2795_s1 + $0x608] sm:$0xff]  ;;  %v1724_v7 = vpack.c.bf16 %v275_v63, %v274_v62  ;;  %v244_v9 = vld [vmem:[%s2795_s1 + $0x690] sm:$0xff]  ;;  %v2547_v15 = vrot.slane %v352_v0, %v2043_v13  ;;  %v367_v25 = vcombine.high %v2538_v11, %v2538_v11 }
  0x5e   :  { %1657 = vmatprep.subr.bf16.mxu0 %v1656_v55  ;;  %v258_v6 = vld [vmem:[%s2795_s1 + $0x700] sm:$0xff]  ;;  %v259_v8 = vld [vmem:[%s2795_s1 + $0x708] sm:$0xff]  ;;  %v245_v10 = vld [vmem:[%s2795_s1 + $0x698] sm:$0xff]  ;;  %v1694_v16 = vpack.c.bf16 %v227_v5, %v226_v4  ;;  %p1801_p3 = por %p1800_p2, %p1799_p1 }
  0x5f   :  { %1687 = vmatpush3.bf16.msra.mxu1 %v1686_v54  ;;  %v276_v12 = vld [vmem:[%s2795_s1 + $0x790] sm:$0xff]  ;;  %v277_v14 = vld [vmem:[%s2795_s1 + $0x798] sm:$0xff]  ;;  %v1726_v17 = vpack.c.bf16 %v259_v8, %v258_v6  ;;  %v1696_v18 = vpack.c.bf16 %v245_v10, %v244_v9  ;;  %v246_v23 = vld [vmem:[%s2795_s1 + $0x6a0] sm:$0xff]  ;;  %v368_v28 = vcombine.high %v2547_v15, %v2547_v15 }
  0x60   :  { %1689 = vmatprep.subr.bf16.mxu1 %v1688_v58  ;;  %v228_v19 = vld [vmem:[%s2795_s1 + $0x610] sm:$0xff]  ;;  %v229_v20 = vld [vmem:[%s2795_s1 + $0x618] sm:$0xff]  ;;  %v1728_v13 = vpack.c.bf16 %v277_v14, %v276_v12  ;;  %v247_v24 = vld [vmem:[%s2795_s1 + $0x6a8] sm:$0xff]  ;;  %p1802_p4 = pnand %p1801_p3, %p1795_p0 }
  0x61   :  { %1659 = vmatpush3.bf16.msra.mxu0 %v1658_v1  ;;  %v260_v21 = vld [vmem:[%s2795_s1 + $0x710] sm:$0xff]  ;;  %v261_v22 = vld [vmem:[%s2795_s1 + $0x718] sm:$0xff]  ;;  %v278_v26 = vld [vmem:[%s2795_s1 + $0x7a0] sm:$0xff]  ;;  %v1698_v29 = vpack.c.bf16 %v229_v20, %v228_v19  ;;  %v1700_v31 = vpack.c.bf16 %v247_v24, %v246_v23 }
  0x62   :  { %1693 = vmatprep.subr.bf16.mxu0 %v1692_v3  ;;  %v279_v27 = vld [vmem:[%s2795_s1 + $0x7a8] sm:$0xff]  ;;  %v1730_v30 = vpack.c.bf16 %v261_v22, %v260_v21  ;;  %v262_v34 = vld [vmem:[%s2795_s1 + $0x720] sm:$0xff]  ;;  %v248_v36 = vld [vmem:[%s2795_s1 + $0x6b0] sm:$0xff] }
  0x63   :  { %1691 = vmatpush3.bf16.msra.mxu1 %v1690_v2  ;;  %v231_v32 = vld [vmem:[%s2795_s1 + $0x628] sm:$0xff]  ;;  %v1732_v35 = vpack.c.bf16 %v279_v27, %v278_v26  ;;  %v249_v37 = vld [vmem:[%s2795_s1 + $0x6b8] sm:$0xff]  ;;  %v280_v38 = vld [vmem:[%s2795_s1 + $0x7b0] sm:$0xff] }
  0x64   :  { %1725 = vmatprep.subr.bf16.mxu1 %v1724_v7  ;;  %730 = vmatmul.mubr.f32.vlgmr.msra.gmra.mrb[4].mxu0 %v2346_v42  ;;  %v230_v42 = vld [vmem:[%s2795_s1 + $0x620] sm:$0xff]  ;;  %v281_v39 = vld [vmem:[%s2795_s1 + $0x7b8] sm:$0xff]  ;;  %v1704_v43 = vpack.c.bf16 %v249_v37, %v248_v36  ;;  %v232_v44 = vld [vmem:[%s2795_s1 + $0x630] sm:$0xff] }
  0x65   :  { %1695 = vmatpush3.bf16.msra.mxu0 %v1694_v16  ;;  %869 = vmatprep.mubr.f32.mxu0 %v367_v25  ;;  %v1702_v40 = vpack.c.bf16 %v231_v32, %v230_v42  ;;  %v233_v46 = vld [vmem:[%s2795_s1 + $0x638] sm:$0xff]  ;;  %v264_v47 = vld [vmem:[%s2795_s1 + $0x730] sm:$0xff]  ;;  %v1736_v48 = vpack.c.bf16 %v281_v39, %v280_v38  ;;  %v250_v50 = vld [vmem:[%s2795_s1 + $0x6c0] sm:$0xff]  ;;  %v1843_v39 = vmov 0.0|0.0  }
  0x66   :  { %800 = vmatmul.mubr.f32.vlgmr.msra.gmra.mrb[4].mxu1 %v2367_v52  ;;  %1697 = vmatprep.subr.bf16.mxu0 %v1696_v18  ;;  %v263_v52 = vld [vmem:[%s2795_s1 + $0x728] sm:$0xff]  ;;  %v265_v49 = vld [vmem:[%s2795_s1 + $0x738] sm:$0xff]  ;;  %v282_v53 = vld [vmem:[%s2795_s1 + $0x7c0] sm:$0xff]  ;;  %v1706_v54 = vpack.c.bf16 %v233_v46, %v232_v44 }
  0x67   :  { %1727 = vmatpush3.bf16.msra.mxu1 %v1726_v17  ;;  %939 = vmatprep.mubr.f32.mxu1 %v368_v28  ;;  %v1734_v41 = vpack.c.bf16 %v263_v52, %v262_v34  ;;  %v251_v51 = vld [vmem:[%s2795_s1 + $0x6c8] sm:$0xff]  ;;  %v1738_v55 = vpack.c.bf16 %v265_v49, %v264_v47  ;;  %v234_v57 = vld [vmem:[%s2795_s1 + $0x640] sm:$0xff]  ;;  %v252_v61 = vld [vmem:[%s2795_s1 + $0x6d0] sm:$0xff] }
  0x68   :  { %1729 = vmatprep.subr.bf16.mxu1 %v1728_v13  ;;  %v283_v33 = vld [vmem:[%s2795_s1 + $0x7c8] sm:$0xff]  ;;  %v1708_v56 = vpack.c.bf16 %v251_v51, %v250_v50  ;;  %v266_v58 = vld [vmem:[%s2795_s1 + $0x740] sm:$0xff]  ;;  %v253_v62 = vld [vmem:[%s2795_s1 + $0x6d8] sm:$0xff] }
  0x69   :  { %1699 = vmatpush3.bf16.msra.mxu0 %v1698_v29  ;;  %v235_v45 = vld [vmem:[%s2795_s1 + $0x648] sm:$0xff]  ;;  %v1740_v59 = vpack.c.bf16 %v283_v33, %v282_v53  ;;  %v284_v63 = vld [vmem:[%s2795_s1 + $0x7d0] sm:$0xff]  ;;  %v285_v0 = vld [vmem:[%s2795_s1 + $0x7d8] sm:$0xff]  ;;  %v1712_v3 = vpack.c.bf16 %v253_v62, %v252_v61 }
  0x6a   :  { %1701 = vmatprep.subr.bf16.mxu0 %v1700_v31  ;;  %v267_v60 = vld [vmem:[%s2795_s1 + $0x748] sm:$0xff]  ;;  %v1710_v1 = vpack.c.bf16 %v235_v45, %v234_v57  ;;  %v236_v4 = vld [vmem:[%s2795_s1 + $0x650] sm:$0xff]  ;;  %v237_v5 = vld [vmem:[%s2795_s1 + $0x658] sm:$0xff]  ;;  %v1744_v7 = vpack.c.bf16 %v285_v0, %v284_v63 }
  0x6b   :  { %1731 = vmatpush3.bf16.msra.mxu1 %v1730_v30  ;;  %v1742_v2 = vpack.c.bf16 %v267_v60, %v266_v58  ;;  %v268_v6 = vld [vmem:[%s2795_s1 + $0x750] sm:$0xff]  ;;  %v269_v8 = vld [vmem:[%s2795_s1 + $0x758] sm:$0xff]  ;;  %v254_v9 = vld [vmem:[%s2795_s1 + $0x6e0] sm:$0xff]  ;;  %v1714_v16 = vpack.c.bf16 %v237_v5, %v236_v4  ;;  %v1845_v60 = vmov 0.0  }
  0x6c   :  { %1733 = vmatprep.subr.bf16.mxu1 %v1732_v35  ;;  %v255_v10 = vld [vmem:[%s2795_s1 + $0x6e8] sm:$0xff]  ;;  %v286_v12 = vld [vmem:[%s2795_s1 + $0x7e0] sm:$0xff]  ;;  %v1746_v17 = vpack.c.bf16 %v269_v8, %v268_v6  ;;  %v256_v23 = vld [vmem:[%s2795_s1 + $0x6f0] sm:$0xff] }
  0x6d   :  { %1703 = vmatpush3.bf16.msra.mxu0 %v1702_v40  ;;  %v287_v14 = vld [vmem:[%s2795_s1 + $0x7e8] sm:$0xff]  ;;  %v1716_v18 = vpack.c.bf16 %v255_v10, %v254_v9  ;;  %v238_v19 = vld [vmem:[%s2795_s1 + $0x660] sm:$0xff]  ;;  %v257_v24 = vld [vmem:[%s2795_s1 + $0x6f8] sm:$0xff] }
  0x6e   :  { %1705 = vmatprep.subr.bf16.mxu0 %v1704_v43  ;;  %v239_v20 = vld [vmem:[%s2795_s1 + $0x668] sm:$0xff]  ;;  %v270_v21 = vld [vmem:[%s2795_s1 + $0x760] sm:$0xff]  ;;  %v1748_v13 = vpack.c.bf16 %v287_v14, %v286_v12  ;;  %v288_v25 = vld [vmem:[%s2795_s1 + $0x7f0] sm:$0xff]  ;;  %v1720_v29 = vpack.c.bf16 %v257_v24, %v256_v23 }
  0x6f   :  { %1735 = vmatpush3.bf16.msra.mxu1 %v1734_v41  ;;  %v271_v22 = vld [vmem:[%s2795_s1 + $0x768] sm:$0xff]  ;;  %v289_v26 = vld [vmem:[%s2795_s1 + $0x7f8] sm:$0xff]  ;;  %v1718_v27 = vpack.c.bf16 %v239_v20, %v238_v19  ;;  %v240_v30 = vld [vmem:[%s2795_s1 + $0x670] sm:$0xff] }
  0x70   :  { %1737 = vmatprep.subr.bf16.mxu1 %v1736_v48  ;;  %v1750_v28 = vpack.c.bf16 %v271_v22, %v270_v21  ;;  %v241_v31 = vld [vmem:[%s2795_s1 + $0x678] sm:$0xff]  ;;  %v1752_v42 = vpack.c.bf16 %v289_v26, %v288_v25  ;;  %v272_v32 = vld [vmem:[%s2795_s1 + $0x770] sm:$0xff]  ;;  %v946_v36 = vld [vmem:[%s2797_s3] sm:$0xff] }
  0x71   :  { %1707 = vmatpush3.bf16.msra.mxu0 %v1706_v54  ;;  %v273_v34 = vld [vmem:[%s2795_s1 + $0x778] sm:$0xff]  ;;  %v1722_v35 = vpack.c.bf16 %v241_v31, %v240_v30  ;;  %v947_v37 = vld [vmem:[%s2797_s3 + $0x8] sm:$0xff]  ;;  %v1036_v38 = vld [vmem:[%s2799_s5] sm:$0xff] }
  0x72   :  { %1709 = vmatprep.subr.bf16.mxu0 %v1708_v56  ;;  %v1754_v52 = vpack.c.bf16 %v273_v34, %v272_v32  ;;  %v1757_v40 = vpack.c.bf16 %v947_v37, %v946_v36  ;;  %v949_v41 = vld [vmem:[%s2797_s3 + $0x18] sm:$0xff]  ;;  %v1038_v44 = vld [vmem:[%s2799_s5 + $0x10] sm:$0xff]  ;;  %v950_v49 = vld [vmem:[%s2797_s3 + $0x20] sm:$0xff] }
  0x73   :  { %1739 = vmatpush3.bf16.msra.mxu1 %v1738_v55  ;;  %v1039_v46 = vld [vmem:[%s2799_s5 + $0x18] sm:$0xff]  ;;  %v951_v50 = vld [vmem:[%s2797_s3 + $0x28] sm:$0xff]  ;;  %v1040_v51 = vld [vmem:[%s2799_s5 + $0x20] sm:$0xff] }
  0x74   :  { %1741 = vmatprep.subr.bf16.mxu1 %v1740_v59  ;;  %v1772_v48 = vpack.c.bf16 %v1039_v46, %v1038_v44  ;;  %v1763_v53 = vpack.c.bf16 %v951_v50, %v950_v49  ;;  %v1041_v33 = vld [vmem:[%s2799_s5 + $0x28] sm:$0xff]  ;;  %v952_v55 = vld [vmem:[%s2797_s3 + $0x30] sm:$0xff]  ;;  %v953_v56 = vld [vmem:[%s2797_s3 + $0x38] sm:$0xff] }
  0x75   :  { %1711 = vmatpush3.bf16.msra.mxu0 %v1710_v1  ;;  %v1775_v54 = vpack.c.bf16 %v1041_v33, %v1040_v51  ;;  %v1042_v57 = vld [vmem:[%s2799_s5 + $0x30] sm:$0xff]  ;;  %v1766_v45 = vpack.c.bf16 %v953_v56, %v952_v55  ;;  %v1043_v58 = vld [vmem:[%s2799_s5 + $0x38] sm:$0xff]  ;;  %v1159_v62 = vld [vmem:[%s2796_s2] ss:$0 sm:$0xff] }
  0x76   :  { %1713 = vmatprep.subr.bf16.mxu0 %v1712_v3  ;;  %v1778_v59 = vpack.c.bf16 %v1043_v58, %v1042_v57  ;;  %v1160_v32 = vld [vmem:[%s2798_s4] ss:$0 sm:$0xff] }
  0x77   :  { %1743 = vmatpush3.bf16.msra.mxu1 %v1742_v2  ;;  %v1162_v34 = vld [vmem:[%s2800_s6] ss:$0 sm:$0xff] }
  0x78   :  { %1745 = vmatprep.subr.bf16.mxu1 %v1744_v7 }
  0x79   :  { %1715 = vmatpush3.bf16.msra.mxu0 %v1714_v16 }
  0x7a   :  { %1717 = vmatprep.subr.bf16.mxu0 %v1716_v18 }
  0x7b   :  { %1747 = vmatpush3.bf16.msra.mxu1 %v1746_v17 }
  0x7c   :  { %1749 = vmatprep.subr.bf16.mxu1 %v1748_v13 }
  0x7d   :  { %1719 = vmatpush3.bf16.msra.mxu0 %v1718_v27 }
  0x7e   :  { %1721 = vmatprep.subr.bf16.mxu0 %v1720_v29 }
  0x7f   :  { %1751 = vmatpush3.bf16.msra.mxu1 %v1750_v28 }
  0x80   :  { %1753 = vmatprep.subr.bf16.mxu1 %v1752_v42 }
  0x81   :  { %1723 = vmatpush3.bf16.msra.mxu0 %v1722_v35 }
  0x82   :  { %1756 = vmatprep.subr.bf16.mxu0 %v1843_v39 }
  0x83   :  { %1755 = vmatpush3.bf16.msra.mxu1 %v1754_v52 }
  0x84   :  { %870 = vmatmul.mubr.f32.vlgmr.msra.gmra.mrb[6].mxu0 %v2538_v11  ;;  %1768 = vmatprep.subr.bf16.mxu1 %v1843_v39  ;;  %v1037_v11 = vld [vmem:[%s2799_s5 + $0x8] sm:$0xff] }
  0x85   :  { %v1769_v43 = vpack.c.bf16 %v1037_v11, %v1036_v38  ;;  %1758 = vmatpush3.bf16.msra.mxu0 %v1757_v40  ;;  %1478 = vmatprep.mubr.msk.f32.mxu0 %vm1844_vm0, %v1845_v60 }
  0x86   :  { %940 = vmatmul.mubr.f32.vlgmr.msra.gmra.mrb[6].mxu1 %v2547_v15  ;;  %v948_v15 = vld [vmem:[%s2797_s3 + $0x10] sm:$0xff]  ;;  %1759 = vmatprep.subr.bf16.mxu0 %v1843_v39 }
  0x87   :  { %v1760_v47 = vpack.c.bf16 %v949_v41, %v948_v15  ;;  %1770 = vmatpush3.bf16.msra.mxu1 %v1769_v43  ;;  %1497 = vmatprep.mubr.msk.f32.mxu1 %vm1844_vm0, %v1845_v60 }
  0x88   :  { %1771 = vmatprep.subr.bf16.mxu1 %v1843_v39 }
  0x89   :  { %1761 = vmatpush3.bf16.msra.mxu0 %v1760_v47 }
  0x8a   :  { %1762 = vmatprep.subr.bf16.mxu0 %v1843_v39 }
  0x8b   :  { %1773 = vmatpush3.bf16.msra.mxu1 %v1772_v48 }
  0x8c   :  { %1774 = vmatprep.subr.bf16.mxu1 %v1843_v39 }
  0x8d   :  { %1764 = vmatpush3.bf16.msra.mxu0 %v1763_v53 }
  0x8e   :  { %1765 = vmatprep.subr.bf16.mxu0 %v1843_v39 }
  0x8f   :  { %1776 = vmatpush3.bf16.msra.mxu1 %v1775_v54 }
  0x90   :  { %1777 = vmatprep.subr.bf16.mxu1 %v1843_v39 }
  0x91   :  { %1767 = vmatpush3.bf16.msra.mxu0 %v1766_v45 }
  0x93   :  { %1779 = vmatpush3.bf16.msra.mxu1 %v1778_v59 }
  0xf7   :  { %v1196_v61 = vpop.f32.mrb[0].mxu0 }
  0xf8   :  { %v1197_v63 = vpop.f32.mrb[1].mxu0 }
  0xf9   :  { %v1231_v0 = vpop.f32.mrb[0].mxu1  ;;  %v1198_v1 = vadd.f32 %v1197_v63, %v1196_v61 }
  0xfa   :  { %v1232_v2 = vpop.f32.mrb[1].mxu1 }
  0xfb   :  { %v1233_v3 = vadd.f32 %v1232_v2, %v1231_v0  ;;  %v452_v4 = vadd.f32 %v1198_v1, %v1159_v62 }
  0xfd   :  { %v522_v5 = vadd.f32 %v1233_v3, %v452_v4 }
 0x117   :  { %v1266_v6 = vpop.f32.mrb[2].mxu0 }
 0x118   :  { %v1267_v7 = vpop.f32.mrb[3].mxu0 }
 0x119   :  { %v1301_v8 = vpop.f32.mrb[2].mxu1  ;;  %v1268_v9 = vadd.f32 %v1267_v7, %v1266_v6 }
 0x11a   :  { %v1302_v10 = vpop.f32.mrb[3].mxu1 }
 0x11b   :  { %v1303_v12 = vadd.f32 %v1302_v10, %v1301_v8  ;;  %v592_v14 = vadd.f32 %v1268_v9, %v522_v5 }
 0x11d   :  { %v662_v16 = vadd.f32 %v1303_v12, %v592_v14 }
 0x137   :  { %v1336_v17 = vpop.f32.mrb[4].mxu0 }
 0x138   :  { %v1337_v18 = vpop.f32.mrb[5].mxu0 }
 0x139   :  { %v1371_v19 = vpop.f32.mrb[4].mxu1  ;;  %v1338_v20 = vadd.f32 %v1337_v18, %v1336_v17 }
 0x13a   :  { %v1372_v21 = vpop.f32.mrb[5].mxu1 }
 0x13b   :  { %v1373_v13 = vadd.f32 %v1372_v21, %v1371_v19  ;;  %v732_v22 = vadd.f32 %v1338_v20, %v662_v16 }
 0x13d   :  { %v802_v23 = vadd.f32 %v1373_v13, %v732_v22 }
 0x157   :  { %v1406_v24 = vpop.f32.mrb[6].mxu0 }
 0x158   :  { %v1407_v25 = vpop.f32.mrb[7].mxu0 }
 0x159   :  { %v1441_v26 = vpop.f32.mrb[6].mxu1  ;;  %v1408_v27 = vadd.f32 %v1407_v25, %v1406_v24 }
 0x15a   :  { %v1442_v28 = vpop.f32.mrb[7].mxu1 }
 0x15b   :  { %v1443_v29 = vadd.f32 %v1442_v28, %v1441_v26  ;;  %v872_v30 = vadd.f32 %v1408_v27, %v802_v23 }
 0x15d   :  { %v942_v31 = vadd.f32 %v1443_v29, %v872_v30 }
 0x15f   :  { %v945_v42 = vmax.f32 %v942_v31, 0.0 }
 0x161   :  { %1479 = vmatmul.mubr.msk.f32.vlgmr.msra.gmra.mrb[8].mxu0 %vm961_vm1, %v945_v42  ;;  %1498 = vmatmul.mubr.msk.f32.vlgmr.msra.gmra.mrb[8].mxu1 %vm961_vm1, %v945_v42 }
 0x234   :  { %v1031_v35 = vpop.f32.mrb[8].mxu0  ;;  %v1117_v52 = vpop.f32.mrb[8].mxu1 }
 0x235   :  { %v1032_v36 = vadd.f32 %v1160_v32, %v1031_v35  ;;  %v1118_v37 = vadd.f32 %v1162_v34, %v1117_v52  ;;  %v1480_v38 = vpop.f32.mrb[9].mxu0  ;;  %v1499_v39 = vpop.f32.mrb[9].mxu1 }
 0x237   :  { %1035 = vst [vmem:[#allocation2] sm:$0x3] %v1032_v36  ;;  %v1122_v40 = vmin.f32 %v1118_v37, 20.0 }
 0x238   :  { %1805 = shalt.err (!%p1802_p4)
}
 0x239   :  { %s1806_s25 = scalar_lea.hbm %s2801_s7, 32 }
 0x23a   :  { %p1807_p5 = scmp.ne.s32.totalorder %s2801_s7, %s1806_s25  ;;  %p1810_p6 = scmp.lt.u32.totalorder %s1806_s25, %s2801_s7 }
 0x23c   :  { %p1812_p7 = pnand %p1810_p6, %p1807_p5 }
 0x23e   :  { %1815 = shalt.err (!%p1812_p7)
}
 0x23f   :  { %1140 = dma.vmem_to_hbm [thread:$0]  %s1138_s23, 32, %s2801_s7, [#allocation3]   ;;  %v1123_v11 = vmul.f32 1.442695, %v1122_v40  ;;  %vm1121_vm2 = vcmp.gt.f32.partialorder %v1118_v37, 20.0 }
 0x240   :  { %s1847_s10 = smov [#allocation4]  }
 0x241   :  { %1790 = vpow2.f32 %v1123_v11  ;;  %s1147_s11 = sshll.u32 %s1847_s10, 4  ;;  %s1148_s11 = int_to_ptr.vmem [resolvable:$true] %s1147_s11 }
 0x242   :  { %s1816_s12 = scalar_lea.vmem %s1148_s11, 32  ;;  %p1821_p9 = scmp.lt.s32.totalorder %s1148_s11, %s1148_s11 }
 0x243   :  { %p1817_p8 = scmp.ne.s32.totalorder %s1148_s11, %s1816_s12  ;;  %p1822_p10 = scmp.lt.s32.totalorder %s1816_s12, %s1816_s12 }
 0x245   :  { %p1823_p11 = por %p1822_p10, %p1821_p9 }
 0x247   :  { %p1824_p12 = pnand %p1823_p11, %p1817_p8 }
 0x24b   :  { %v1791_v15 = vpop.eup %1790 }
 0x24c   :  { %v1125_v41 = vadd.f32 1.0, %v1791_v15 }
 0x24e   :  { %1792 = vlog2.f32 %v1125_v41 }
 0x258   :  { %v1793_v43 = vpop.eup %1792 }
 0x259   :  { %v1127_v44 = vmul.f32 0.6931472, %v1793_v43 }
 0x25b   :  { %v1128_v46 = vsel %vm1121_vm2, %v1118_v37, %v1127_v44 }
 0x25c   :  { %v1129_v47 = vmax.f32 %v1128_v46, 0.001 }
 0x25e   :  { %1130 = vst [vmem:[#allocation4] sm:$0x3] %v1129_v47 }
 0x25f   :  { %1827 = shalt.err (!%p1824_p12)
}
 0x260   :  { %s1828_s14 = scalar_lea.hbm %s2802_s8, 32 }
 0x261   :  { %p1829_p13 = scmp.ne.s32.totalorder %s2802_s8, %s1828_s14  ;;  %p1832_p0 = scmp.lt.u32.totalorder %s1828_s14, %s2802_s8 }
 0x263   :  { %p1834_p1 = pnand %p1832_p0, %p1829_p13 }
 0x265   :  { %1837 = shalt.err (!%p1834_p1)
}
 0x266   :  { %1150 = dma.vmem_to_hbm [thread:$0]  %s1148_s11, 32, %s2802_s8, [#allocation5]  }
 0x267   :  { %1838 = dma.done.wait [#allocation3], 32  }
 0x268   :  { %1839 = vsyncadd [#allocation3], 4294967264 }
 0x269   :  { %1840 = dma.done.wait [#allocation5], 32  }
 0x26a   :  { %1841 = vsyncadd [#allocation5], 4294967264 }
 0x26b   :  { %1157 = vsyncpa [#allocation3], 1 }
 0x26c   :  { %1158 = vsyncpa [#allocation5], 1 }

</bundles_post_ra>
